<compile_context>
chip_gen: v5e
topology: v5e:2x2
jax: 0.10.0
libtpu: 0.0.40
codegen_flags: <defaults>
</compile_context>

<pallas_src>
import jax
import jax.numpy as jnp
import numpy as np
from jax.experimental import pallas as pl
from jax.experimental.pallas import tpu as pltpu

B = 4            # batch (== LSTM time axis, since batch_first=False)
L = 16           # sequence length (== LSTM "batch" axis)
BL = B * L
H = 50           # hidden_size
HP = 128         # hidden_size padded so each gate sits on a 128-lane tile
G4 = 4 * HP
C1 = 16          # conv hidden channels
K = 7            # window_size of DeepTrendDecomposer
PAD = (K - 1) // 2


def _shift_rows(a, s, mask_col):
    """out[p, :] = a[p + s, :] if 0 <= (p % L) + s < L else 0.   a: (BL, C)."""
    if s == 0:
        return a
    n, c = a.shape
    if s > 0:
        sh = jnp.concatenate([a[s:, :], jnp.zeros((s, c), a.dtype)], axis=0)
    else:
        sh = jnp.concatenate([jnp.zeros((-s, c), a.dtype), a[:n + s, :]], axis=0)
    return sh * mask_col


def trend_lstm_kernel(xcol_ref, mask_ref, w1_ref, b1_ref, w2_ref, b2_ref,
                      wih_ref, bls_ref, whhT_ref, wlin_ref, blin_ref,
                      out_ref):
    f32 = jnp.float32
    x_col = xcol_ref[...]                                    # (BL, 1)
    masks = mask_ref[...]                                    # (BL, K)

    # ---- DeepTrendDecomposer -----------------------------------------------
    # conv1: Conv1d(1 -> 16, k=7, 'same') + ReLU  == one MXU matmul on im2col
    xcol = jnp.concatenate(
        [_shift_rows(x_col, k - PAD, masks[:, k:k + 1]) for k in range(K)],
        axis=1)                                              # (BL, K)
    h1 = jnp.maximum(
        jnp.dot(xcol, w1_ref[...], preferred_element_type=f32) + b1_ref[...],
        0.0)                                                 # (BL, C1)

    # conv2: Conv1d(16 -> 1, k=7, 'same')  == vector multiply + lane reduction
    h1col = jnp.concatenate(
        [_shift_rows(h1, k - PAD, masks[:, k:k + 1]) for k in range(K)],
        axis=1)                                              # (BL, K*C1)
    trend_col = (jnp.sum(h1col * w2_ref[...], axis=1, keepdims=True)
                 + b2_ref[0])                                # (BL, 1)
    residual_col = x_col - trend_col                         # (BL, 1)

    # ---- nn.LSTM(1, H), batch_first=False: time axis = B, "batch" axis = L --
    # Input+bias gate pre-activations (independent of h/c) computed up front,
    # in vregs, so they sit off the serial recurrent chain.
    wih = wih_ref[...]                                       # (1, 4*HP)
    bls = bls_ref[...]                                       # (1, 4*HP)
    gate_x = [residual_col[t * L:(t + 1) * L, :] * wih + bls  # (L, 4*HP) each
              for t in range(B)]

    whhT = whhT_ref[...]                                     # (HP, 4*HP)
    h = jnp.zeros((L, HP), f32)
    c = jnp.zeros((L, HP), f32)
    last_rows = []
    for t in range(B):
        # one fused gate matmul per time step, gates on aligned 128-lane tiles
        gates = gate_x[t] + jnp.dot(h, whhT,
                                    preferred_element_type=f32)   # (L, 4*HP)
        i_g = jax.nn.sigmoid(gates[:, 0 * HP:1 * HP])
        f_g = jax.nn.sigmoid(gates[:, 1 * HP:2 * HP])
        g_g = jnp.tanh(gates[:, 2 * HP:3 * HP])
        o_g = jax.nn.sigmoid(gates[:, 3 * HP:4 * HP])
        c = f_g * c + i_g * g_g
        h = o_g * jnp.tanh(c)
        last_rows.append(h[L - 1:L, :])                      # lstm_out[t, -1, :]

    # ---- Linear(H, 1) on lstm_out[:, -1, :]  +  (B,1,1)+(B,1) broadcast -----
    wlin = wlin_ref[...]                                     # (1, HP)
    pred_row = jnp.concatenate(
        [jnp.sum(r * wlin, axis=1, keepdims=True) for r in last_rows],
        axis=1) + blin_ref[0]                                # (1, B)
    trend_last = jnp.concatenate(
        [trend_col[t * L + L - 1:t * L + L, :] for t in range(B)],
        axis=0)                                              # (B, 1)
    out_ref[...] = trend_last + pred_row                     # (B, B)


def trend_aware_lstm(x, params):
    (w1, b1, w2, b2, Wih, Whh, bih, bhh, Wlin, blin) = params
    f32 = jnp.float32
    x_col = x.reshape(BL, 1).astype(f32)                     # flat p = b*L + l

    # ---- parameter re-layout (host glue, done once) ----
    w1kT = jnp.transpose(w1[:, 0, :]).astype(f32)            # (K, C1)
    b1row = b1.reshape(1, C1).astype(f32)                    # (1, C1)
    w2row = jnp.transpose(w2[0]).reshape(1, K * C1).astype(f32)  # [0, k*C1+c]
    b2s = b2.astype(f32)                                     # (1,)

    bsum = (bih + bhh).astype(f32)
    wih_row = jnp.zeros((1, G4), f32)
    bls_row = jnp.zeros((1, G4), f32)
    whhT = jnp.zeros((HP, G4), f32)
    for g in range(4):                                       # gate order i,f,g,o
        wih_row = wih_row.at[0, g * HP:g * HP + H].set(Wih[g * H:(g + 1) * H, 0])
        bls_row = bls_row.at[0, g * HP:g * HP + H].set(bsum[g * H:(g + 1) * H])
        whhT = whhT.at[:H, g * HP:g * HP + H].set(
            jnp.transpose(Whh[g * H:(g + 1) * H, :]))
    wlin_row = jnp.zeros((1, HP), f32).at[0, :H].set(Wlin[0, :])
    blin_s = blin.astype(f32)                                # (1,)

    # per-tap validity masks for 'same' padding at batch boundaries (constants)
    pos = np.arange(BL) % L
    masks = np.stack(
        [((pos + (k - PAD) >= 0) & (pos + (k - PAD) < L)) for k in range(K)],
        axis=1).astype(np.float32)                           # (BL, K)
    masks = jnp.asarray(masks)

    vmem = pl.BlockSpec(memory_space=pltpu.MemorySpace.VMEM)
    smem = pl.BlockSpec(memory_space=pltpu.MemorySpace.SMEM)

    out = pl.pallas_call(
        trend_lstm_kernel,
        out_shape=jax.ShapeDtypeStruct((B, B), jnp.float32),
        in_specs=[vmem, vmem, vmem, vmem, vmem, smem,
                  vmem, vmem, vmem, vmem, smem],
        out_specs=vmem,
    )(x_col, masks, w1kT, b1row, w2row, b2s,
      wih_row, bls_row, whhT, wlin_row, blin_s)

    # torch broadcast quirk: (B,1,1) + (B,1) -> (B, B, 1)
    return out.reshape(B, B, 1)


# -------- pure-JAX reference mirroring the PyTorch forward exactly --------
def reference_forward(x, params):
    (w1, b1, w2, b2, Wih, Whh, bih, bhh, Wlin, blin) = params
    xp = jnp.transpose(x, (0, 2, 1))                       # (B, 1, L)

    def conv1d_same(inp, w, b):                            # inp (B,Cin,L), w (Cout,Cin,K)
        Kc = w.shape[2]
        pad = (Kc - 1) // 2
        Lc = inp.shape[2]
        ip = jnp.pad(inp, ((0, 0), (0, 0), (pad, pad)))
        out = jnp.zeros((inp.shape[0], w.shape[0], Lc), jnp.float32)
        for k in range(Kc):
            out = out + jnp.einsum('oc,bcl->bol', w[:, :, k], ip[:, :, k:k + Lc])
        return out + b[None, :, None]

    hmid = jax.nn.relu(conv1d_same(xp, w1, b1))
    trend = conv1d_same(hmid, w2, b2)                      # (B, 1, L)
    residual = xp - trend
    trend_p = jnp.transpose(trend, (0, 2, 1))              # (B, L, 1)
    residual_p = jnp.transpose(residual, (0, 2, 1))        # (B, L, 1)

    def step(carry, x_t):                                  # x_t (L, 1)
        hh, cc = carry
        gates = x_t @ Wih.T + hh @ Whh.T + bih + bhh       # (L, 4H)
        i = jax.nn.sigmoid(gates[:, :H])
        f = jax.nn.sigmoid(gates[:, H:2 * H])
        g = jnp.tanh(gates[:, 2 * H:3 * H])
        o = jax.nn.sigmoid(gates[:, 3 * H:])
        cc = f * cc + i * g
        hh = o * jnp.tanh(cc)
        return (hh, cc), hh

    init = (jnp.zeros((L, H), jnp.float32), jnp.zeros((L, H), jnp.float32))
    _, outs = jax.lax.scan(step, init, residual_p)         # (B, L, H)
    pred_residual = outs[:, -1, :] @ Wlin.T + blin         # (B, 1)
    pred_trend = trend_p[:, -1][..., None]                 # (B, 1, 1)
    return pred_trend + pred_residual                      # (B, B, 1)


if __name__ == "__main__":
    key = jax.random.PRNGKey(0)
    keys = jax.random.split(key, 11)
    x = jax.random.normal(keys[0], (B, L, 1), jnp.float32)

    s = 0.2
    w1 = s * jax.random.normal(keys[1], (C1, 1, K), jnp.float32)
    b1 = s * jax.random.normal(keys[2], (C1,), jnp.float32)
    w2 = s * jax.random.normal(keys[3], (1, C1, K), jnp.float32)
    b2 = s * jax.random.normal(keys[4], (1,), jnp.float32)
    Wih = s * jax.random.normal(keys[5], (4 * H, 1), jnp.float32)
    Whh = s * jax.random.normal(keys[6], (4 * H, H), jnp.float32)
    bih = s * jax.random.normal(keys[7], (4 * H,), jnp.float32)
    bhh = s * jax.random.normal(keys[8], (4 * H,), jnp.float32)
    Wlin = s * jax.random.normal(keys[9], (1, H), jnp.float32)
    blin = s * jax.random.normal(keys[10], (1,), jnp.float32)
    params = (w1, b1, w2, b2, Wih, Whh, bih, bhh, Wlin, blin)

    out = jax.block_until_ready(trend_aware_lstm(x, params))
    ref = jax.block_until_ready(reference_forward(x, params))

    assert out.shape == (B, B, 1)   # PyTorch's (B,1,1)+(B,1) broadcast quirk
    np.testing.assert_allclose(np.asarray(out), np.asarray(ref), rtol=1e-4, atol=1e-4)
    print("KERNEL_OK")
</pallas_src>

<mosaic_0001>
module attributes {stable_mosaic.version = 11 : i64} {
  func.func @trend_lstm_kernel(%arg0: memref<64x1xf32, #tpu.memory_space<vmem>>, %arg1: memref<64x7xf32, #tpu.memory_space<vmem>>, %arg2: memref<7x16xf32, #tpu.memory_space<vmem>>, %arg3: memref<1x16xf32, #tpu.memory_space<vmem>>, %arg4: memref<1x112xf32, #tpu.memory_space<vmem>>, %arg5: memref<1xf32, #tpu.memory_space<smem>>, %arg6: memref<1x512xf32, #tpu.memory_space<vmem>>, %arg7: memref<1x512xf32, #tpu.memory_space<vmem>>, %arg8: memref<128x512xf32, #tpu.memory_space<vmem>>, %arg9: memref<1x128xf32, #tpu.memory_space<vmem>>, %arg10: memref<1xf32, #tpu.memory_space<smem>>, %arg11: memref<4x4xf32, #tpu.memory_space<vmem>>) attributes {dimension_semantics = [], scalar_prefetch = 0 : i64, scratch_operands = 0 : i64, tpu.core_type = #tpu.core_type<tc>} {
    %c0 = arith.constant 0 : index
    %c0_0 = arith.constant 0 : index
    %0 = vector.load %arg0[%c0, %c0_0] : memref<64x1xf32, #tpu.memory_space<vmem>>, vector<64x1xf32>
    %c0_1 = arith.constant 0 : index
    %c0_2 = arith.constant 0 : index
    %1 = vector.load %arg1[%c0_1, %c0_2] : memref<64x7xf32, #tpu.memory_space<vmem>>, vector<64x7xf32>
    %2 = vector.extract_strided_slice %1 {offsets = [0, 0], sizes = [64, 1], strides = [1, 1]} : vector<64x7xf32> to vector<64x1xf32>
    %cst = arith.constant 0.000000e+00 : f32
    %3 = vector.broadcast %cst : f32 to vector<3x1xf32>
    %4 = vector.extract_strided_slice %0 {offsets = [0, 0], sizes = [61, 1], strides = [1, 1]} : vector<64x1xf32> to vector<61x1xf32>
    %5 = tpu.concatenate %3, %4 in 0 : vector<3x1xf32>, vector<61x1xf32> -> vector<64x1xf32>
    %6 = arith.mulf %5, %2 : vector<64x1xf32>
    %7 = vector.extract_strided_slice %1 {offsets = [0, 1], sizes = [64, 1], strides = [1, 1]} : vector<64x7xf32> to vector<64x1xf32>
    %cst_3 = arith.constant 0.000000e+00 : f32
    %8 = vector.broadcast %cst_3 : f32 to vector<2x1xf32>
    %9 = vector.extract_strided_slice %0 {offsets = [0, 0], sizes = [62, 1], strides = [1, 1]} : vector<64x1xf32> to vector<62x1xf32>
    %10 = tpu.concatenate %8, %9 in 0 : vector<2x1xf32>, vector<62x1xf32> -> vector<64x1xf32>
    %11 = arith.mulf %10, %7 : vector<64x1xf32>
    %12 = vector.extract_strided_slice %1 {offsets = [0, 2], sizes = [64, 1], strides = [1, 1]} : vector<64x7xf32> to vector<64x1xf32>
    %cst_4 = arith.constant 0.000000e+00 : f32
    %13 = vector.broadcast %cst_4 : f32 to vector<1x1xf32>
    %14 = vector.extract_strided_slice %0 {offsets = [0, 0], sizes = [63, 1], strides = [1, 1]} : vector<64x1xf32> to vector<63x1xf32>
    %15 = tpu.concatenate %13, %14 in 0 : vector<1x1xf32>, vector<63x1xf32> -> vector<64x1xf32>
    %16 = arith.mulf %15, %12 : vector<64x1xf32>
    %17 = vector.extract_strided_slice %1 {offsets = [0, 4], sizes = [64, 1], strides = [1, 1]} : vector<64x7xf32> to vector<64x1xf32>
    %18 = vector.extract_strided_slice %0 {offsets = [1, 0], sizes = [63, 1], strides = [1, 1]} : vector<64x1xf32> to vector<63x1xf32>
    %cst_5 = arith.constant 0.000000e+00 : f32
    %19 = vector.broadcast %cst_5 : f32 to vector<1x1xf32>
    %20 = tpu.concatenate %18, %19 in 0 : vector<63x1xf32>, vector<1x1xf32> -> vector<64x1xf32>
    %21 = arith.mulf %20, %17 : vector<64x1xf32>
    %22 = vector.extract_strided_slice %1 {offsets = [0, 5], sizes = [64, 1], strides = [1, 1]} : vector<64x7xf32> to vector<64x1xf32>
    %23 = vector.extract_strided_slice %0 {offsets = [2, 0], sizes = [62, 1], strides = [1, 1]} : vector<64x1xf32> to vector<62x1xf32>
    %cst_6 = arith.constant 0.000000e+00 : f32
    %24 = vector.broadcast %cst_6 : f32 to vector<2x1xf32>
    %25 = tpu.concatenate %23, %24 in 0 : vector<62x1xf32>, vector<2x1xf32> -> vector<64x1xf32>
    %26 = arith.mulf %25, %22 : vector<64x1xf32>
    %27 = vector.extract_strided_slice %1 {offsets = [0, 6], sizes = [64, 1], strides = [1, 1]} : vector<64x7xf32> to vector<64x1xf32>
    %28 = vector.extract_strided_slice %0 {offsets = [3, 0], sizes = [61, 1], strides = [1, 1]} : vector<64x1xf32> to vector<61x1xf32>
    %cst_7 = arith.constant 0.000000e+00 : f32
    %29 = vector.broadcast %cst_7 : f32 to vector<3x1xf32>
    %30 = tpu.concatenate %28, %29 in 0 : vector<61x1xf32>, vector<3x1xf32> -> vector<64x1xf32>
    %31 = arith.mulf %30, %27 : vector<64x1xf32>
    %32 = tpu.concatenate %6, %11, %16, %0, %21, %26, %31 in 1 : vector<64x1xf32>, vector<64x1xf32>, vector<64x1xf32>, vector<64x1xf32>, vector<64x1xf32>, vector<64x1xf32>, vector<64x1xf32> -> vector<64x7xf32>
    %c0_8 = arith.constant 0 : index
    %c0_9 = arith.constant 0 : index
    %33 = vector.load %arg2[%c0_8, %c0_9] : memref<7x16xf32, #tpu.memory_space<vmem>>, vector<7x16xf32>
    %cst_10 = arith.constant dense<0.000000e+00> : vector<64x16xf32>
    %34 = tpu.matmul %32, %33, %cst_10 {dimension_numbers = #tpu.dot_dimension_numbers<[1], [0], [0], [1], [0, 0, 1, 1], [], []>} : vector<64x7xf32>, vector<7x16xf32>, vector<64x16xf32> -> vector<64x16xf32>
    %c0_11 = arith.constant 0 : index
    %c0_12 = arith.constant 0 : index
    %35 = vector.load %arg3[%c0_11, %c0_12] : memref<1x16xf32, #tpu.memory_space<vmem>>, vector<1x16xf32>
    %36 = vector.broadcast %35 : vector<1x16xf32> to vector<64x16xf32>
    %37 = arith.addf %34, %36 : vector<64x16xf32>
    %cst_13 = arith.constant 0.000000e+00 : f32
    %38 = vector.broadcast %cst_13 : f32 to vector<64x16xf32>
    %39 = arith.maximumf %37, %38 : vector<64x16xf32>
    %40 = vector.extract_strided_slice %1 {offsets = [0, 0], sizes = [64, 1], strides = [1, 1]} : vector<64x7xf32> to vector<64x1xf32>
    %cst_14 = arith.constant 0.000000e+00 : f32
    %41 = vector.broadcast %cst_14 : f32 to vector<3x16xf32>
    %42 = vector.extract_strided_slice %39 {offsets = [0, 0], sizes = [61, 16], strides = [1, 1]} : vector<64x16xf32> to vector<61x16xf32>
    %43 = tpu.concatenate %41, %42 in 0 : vector<3x16xf32>, vector<61x16xf32> -> vector<64x16xf32>
    %44 = vector.broadcast %40 : vector<64x1xf32> to vector<64x16xf32>
    %45 = arith.mulf %43, %44 : vector<64x16xf32>
    %46 = vector.extract_strided_slice %1 {offsets = [0, 1], sizes = [64, 1], strides = [1, 1]} : vector<64x7xf32> to vector<64x1xf32>
    %cst_15 = arith.constant 0.000000e+00 : f32
    %47 = vector.broadcast %cst_15 : f32 to vector<2x16xf32>
    %48 = vector.extract_strided_slice %39 {offsets = [0, 0], sizes = [62, 16], strides = [1, 1]} : vector<64x16xf32> to vector<62x16xf32>
    %49 = tpu.concatenate %47, %48 in 0 : vector<2x16xf32>, vector<62x16xf32> -> vector<64x16xf32>
    %50 = vector.broadcast %46 : vector<64x1xf32> to vector<64x16xf32>
    %51 = arith.mulf %49, %50 : vector<64x16xf32>
    %52 = vector.extract_strided_slice %1 {offsets = [0, 2], sizes = [64, 1], strides = [1, 1]} : vector<64x7xf32> to vector<64x1xf32>
    %cst_16 = arith.constant 0.000000e+00 : f32
    %53 = vector.broadcast %cst_16 : f32 to vector<1x16xf32>
    %54 = vector.extract_strided_slice %39 {offsets = [0, 0], sizes = [63, 16], strides = [1, 1]} : vector<64x16xf32> to vector<63x16xf32>
    %55 = tpu.concatenate %53, %54 in 0 : vector<1x16xf32>, vector<63x16xf32> -> vector<64x16xf32>
    %56 = vector.broadcast %52 : vector<64x1xf32> to vector<64x16xf32>
    %57 = arith.mulf %55, %56 : vector<64x16xf32>
    %58 = vector.extract_strided_slice %1 {offsets = [0, 4], sizes = [64, 1], strides = [1, 1]} : vector<64x7xf32> to vector<64x1xf32>
    %59 = vector.extract_strided_slice %39 {offsets = [1, 0], sizes = [63, 16], strides = [1, 1]} : vector<64x16xf32> to vector<63x16xf32>
    %cst_17 = arith.constant 0.000000e+00 : f32
    %60 = vector.broadcast %cst_17 : f32 to vector<1x16xf32>
    %61 = tpu.concatenate %59, %60 in 0 : vector<63x16xf32>, vector<1x16xf32> -> vector<64x16xf32>
    %62 = vector.broadcast %58 : vector<64x1xf32> to vector<64x16xf32>
    %63 = arith.mulf %61, %62 : vector<64x16xf32>
    %64 = vector.extract_strided_slice %1 {offsets = [0, 5], sizes = [64, 1], strides = [1, 1]} : vector<64x7xf32> to vector<64x1xf32>
    %65 = vector.extract_strided_slice %39 {offsets = [2, 0], sizes = [62, 16], strides = [1, 1]} : vector<64x16xf32> to vector<62x16xf32>
    %cst_18 = arith.constant 0.000000e+00 : f32
    %66 = vector.broadcast %cst_18 : f32 to vector<2x16xf32>
    %67 = tpu.concatenate %65, %66 in 0 : vector<62x16xf32>, vector<2x16xf32> -> vector<64x16xf32>
    %68 = vector.broadcast %64 : vector<64x1xf32> to vector<64x16xf32>
    %69 = arith.mulf %67, %68 : vector<64x16xf32>
    %70 = vector.extract_strided_slice %1 {offsets = [0, 6], sizes = [64, 1], strides = [1, 1]} : vector<64x7xf32> to vector<64x1xf32>
    %71 = vector.extract_strided_slice %39 {offsets = [3, 0], sizes = [61, 16], strides = [1, 1]} : vector<64x16xf32> to vector<61x16xf32>
    %cst_19 = arith.constant 0.000000e+00 : f32
    %72 = vector.broadcast %cst_19 : f32 to vector<3x16xf32>
    %73 = tpu.concatenate %71, %72 in 0 : vector<61x16xf32>, vector<3x16xf32> -> vector<64x16xf32>
    %74 = vector.broadcast %70 : vector<64x1xf32> to vector<64x16xf32>
    %75 = arith.mulf %73, %74 : vector<64x16xf32>
    %76 = tpu.concatenate %45, %51, %57, %39, %63, %69, %75 in 1 : vector<64x16xf32>, vector<64x16xf32>, vector<64x16xf32>, vector<64x16xf32>, vector<64x16xf32>, vector<64x16xf32>, vector<64x16xf32> -> vector<64x112xf32>
    %c0_20 = arith.constant 0 : index
    %c0_21 = arith.constant 0 : index
    %77 = vector.load %arg4[%c0_20, %c0_21] : memref<1x112xf32, #tpu.memory_space<vmem>>, vector<1x112xf32>
    %78 = vector.broadcast %77 : vector<1x112xf32> to vector<64x112xf32>
    %79 = arith.mulf %76, %78 : vector<64x112xf32>
    %cst_22 = arith.constant dense<0.000000e+00> : vector<64xf32>
    %80 = vector.multi_reduction <add>, %79, %cst_22 [1] : vector<64x112xf32> to vector<64xf32>
    %81 = vector.shape_cast %80 : vector<64xf32> to vector<64x1xf32>
    %c0_23 = arith.constant 0 : index
    %82 = memref.load %arg5[%c0_23] : memref<1xf32, #tpu.memory_space<smem>>
    %83 = vector.broadcast %82 : f32 to vector<64x1xf32>
    %84 = arith.addf %81, %83 : vector<64x1xf32>
    %85 = arith.subf %0, %84 : vector<64x1xf32>
    %c0_24 = arith.constant 0 : index
    %c0_25 = arith.constant 0 : index
    %86 = vector.load %arg6[%c0_24, %c0_25] : memref<1x512xf32, #tpu.memory_space<vmem>>, vector<1x512xf32>
    %c0_26 = arith.constant 0 : index
    %c0_27 = arith.constant 0 : index
    %87 = vector.load %arg7[%c0_26, %c0_27] : memref<1x512xf32, #tpu.memory_space<vmem>>, vector<1x512xf32>
    %88 = vector.extract_strided_slice %85 {offsets = [0, 0], sizes = [16, 1], strides = [1, 1]} : vector<64x1xf32> to vector<16x1xf32>
    %89 = vector.broadcast %88 : vector<16x1xf32> to vector<16x512xf32>
    %90 = vector.broadcast %86 : vector<1x512xf32> to vector<16x512xf32>
    %91 = arith.mulf %89, %90 : vector<16x512xf32>
    %92 = vector.broadcast %87 : vector<1x512xf32> to vector<16x512xf32>
    %93 = arith.addf %91, %92 : vector<16x512xf32>
    %94 = vector.extract_strided_slice %85 {offsets = [16, 0], sizes = [16, 1], strides = [1, 1]} : vector<64x1xf32> to vector<16x1xf32>
    %95 = vector.broadcast %94 : vector<16x1xf32> to vector<16x512xf32>
    %96 = vector.broadcast %86 : vector<1x512xf32> to vector<16x512xf32>
    %97 = arith.mulf %95, %96 : vector<16x512xf32>
    %98 = vector.broadcast %87 : vector<1x512xf32> to vector<16x512xf32>
    %99 = arith.addf %97, %98 : vector<16x512xf32>
    %100 = vector.extract_strided_slice %85 {offsets = [32, 0], sizes = [16, 1], strides = [1, 1]} : vector<64x1xf32> to vector<16x1xf32>
    %101 = vector.broadcast %100 : vector<16x1xf32> to vector<16x512xf32>
    %102 = vector.broadcast %86 : vector<1x512xf32> to vector<16x512xf32>
    %103 = arith.mulf %101, %102 : vector<16x512xf32>
    %104 = vector.broadcast %87 : vector<1x512xf32> to vector<16x512xf32>
    %105 = arith.addf %103, %104 : vector<16x512xf32>
    %106 = vector.extract_strided_slice %85 {offsets = [48, 0], sizes = [16, 1], strides = [1, 1]} : vector<64x1xf32> to vector<16x1xf32>
    %107 = vector.broadcast %106 : vector<16x1xf32> to vector<16x512xf32>
    %108 = vector.broadcast %86 : vector<1x512xf32> to vector<16x512xf32>
    %109 = arith.mulf %107, %108 : vector<16x512xf32>
    %110 = vector.broadcast %87 : vector<1x512xf32> to vector<16x512xf32>
    %111 = arith.addf %109, %110 : vector<16x512xf32>
    %c0_28 = arith.constant 0 : index
    %c0_29 = arith.constant 0 : index
    %112 = vector.load %arg8[%c0_28, %c0_29] : memref<128x512xf32, #tpu.memory_space<vmem>>, vector<128x512xf32>
    %cst_30 = arith.constant 0.000000e+00 : f32
    %113 = vector.broadcast %cst_30 : f32 to vector<16x128xf32>
    %cst_31 = arith.constant 0.000000e+00 : f32
    %114 = vector.broadcast %cst_31 : f32 to vector<16x128xf32>
    %cst_32 = arith.constant dense<0.000000e+00> : vector<16x512xf32>
    %115 = tpu.matmul %113, %112, %cst_32 {dimension_numbers = #tpu.dot_dimension_numbers<[1], [0], [0], [1], [0, 0, 1, 1], [], []>} : vector<16x128xf32>, vector<128x512xf32>, vector<16x512xf32> -> vector<16x512xf32>
    %116 = arith.addf %93, %115 : vector<16x512xf32>
    %117 = vector.extract_strided_slice %116 {offsets = [0, 0], sizes = [16, 128], strides = [1, 1]} : vector<16x512xf32> to vector<16x128xf32>
    %118 = arith.negf %117 : vector<16x128xf32>
    %119 = math.exp %118 : vector<16x128xf32>
    %cst_33 = arith.constant 1.000000e+00 : f32
    %120 = vector.broadcast %cst_33 : f32 to vector<16x128xf32>
    %121 = arith.addf %120, %119 : vector<16x128xf32>
    %122 = arith.divf %120, %121 : vector<16x128xf32>
    %123 = vector.extract_strided_slice %116 {offsets = [0, 128], sizes = [16, 128], strides = [1, 1]} : vector<16x512xf32> to vector<16x128xf32>
    %124 = arith.negf %123 : vector<16x128xf32>
    %125 = math.exp %124 : vector<16x128xf32>
    %cst_34 = arith.constant 1.000000e+00 : f32
    %126 = vector.broadcast %cst_34 : f32 to vector<16x128xf32>
    %127 = arith.addf %126, %125 : vector<16x128xf32>
    %128 = arith.divf %126, %127 : vector<16x128xf32>
    %129 = vector.extract_strided_slice %116 {offsets = [0, 256], sizes = [16, 128], strides = [1, 1]} : vector<16x512xf32> to vector<16x128xf32>
    %130 = math.tanh %129 : vector<16x128xf32>
    %131 = vector.extract_strided_slice %116 {offsets = [0, 384], sizes = [16, 128], strides = [1, 1]} : vector<16x512xf32> to vector<16x128xf32>
    %132 = arith.negf %131 : vector<16x128xf32>
    %133 = math.exp %132 : vector<16x128xf32>
    %cst_35 = arith.constant 1.000000e+00 : f32
    %134 = vector.broadcast %cst_35 : f32 to vector<16x128xf32>
    %135 = arith.addf %134, %133 : vector<16x128xf32>
    %136 = arith.divf %134, %135 : vector<16x128xf32>
    %137 = arith.mulf %128, %114 : vector<16x128xf32>
    %138 = arith.mulf %122, %130 : vector<16x128xf32>
    %139 = arith.addf %137, %138 : vector<16x128xf32>
    %140 = math.tanh %139 : vector<16x128xf32>
    %141 = arith.mulf %136, %140 : vector<16x128xf32>
    %142 = vector.extract_strided_slice %141 {offsets = [15, 0], sizes = [1, 128], strides = [1, 1]} : vector<16x128xf32> to vector<1x128xf32>
    %cst_36 = arith.constant dense<0.000000e+00> : vector<16x512xf32>
    %143 = tpu.matmul %141, %112, %cst_36 {dimension_numbers = #tpu.dot_dimension_numbers<[1], [0], [0], [1], [0, 0, 1, 1], [], []>} : vector<16x128xf32>, vector<128x512xf32>, vector<16x512xf32> -> vector<16x512xf32>
    %144 = arith.addf %99, %143 : vector<16x512xf32>
    %145 = vector.extract_strided_slice %144 {offsets = [0, 0], sizes = [16, 128], strides = [1, 1]} : vector<16x512xf32> to vector<16x128xf32>
    %146 = arith.negf %145 : vector<16x128xf32>
    %147 = math.exp %146 : vector<16x128xf32>
    %cst_37 = arith.constant 1.000000e+00 : f32
    %148 = vector.broadcast %cst_37 : f32 to vector<16x128xf32>
    %149 = arith.addf %148, %147 : vector<16x128xf32>
    %150 = arith.divf %148, %149 : vector<16x128xf32>
    %151 = vector.extract_strided_slice %144 {offsets = [0, 128], sizes = [16, 128], strides = [1, 1]} : vector<16x512xf32> to vector<16x128xf32>
    %152 = arith.negf %151 : vector<16x128xf32>
    %153 = math.exp %152 : vector<16x128xf32>
    %cst_38 = arith.constant 1.000000e+00 : f32
    %154 = vector.broadcast %cst_38 : f32 to vector<16x128xf32>
    %155 = arith.addf %154, %153 : vector<16x128xf32>
    %156 = arith.divf %154, %155 : vector<16x128xf32>
    %157 = vector.extract_strided_slice %144 {offsets = [0, 256], sizes = [16, 128], strides = [1, 1]} : vector<16x512xf32> to vector<16x128xf32>
    %158 = math.tanh %157 : vector<16x128xf32>
    %159 = vector.extract_strided_slice %144 {offsets = [0, 384], sizes = [16, 128], strides = [1, 1]} : vector<16x512xf32> to vector<16x128xf32>
    %160 = arith.negf %159 : vector<16x128xf32>
    %161 = math.exp %160 : vector<16x128xf32>
    %cst_39 = arith.constant 1.000000e+00 : f32
    %162 = vector.broadcast %cst_39 : f32 to vector<16x128xf32>
    %163 = arith.addf %162, %161 : vector<16x128xf32>
    %164 = arith.divf %162, %163 : vector<16x128xf32>
    %165 = arith.mulf %156, %139 : vector<16x128xf32>
    %166 = arith.mulf %150, %158 : vector<16x128xf32>
    %167 = arith.addf %165, %166 : vector<16x128xf32>
    %168 = math.tanh %167 : vector<16x128xf32>
    %169 = arith.mulf %164, %168 : vector<16x128xf32>
    %170 = vector.extract_strided_slice %169 {offsets = [15, 0], sizes = [1, 128], strides = [1, 1]} : vector<16x128xf32> to vector<1x128xf32>
    %cst_40 = arith.constant dense<0.000000e+00> : vector<16x512xf32>
    %171 = tpu.matmul %169, %112, %cst_40 {dimension_numbers = #tpu.dot_dimension_numbers<[1], [0], [0], [1], [0, 0, 1, 1], [], []>} : vector<16x128xf32>, vector<128x512xf32>, vector<16x512xf32> -> vector<16x512xf32>
    %172 = arith.addf %105, %171 : vector<16x512xf32>
    %173 = vector.extract_strided_slice %172 {offsets = [0, 0], sizes = [16, 128], strides = [1, 1]} : vector<16x512xf32> to vector<16x128xf32>
    %174 = arith.negf %173 : vector<16x128xf32>
    %175 = math.exp %174 : vector<16x128xf32>
    %cst_41 = arith.constant 1.000000e+00 : f32
    %176 = vector.broadcast %cst_41 : f32 to vector<16x128xf32>
    %177 = arith.addf %176, %175 : vector<16x128xf32>
    %178 = arith.divf %176, %177 : vector<16x128xf32>
    %179 = vector.extract_strided_slice %172 {offsets = [0, 128], sizes = [16, 128], strides = [1, 1]} : vector<16x512xf32> to vector<16x128xf32>
    %180 = arith.negf %179 : vector<16x128xf32>
    %181 = math.exp %180 : vector<16x128xf32>
    %cst_42 = arith.constant 1.000000e+00 : f32
    %182 = vector.broadcast %cst_42 : f32 to vector<16x128xf32>
    %183 = arith.addf %182, %181 : vector<16x128xf32>
    %184 = arith.divf %182, %183 : vector<16x128xf32>
    %185 = vector.extract_strided_slice %172 {offsets = [0, 256], sizes = [16, 128], strides = [1, 1]} : vector<16x512xf32> to vector<16x128xf32>
    %186 = math.tanh %185 : vector<16x128xf32>
    %187 = vector.extract_strided_slice %172 {offsets = [0, 384], sizes = [16, 128], strides = [1, 1]} : vector<16x512xf32> to vector<16x128xf32>
    %188 = arith.negf %187 : vector<16x128xf32>
    %189 = math.exp %188 : vector<16x128xf32>
    %cst_43 = arith.constant 1.000000e+00 : f32
    %190 = vector.broadcast %cst_43 : f32 to vector<16x128xf32>
    %191 = arith.addf %190, %189 : vector<16x128xf32>
    %192 = arith.divf %190, %191 : vector<16x128xf32>
    %193 = arith.mulf %184, %167 : vector<16x128xf32>
    %194 = arith.mulf %178, %186 : vector<16x128xf32>
    %195 = arith.addf %193, %194 : vector<16x128xf32>
    %196 = math.tanh %195 : vector<16x128xf32>
    %197 = arith.mulf %192, %196 : vector<16x128xf32>
    %198 = vector.extract_strided_slice %197 {offsets = [15, 0], sizes = [1, 128], strides = [1, 1]} : vector<16x128xf32> to vector<1x128xf32>
    %cst_44 = arith.constant dense<0.000000e+00> : vector<16x512xf32>
    %199 = tpu.matmul %197, %112, %cst_44 {dimension_numbers = #tpu.dot_dimension_numbers<[1], [0], [0], [1], [0, 0, 1, 1], [], []>} : vector<16x128xf32>, vector<128x512xf32>, vector<16x512xf32> -> vector<16x512xf32>
    %200 = arith.addf %111, %199 : vector<16x512xf32>
    %201 = vector.extract_strided_slice %200 {offsets = [0, 0], sizes = [16, 128], strides = [1, 1]} : vector<16x512xf32> to vector<16x128xf32>
    %202 = arith.negf %201 : vector<16x128xf32>
    %203 = math.exp %202 : vector<16x128xf32>
    %cst_45 = arith.constant 1.000000e+00 : f32
    %204 = vector.broadcast %cst_45 : f32 to vector<16x128xf32>
    %205 = arith.addf %204, %203 : vector<16x128xf32>
    %206 = arith.divf %204, %205 : vector<16x128xf32>
    %207 = vector.extract_strided_slice %200 {offsets = [0, 128], sizes = [16, 128], strides = [1, 1]} : vector<16x512xf32> to vector<16x128xf32>
    %208 = arith.negf %207 : vector<16x128xf32>
    %209 = math.exp %208 : vector<16x128xf32>
    %cst_46 = arith.constant 1.000000e+00 : f32
    %210 = vector.broadcast %cst_46 : f32 to vector<16x128xf32>
    %211 = arith.addf %210, %209 : vector<16x128xf32>
    %212 = arith.divf %210, %211 : vector<16x128xf32>
    %213 = vector.extract_strided_slice %200 {offsets = [0, 256], sizes = [16, 128], strides = [1, 1]} : vector<16x512xf32> to vector<16x128xf32>
    %214 = math.tanh %213 : vector<16x128xf32>
    %215 = vector.extract_strided_slice %200 {offsets = [0, 384], sizes = [16, 128], strides = [1, 1]} : vector<16x512xf32> to vector<16x128xf32>
    %216 = arith.negf %215 : vector<16x128xf32>
    %217 = math.exp %216 : vector<16x128xf32>
    %cst_47 = arith.constant 1.000000e+00 : f32
    %218 = vector.broadcast %cst_47 : f32 to vector<16x128xf32>
    %219 = arith.addf %218, %217 : vector<16x128xf32>
    %220 = arith.divf %218, %219 : vector<16x128xf32>
    %221 = arith.mulf %212, %195 : vector<16x128xf32>
    %222 = arith.mulf %206, %214 : vector<16x128xf32>
    %223 = arith.addf %221, %222 : vector<16x128xf32>
    %224 = math.tanh %223 : vector<16x128xf32>
    %225 = arith.mulf %220, %224 : vector<16x128xf32>
    %226 = vector.extract_strided_slice %225 {offsets = [15, 0], sizes = [1, 128], strides = [1, 1]} : vector<16x128xf32> to vector<1x128xf32>
    %c0_48 = arith.constant 0 : index
    %c0_49 = arith.constant 0 : index
    %227 = vector.load %arg9[%c0_48, %c0_49] : memref<1x128xf32, #tpu.memory_space<vmem>>, vector<1x128xf32>
    %228 = arith.mulf %142, %227 : vector<1x128xf32>
    %cst_50 = arith.constant dense<0.000000e+00> : vector<1xf32>
    %229 = vector.multi_reduction <add>, %228, %cst_50 [1] : vector<1x128xf32> to vector<1xf32>
    %230 = vector.shape_cast %229 : vector<1xf32> to vector<1x1xf32>
    %231 = arith.mulf %170, %227 : vector<1x128xf32>
    %cst_51 = arith.constant dense<0.000000e+00> : vector<1xf32>
    %232 = vector.multi_reduction <add>, %231, %cst_51 [1] : vector<1x128xf32> to vector<1xf32>
    %233 = vector.shape_cast %232 : vector<1xf32> to vector<1x1xf32>
    %234 = arith.mulf %198, %227 : vector<1x128xf32>
    %cst_52 = arith.constant dense<0.000000e+00> : vector<1xf32>
    %235 = vector.multi_reduction <add>, %234, %cst_52 [1] : vector<1x128xf32> to vector<1xf32>
    %236 = vector.shape_cast %235 : vector<1xf32> to vector<1x1xf32>
    %237 = arith.mulf %226, %227 : vector<1x128xf32>
    %cst_53 = arith.constant dense<0.000000e+00> : vector<1xf32>
    %238 = vector.multi_reduction <add>, %237, %cst_53 [1] : vector<1x128xf32> to vector<1xf32>
    %239 = vector.shape_cast %238 : vector<1xf32> to vector<1x1xf32>
    %240 = tpu.concatenate %230, %233, %236, %239 in 1 : vector<1x1xf32>, vector<1x1xf32>, vector<1x1xf32>, vector<1x1xf32> -> vector<1x4xf32>
    %c0_54 = arith.constant 0 : index
    %241 = memref.load %arg10[%c0_54] : memref<1xf32, #tpu.memory_space<smem>>
    %242 = vector.broadcast %241 : f32 to vector<1x4xf32>
    %243 = arith.addf %240, %242 : vector<1x4xf32>
    %244 = vector.extract_strided_slice %84 {offsets = [15, 0], sizes = [1, 1], strides = [1, 1]} : vector<64x1xf32> to vector<1x1xf32>
    %245 = vector.extract_strided_slice %84 {offsets = [31, 0], sizes = [1, 1], strides = [1, 1]} : vector<64x1xf32> to vector<1x1xf32>
    %246 = vector.extract_strided_slice %84 {offsets = [47, 0], sizes = [1, 1], strides = [1, 1]} : vector<64x1xf32> to vector<1x1xf32>
    %247 = vector.extract_strided_slice %84 {offsets = [63, 0], sizes = [1, 1], strides = [1, 1]} : vector<64x1xf32> to vector<1x1xf32>
    %248 = tpu.concatenate %244, %245, %246, %247 in 0 : vector<1x1xf32>, vector<1x1xf32>, vector<1x1xf32>, vector<1x1xf32> -> vector<4x1xf32>
    %249 = vector.broadcast %248 : vector<4x1xf32> to vector<4x4xf32>
    %250 = vector.broadcast %243 : vector<1x4xf32> to vector<4x4xf32>
    %251 = arith.addf %249, %250 : vector<4x4xf32>
    %c0_55 = arith.constant 0 : index
    %c0_56 = arith.constant 0 : index
    %252 = vector.load %arg11[%c0_55, %c0_56] : memref<4x4xf32, #tpu.memory_space<vmem>>, vector<4x4xf32>
    tpu.vector_store %arg11[%c0_55, %c0_56], %251 {strides = array<i32>} : memref<4x4xf32, #tpu.memory_space<vmem>>, vector<4x4xf32>,
    return
  }
}

</mosaic_0001>

<bundles_post_ra>
// kernel: tpu_custom_call.1
= control target key start
LH: loop header
LB: loop body
LE: loop exit
PB: predicated region body
PF: predicated region fallthrough
CT: control target
= control target key end

     0   :  { %18 = vsyncpa [#allocation5], 0  ;;  %s4539_s0 = inlined_call_operand.vmem [shape: f32[64,1], index: 0, kind: input, shape index: {}]   ;;  %s4540_s1 = inlined_call_operand.vmem [shape: f32[64,7], index: 1, kind: input, shape index: {}]   ;;  %s4541_s2 = inlined_call_operand.vmem [shape: f32[7,16], index: 2, kind: input, shape index: {}]   ;;  %s4542_s3 = inlined_call_operand.vmem [shape: f32[1,16], index: 3, kind: input, shape index: {}]   ;;  %s4543_s4 = inlined_call_operand.vmem [shape: f32[1,112], index: 4, kind: input, shape index: {}]   ;;  %s4544_s5 = inlined_call_operand.<no memory space> [shape: f32[1], index: 5, kind: input, shape index: {}]   ;;  %s4545_s6 = inlined_call_operand.vmem [shape: f32[1,512], index: 6, kind: input, shape index: {}]   ;;  %s4546_s7 = inlined_call_operand.vmem [shape: f32[1,512], index: 7, kind: input, shape index: {}]   ;;  %s4547_s8 = inlined_call_operand.hbm [shape: f32[128,512], index: 8, kind: input, shape index: {}]   ;;  %s4548_s9 = inlined_call_operand.vmem [shape: f32[1,128], index: 9, kind: input, shape index: {}]   ;;  %s4549_s10 = inlined_call_operand.<no memory space> [shape: f32[1], index: 10, kind: input, shape index: {}]   ;;  %s4550_s11 = inlined_call_operand.hbm [shape: f32[4,4], index: 11, kind: output, shape index: {}]  }
   0x1   :  { %19 = vsyncpa [#allocation6], 0  ;;  %s40_s19 = sshll.u32 %s4547_s8, 4  ;;  %s2778_s20 = smov [#allocation4]   ;;  %s41_s19 = int_to_ptr.hbm [resolvable:$true] %s40_s19 }
   0x2   :  { %s42_s21 = sshll.u32 %s2778_s20, 4  ;;  %s2779_s22 = smov 512   ;;  %s43_s21 = int_to_ptr.vmem [resolvable:$true] %s42_s21 }
   0x3   :  { %s2780_s23 = smov 32  }
   0x4   :  { %48 = dma.hbm_to_vmem [thread:$0]  %s41_s19, 8192, %s43_s21, [#allocation5], %s2779_s22, %s2779_s22, %s2780_s23  }
   0x5   :  { %2774 = dma.done.wait [#allocation5], 8192  }
   0x6   :  { %2775 = vsyncadd [#allocation5], 4294959104  ;;  %v2872_v0 = vld [vmem:[%s4540_s1] sm:$0xff]  ;;  %s2781_s26 = smov 127   ;;  %s2782_s8 = smov 124   ;;  %v2887_v1 = vld [vmem:[%s4540_s1 + $0x8] sm:$0xff] }
   0x7   :  { %147 = vrot.lane.b32.xlu0 %v2872_v0, %s2781_s26  ;;  %261 = vrot.lane.b32.xlu1 %v2872_v0, %s2782_s8  ;;  %s2783_s27 = smov 122   ;;  %s2784_s28 = smov 126   ;;  %v2900_v2 = vld [vmem:[%s4540_s1 + $0x10] sm:$0xff]  ;;  %v2917_v3 = vld [vmem:[%s4539_s0] sm:$0xff]  ;;  %vm4616_vm0 = vcmask 1044480   ;;  %vm4615_vm1 = vcmask 1041408  }
   0x8   :  { %375 = vrot.lane.b32.xlu2 %v2872_v0, %s2783_s27  ;;  %s2785_s29 = smov 123   ;;  %s2786_s17 = smov 3   ;;  %v2924_v4 = vld [vmem:[%s4539_s0 + $0x8] sm:$0xff]  ;;  %v351_v5 = vrot.slane %v2917_v3, 3  ;;  %v2933_v7 = vld [vmem:[%s4539_s0 + $0x10] sm:$0xff]  ;;  %v115_v11 = vrot.slane %v2917_v3, 6 }
   0x9   :  { %v352_v6 = vrot.slane %v2924_v4, 3  ;;  %s2787_s22 = smov 6   ;;  %v237_v15 = vrot.slane %v2917_v3, 1  ;;  %v238_v16 = vrot.slane %v2924_v4, 1  ;;  %vm4613_vm2 = vcmask 1046528   ;;  %s2788_s24 = smov 1  }
   0xa   :  { %v138_v12 = vsel %vm4615_vm1, 0.0, %v115_v11  ;;  %v180_v18 = vrot.slane %v2917_v3, 7  ;;  %vm4617_vm3 = vcmask 1040384   ;;  %v116_v24 = vrot.slane %v2924_v4, 6  ;;  %s2789_s25 = smov 2   ;;  %s2790_s30 = smov 4  }
   0xb   :  { %v353_v8 = vsel %vm4616_vm0, %v351_v5, %v352_v6  ;;  %v239_v20 = vsel %vm4613_vm2, %v237_v15, %v238_v16  ;;  %v294_v26 = vrot.slane %v2917_v3, 2  ;;  %v295_v27 = vrot.slane %v2924_v4, 2  ;;  %s2791_s12 = smov 5   ;;  %v2967_v49 = vld [vmem:[%s4539_s0 + $0x18] sm:$0xff]  ;;  %s2798_s13 = smov 48  }
   0xc   :  { %v203_v21 = vsel %vm4617_vm3, 0.0, %v180_v18  ;;  %vm4614_vm4 = vcmask 1045504   ;;  %v117_v30 = vsel %vm4615_vm1, %v115_v11, %v116_v24  ;;  %v240_v34 = vrot.slane %v2933_v7, 1  ;;  %s2799_s14 = smov 16   ;;  %s2800_s15 = smov 80  }
   0xd   :  { %v296_v31 = vsel %vm4614_vm4, %v294_v26, %v295_v27  ;;  %v181_v36 = vrot.slane %v2924_v4, 7  ;;  %v354_v38 = vrot.slane %v2933_v7, 3  ;;  %v297_v45 = vrot.slane %v2933_v7, 2  ;;  %s2801_s16 = smov 64   ;;  %s2802_s18 = smov 96  }
   0xe   :  { %v241_v39 = vsel %vm4613_vm2, %v238_v16, %v240_v34  ;;  %v118_v46 = vrot.slane %v2933_v7, 6  ;;  %v356_v50 = vrot.slane %v2967_v49, 3  ;;  %v4555_v54 = vmov 2   ;;  %v3021_v16 = vld [vmem:[%s4540_s1 + $0x20] sm:$0xff] }
   0xf   :  { %204 = vrot.lane.b32.xlu0 %v2872_v0, %s2784_s28  ;;  %318 = vrot.lane.b32.xlu1 %v2872_v0, %s2785_s29  ;;  %v182_v40 = vsel %vm4617_vm3, %v180_v18, %v181_v36  ;;  %v355_v42 = vsel %vm4616_vm0, %v352_v6, %v354_v38  ;;  %v298_v51 = vsel %vm4614_vm4, %v295_v27, %v297_v45  ;;  %v183_v59 = vrot.slane %v2933_v7, 7 }
  0x10   :  { %149 = vrot.lane.b32.xlu2 %v2887_v1, %s2781_s26  ;;  %v119_v53 = vsel %vm4615_vm1, %v116_v24, %v118_v46  ;;  %2485 = vset.pattern.permute.xlu1 %v4555_v54  ;;  %v357_v56 = vsel %vm4616_vm0, %v354_v38, %v356_v50  ;;  %v242_v60 = vrot.slane %v2967_v49, 1  ;;  %v4559_v6 = vmov 1  }
  0x11   :  { %2489 = vset.pattern.permute.xlu0 %v4555_v54  ;;  %v184_v62 = vsel %vm4617_vm3, %v181_v36, %v183_v59  ;;  %2484 = vset.pattern.permute.xlu2 %v4559_v6  ;;  %v4575_v15 = vmov 5   ;;  %vm81_vm5 = vcmask 1042432   ;;  %vm591_vm6 = vcmask 7168  }
  0x12   :  { %v243_v5 = vsel %vm4613_vm2, %v240_v34, %v242_v60  ;;  %vm600_vm7 = vcmask 15360   ;;  %vm609_vm8 = vcmask 23552   ;;  %vm4554_vm9 = vcmask 31744  }
  0x13   :  { %vm4553_vm10 = vcmask 39936   ;;  %vm4552_vm11 = vcmask 48128   ;;  %vm4551_vm12 = vcmask 56320   ;;  %vm1238_vm13 = vcmask 130048  }
  0x14   :  { %vm1246_vm14 = vcmask 261120   ;;  %vm1254_vm15 = vcmask 392192  }
  0x17   :  { %263 = vrot.lane.b32.xlu1 %v2887_v1, %s2782_s8  ;;  %206 = vrot.lane.b32.xlu0 %v2887_v1, %s2784_s28 }
  0x18   :  { %320 = vrot.lane.b32.xlu2 %v2887_v1, %s2785_s29 }
  0x1f   :  { %151 = vrot.lane.b32.xlu1 %v2900_v2, %s2781_s26  ;;  %377 = vrot.lane.b32.xlu0 %v2887_v1, %s2783_s27 }
  0x20   :  { %208 = vrot.lane.b32.xlu2 %v2900_v2, %s2784_s28 }
  0x27   :  { %265 = vrot.lane.b32.xlu0 %v2900_v2, %s2782_s8  ;;  %322 = vrot.lane.b32.xlu1 %v2900_v2, %s2785_s29 }
  0x28   :  { %379 = vrot.lane.b32.xlu2 %v2900_v2, %s2783_s27 }
  0x30   :  { %471 = vrot.lane.b32.xlu2 %v2917_v3, %s2786_s17 }
  0x38   :  { %473 = vrot.lane.b32.xlu2 %v2924_v4, %s2786_s17 }
  0x40   :  { %475 = vrot.lane.b32.xlu2 %v2933_v7, %s2786_s17 }
  0x62   :  { %v376_v9 = vpop.permute.xlu2 %375 }
  0x63   :  { %v399_v10 = vmul.f32 %v376_v9, %v353_v8 }
  0x65   :  { %567 = vrot.lane.b32.xlu2 %v399_v10, %s2787_s22  ;;  %v299_v10 = vrot.slane %v2967_v49, 2 }
  0x6a   :  { %v150_v19 = vpop.permute.xlu2 %149 }
  0x6b   :  { %v172_v32 = vmul.f32 %v150_v19, %v117_v30 }
  0x72   :  { %v321_v29 = vpop.permute.xlu2 %320 }
  0x73   :  { %v343_v57 = vmul.f32 %v321_v29, %v298_v51  ;;  %v85_v51 = vrot.slane %v2933_v7, 5 }
  0x79   :  { %v148_v13 = vpop.permute.xlu0 %147  ;;  %v262_v14 = vpop.permute.xlu1 %261 }
  0x7a   :  { %v171_v17 = vmul.f32 %v148_v13, %v138_v12  ;;  %v285_v22 = vmul.f32 %v262_v14, %v239_v20  ;;  %v209_v41 = vpop.permute.xlu2 %208  ;;  %v300_v12 = vsel %vm4614_vm4, %v297_v45, %v299_v10  ;;  %v3004_v14 = vld [vmem:[%s4540_s1 + $0x18] sm:$0xff]  ;;  %v3070_v45 = vld [vmem:[%s4539_s0 + $0x20] sm:$0xff] }
  0x7b   :  { %v230_v8 = vmul.f32 %v209_v41, %v184_v62  ;;  %4625 = vst [vmem:[#allocation10_spill] sm:$0xff] %v3070_v45 }
  0x7c   :  { %415 = vrot.lane.b32.xlu0 %v171_v17, %s2788_s24  ;;  %v4566_v17 = vmov 4  }
  0x81   :  { %v205_v23 = vpop.permute.xlu0 %204  ;;  %v319_v25 = vpop.permute.xlu1 %318 }
  0x82   :  { %v228_v28 = vmul.f32 %v205_v23, %v203_v21  ;;  %v342_v33 = vmul.f32 %v319_v25, %v296_v31  ;;  %v380_v55 = vpop.permute.xlu2 %379  ;;  %v645_v21 = vld [vmem:[%s4541_s2] sm:$0x7f]  ;;  %v82_v23 = vrot.slane %v2917_v3, 5 }
  0x83   :  { %v401_v61 = vmul.f32 %v380_v55, %v357_v56  ;;  %2411 = vmatpush.msk.msra.mxu0 %vm4613_vm2, %v645_v21 }
  0x84   :  { %447 = vrot.lane.b32.xlu1 %v228_v28, %s2789_s25  ;;  %503 = vrot.lane.b32.xlu0 %v285_v22, %s2790_s30  ;;  %v105_v25 = vsel %vm81_vm5, 0.0, %v82_v23 }
  0x85   :  { %v106_v27 = vmul.f32 %v105_v25, %v2872_v0 }
  0x89   :  { %v207_v35 = vpop.permute.xlu0 %206  ;;  %v264_v37 = vpop.permute.xlu1 %263 }
  0x8a   :  { %v286_v43 = vmul.f32 %v264_v37, %v241_v39  ;;  %v229_v44 = vmul.f32 %v207_v35, %v182_v40  ;;  %v472_v18 = vpop.permute.xlu2 %471  ;;  %v4564_v40 = vmov 6  }
  0x8c   :  { %535 = vrot.lane.b32.xlu1 %v342_v33, %s2791_s12  ;;  %417 = vrot.lane.b32.xlu0 %v172_v32, %s2788_s24  ;;  %v83_v33 = vrot.slane %v2924_v4, 5 }
  0x8e   :  { %v84_v37 = vsel %vm81_vm5, %v82_v23, %v83_v33  ;;  %v86_v62 = vsel %vm81_vm5, %v83_v33, %v85_v51  ;;  %v358_v33 = vrot.slane %v3070_v45, 3 }
  0x8f   :  { %v107_v4 = vmul.f32 %v84_v37, %v2887_v1 }
  0x91   :  { %v378_v47 = vpop.permute.xlu0 %377  ;;  %v152_v52 = vpop.permute.xlu1 %151 }
  0x92   :  { %v400_v48 = vmul.f32 %v378_v47, %v355_v42  ;;  %v173_v58 = vmul.f32 %v152_v52, %v119_v53  ;;  %v474_v19 = vpop.permute.xlu2 %473  ;;  %v4572_v53 = vmov 0  }
  0x94   :  { %449 = vrot.lane.b32.xlu1 %v229_v44, %s2789_s25  ;;  %505 = vrot.lane.b32.xlu0 %v286_v43, %s2790_s30 }
  0x95   :  { %569 = vrot.lane.b32.xlu2 %v400_v48, %s2787_s22  ;;  %v301_v48 = vrot.slane %v3070_v45, 2 }
  0x97   :  { %v302_v52 = vsel %vm4614_vm4, %v299_v10, %v301_v48 }
  0x99   :  { %v266_v63 = vpop.permute.xlu0 %265  ;;  %v323_v11 = vpop.permute.xlu1 %322 }
  0x9a   :  { %v287_v9 = vmul.f32 %v266_v63, %v243_v5  ;;  %v344_v13 = vmul.f32 %v323_v11, %v300_v12  ;;  %v3041_v20 = vpop.permute.xlu2 %475 }
  0x9c   :  { %537 = vrot.lane.b32.xlu1 %v343_v57, %s2791_s12  ;;  %419 = vrot.lane.b32.xlu0 %v173_v58, %s2788_s24 }
  0x9d   :  { %571 = vrot.lane.b32.xlu2 %v401_v61, %s2787_s22 }
  0xa4   :  { %451 = vrot.lane.b32.xlu1 %v230_v8, %s2789_s25  ;;  %507 = vrot.lane.b32.xlu0 %v287_v9, %s2790_s30  ;;  %v108_v9 = vmul.f32 %v86_v62, %v2900_v2 }
  0xa5   :  { %815 = vperm.xlu2 %2484, %v2872_v0  }
  0xac   :  { %539 = vrot.lane.b32.xlu1 %v344_v13, %s2791_s12  ;;  %153 = vrot.lane.b32.xlu0 %v3004_v14, %s2781_s26  ;;  %v120_v13 = vrot.slane %v2967_v49, 6 }
  0xad   :  { %324 = vrot.lane.b32.xlu2 %v3004_v14, %s2785_s29 }
  0xae   :  { %2487 = vset.pattern.permute.xlu2 %v4575_v15 }
  0xb4   :  { %210 = vrot.lane.b32.xlu1 %v3004_v14, %s2784_s28  ;;  %267 = vrot.lane.b32.xlu0 %v3004_v14, %s2782_s8 }
  0xb5   :  { %986 = vperm.xlu2 %2487, %v2872_v0  }
  0xbc   :  { %872 = vperm.xlu1 %2485, %v2872_v0   ;;  %381 = vrot.lane.b32.xlu0 %v3004_v14, %s2783_s27 }
  0xbd   :  { %212 = vrot.lane.b32.xlu2 %v3021_v16, %s2784_s28 }
  0xbf   :  { %v568_v22 = vpop.permute.xlu2 %567 }
  0xc4   :  { %2486 = vset.pattern.permute.xlu1 %v4566_v17  ;;  %876 = vperm.xlu0 %2489, %v2887_v1  }
  0xc5   :  { %929 = vperm.xlu1 %2486, %v2872_v0   ;;  %269 = vrot.lane.b32.xlu2 %v3021_v16, %s2782_s8 }
  0xcc   :  { %2490 = vset.pattern.permute.xlu0 %v4564_v40 }
  0xcd   :  { %155 = vrot.lane.b32.xlu1 %v3021_v16, %s2781_s26  ;;  %383 = vrot.lane.b32.xlu2 %v3021_v16, %s2783_s27 }
  0xce   :  { %2488 = vset.pattern.permute.xlu1 %v4559_v6  ;;  %1043 = vperm.xlu0 %2490, %v2872_v0  }
  0xd5   :  { %819 = vperm.xlu1 %2488, %v2887_v1   ;;  %990 = vperm.xlu2 %2487, %v2887_v1  }
  0xd6   :  { %1047 = vperm.xlu0 %2490, %v2887_v1  }
  0xdd   :  { %326 = vrot.lane.b32.xlu1 %v3021_v16, %s2785_s29  ;;  %2492 = vset.pattern.permute.xlu2 %v4572_v53 }
  0xde   :  { %2491 = vset.pattern.permute.xlu1 %v4566_v17  ;;  %758 = vperm.xlu2 %2492, %v2872_v0  }
  0xdf   :  { %2494 = vset.pattern.permute.xlu0 %v4559_v6 }
  0xe5   :  { %933 = vperm.xlu1 %2491, %v2887_v1  }
  0xe6   :  { %477 = vrot.lane.b32.xlu2 %v2967_v49, %s2786_s17 }
  0xe7   :  { %2495 = vset.pattern.permute.xlu2 %v4555_v54 }
  0xed   :  { %2493 = vset.pattern.permute.xlu1 %v4572_v53 }
  0xee   :  { %v416_v24 = vpop.permute.xlu0 %415 }
  0xef   :  { %v570_v26 = vpop.permute.xlu2 %569  ;;  %v592_v30 = vsel %vm591_vm6, %v106_v27, %v416_v24  ;;  %v185_v27 = vrot.slane %v2967_v49, 7 }
  0xf6   :  { %v448_v28 = vpop.permute.xlu1 %447  ;;  %v504_v29 = vpop.permute.xlu0 %503 }
  0xf7   :  { %v601_v31 = vsel %vm600_vm7, %v592_v30, %v448_v28  ;;  %v572_v32 = vpop.permute.xlu2 %571  ;;  %v244_v28 = vrot.slane %v3070_v45, 1 }
  0xf8   :  { %v610_v3 = vsel %vm609_vm8, %v601_v31, %v472_v18 }
  0xf9   :  { %v619_v34 = vsel %vm4554_vm9, %v610_v3, %v504_v29  ;;  %v359_v3 = vsel %vm4616_vm0, %v356_v50, %v358_v33  ;;  %v3135_v50 = vld [vmem:[%s4539_s0 + $0x28] sm:$0xff] }
  0xfa   :  { %v303_v62 = vrot.slane %v3135_v50, 2 }
  0xfe   :  { %v536_v35 = vpop.permute.xlu1 %535  ;;  %v418_v36 = vpop.permute.xlu0 %417 }
  0xff   :  { %v628_v38 = vsel %vm4553_vm10, %v619_v34, %v536_v35  ;;  %v3064_v41 = vpop.permute.xlu2 %815  ;;  %v593_v42 = vsel %vm591_vm6, %v107_v4, %v418_v36  ;;  %v187_v35 = vrot.slane %v3070_v45, 7  ;;  %v246_v4 = vrot.slane %v3135_v50, 1 }
 0x100   :  { %v637_v39 = vsel %vm4552_vm11, %v628_v38, %v568_v22 }
 0x101   :  { %2412 = vmatmul.msk.f32.vlgmr.msra.gmra.mxu0 %vm4551_vm12, %v637_v39  ;;  %v188_v38 = vsel %vm4617_vm3, %v185_v27, %v187_v35 }
 0x106   :  { %v450_v43 = vpop.permute.xlu1 %449  ;;  %v506_v44 = vpop.permute.xlu0 %505 }
 0x107   :  { %v602_v47 = vsel %vm600_vm7, %v593_v42, %v450_v43  ;;  %v325_v56 = vpop.permute.xlu2 %324  ;;  %v122_v43 = vrot.slane %v3070_v45, 6 }
 0x108   :  { %v611_v55 = vsel %vm609_vm8, %v602_v47, %v474_v19  ;;  %v345_v57 = vmul.f32 %v325_v56, %v302_v52  ;;  %v121_v19 = vsel %vm4615_vm1, %v118_v46, %v120_v13 }
 0x109   :  { %v620_v58 = vsel %vm4554_vm9, %v611_v55, %v506_v44  ;;  %v247_v44 = vsel %vm4613_vm2, %v244_v28, %v246_v4  ;;  %v123_v55 = vsel %vm4615_vm1, %v120_v13, %v122_v43 }
 0x10a   :  { %541 = vrot.lane.b32.xlu0 %v345_v57, %s2791_s12 }
 0x10e   :  { %v538_v61 = vpop.permute.xlu1 %537  ;;  %v420_v63 = vpop.permute.xlu0 %419 }
 0x10f   :  { %v629_v5 = vsel %vm4553_vm10, %v620_v58, %v538_v61  ;;  %v594_v0 = vsel %vm591_vm6, %v108_v9, %v420_v63  ;;  %v3116_v31 = vpop.permute.xlu2 %986  ;;  %v70_v61 = vld [vmem:[%s4540_s1 + $0x28] sm:$0xff] }
 0x110   :  { %v638_v8 = vsel %vm4552_vm11, %v629_v5, %v570_v26 }
 0x111   :  { %2413 = vmatmul.msk.f32.gmra.mxu0 %vm4551_vm12, %v638_v8  ;;  %v304_v8 = vsel %vm4614_vm4, %v301_v48, %v303_v62 }
 0x116   :  { %v452_v10 = vpop.permute.xlu1 %451  ;;  %v508_v11 = vpop.permute.xlu0 %507 }
 0x117   :  { %v603_v12 = vsel %vm600_vm7, %v594_v0, %v452_v10  ;;  %v213_v39 = vpop.permute.xlu2 %212 }
 0x118   :  { %v612_v18 = vsel %vm609_vm8, %v603_v12, %v3041_v20  ;;  %v186_v20 = vsel %vm4617_vm3, %v183_v59, %v185_v27  ;;  %v3188_v12 = vld [vmem:[%s4542_s3] ss:$0 sm:$0xff] }
 0x119   :  { %v621_v21 = vsel %vm4554_vm9, %v612_v18, %v508_v11  ;;  %v3179_v11 = vld [vmem:[%s4540_s1 + $0x30] sm:$0xff] }
 0x11e   :  { %v540_v22 = vpop.permute.xlu1 %539  ;;  %v154_v23 = vpop.permute.xlu0 %153 }
 0x11f   :  { %v630_v24 = vsel %vm4553_vm10, %v621_v21, %v540_v22  ;;  %v174_v25 = vmul.f32 %v154_v23, %v121_v19  ;;  %v270_v47 = vpop.permute.xlu2 %269 }
 0x120   :  { %v639_v26 = vsel %vm4552_vm11, %v630_v24, %v572_v32  ;;  %v245_v32 = vsel %vm4613_vm2, %v242_v60, %v244_v28  ;;  %v232_v60 = vmul.f32 %v213_v39, %v188_v38  ;;  %v289_v52 = vmul.f32 %v270_v47, %v247_v44 }
 0x121   :  { %421 = vrot.lane.b32.xlu1 %v174_v25, %s2788_s24  ;;  %2414 = vmatmul.msk.f32.gmra.mxu0 %vm4551_vm12, %v639_v26 }
 0x126   :  { %v211_v46 = vpop.permute.xlu1 %210  ;;  %v268_v29 = vpop.permute.xlu0 %267 }
 0x127   :  { %v231_v30 = vmul.f32 %v211_v46, %v186_v20  ;;  %v288_v59 = vmul.f32 %v268_v29, %v245_v32  ;;  %v384_v5 = vpop.permute.xlu2 %383 }
 0x129   :  { %453 = vrot.lane.b32.xlu1 %v231_v30, %s2789_s25 }
 0x12e   :  { %v873_v34 = vpop.permute.xlu1 %872  ;;  %v382_v36 = vpop.permute.xlu0 %381 }
 0x12f   :  { %v402_v37 = vmul.f32 %v382_v36, %v359_v3  ;;  %v3183_v48 = vpop.permute.xlu2 %990 }
 0x131   :  { %509 = vrot.lane.b32.xlu1 %v288_v59, %s2790_s30  ;;  %573 = vrot.lane.b32.xlu2 %v402_v37, %s2787_s22  ;;  %v87_v59 = vrot.slane %v2967_v49, 5 }
 0x133   :  { %v88_v44 = vsel %vm81_vm5, %v85_v51, %v87_v59 }
 0x136   :  { %v877_v25 = vpop.permute.xlu0 %876 }
 0x137   :  { %v3138_v42 = vpop.permute.xlu1 %929 }
 0x138   :  { %v759_v21 = vpop.permute.xlu2 %758 }
 0x139   :  { %762 = vperm.xlu1 %2493, %v2887_v1   ;;  %455 = vrot.lane.b32.xlu2 %v232_v60, %s2789_s25  ;;  %v360_v1 = vrot.slane %v3135_v50, 3 }
 0x13b   :  { %v361_v63 = vsel %vm4616_vm0, %v358_v33, %v360_v1 }
 0x13c   :  { %v403_v9 = vmul.f32 %v384_v5, %v361_v63  ;;  %v109_v5 = vmul.f32 %v88_v44, %v3004_v14 }
 0x13f   :  { %v156_v56 = vpop.permute.xlu1 %155 }
 0x140   :  { %v175_v57 = vmul.f32 %v156_v56, %v123_v55  ;;  %v1044_v32 = vpop.permute.xlu0 %1043 }
 0x141   :  { %511 = vrot.lane.b32.xlu2 %v289_v52, %s2790_s30  ;;  %2496 = vset.pattern.permute.xlu1 %v4566_v17 }
 0x142   :  { %423 = vrot.lane.b32.xlu0 %v175_v57, %s2788_s24 }
 0x147   :  { %v3153_v58 = vpop.permute.xlu1 %819 }
 0x149   :  { %328 = vrot.lane.b32.xlu2 %v70_v61, %s2785_s29 }
 0x14a   :  { %479 = vrot.lane.b32.xlu0 %v3070_v45, %s2786_s17 }
 0x14f   :  { %v327_v0 = vpop.permute.xlu1 %326 }
 0x150   :  { %v346_v10 = vmul.f32 %v327_v0, %v304_v8 }
 0x152   :  { %543 = vrot.lane.b32.xlu1 %v346_v10, %s2791_s12  ;;  %575 = vrot.lane.b32.xlu0 %v403_v9, %s2787_s22 }
 0x157   :  { %v934_v30 = vpop.permute.xlu1 %933 }
 0x15a   :  { %157 = vrot.lane.b32.xlu0 %v70_v61, %s2781_s26  ;;  %385 = vrot.lane.b32.xlu1 %v70_v61, %s2783_s27 }
 0x162   :  { %214 = vrot.lane.b32.xlu0 %v70_v61, %s2784_s28 }
 0x16a   :  { %271 = vrot.lane.b32.xlu0 %v70_v61, %s2782_s8 }
 0x172   :  { %159 = vrot.lane.b32.xlu0 %v3179_v11, %s2781_s26 }
 0x17e   :  { %v695_v13 = vpop.f32.mrf.mxu0 }
 0x17f   :  { %v696_v18 = vadd.f32 %v3188_v12, %v695_v13 }
 0x181   :  { %v719_v19 = vmax.f32 %v696_v18, 0.0 }
 0x183   :  { %1133 = vrot.lane.b32.xlu1 %v719_v19, %s2798_s13  ;;  %v735_v22 = vrot.slane %v719_v19, 5  ;;  %v849_v23 = vrot.slane %v719_v19, 7  ;;  %v792_v24 = vrot.slane %v719_v19, 6  ;;  %v963_v37 = vrot.slane %v719_v19, 2 }
 0x184   :  { %v906_v39 = vrot.slane %v719_v19, 1  ;;  %v1020_v47 = vrot.slane %v719_v19, 3 }
 0x185   :  { %v756_v26 = vsel %vm81_vm5, 0.0, %v735_v22  ;;  %v870_v27 = vsel %vm4617_vm3, 0.0, %v849_v23  ;;  %v813_v20 = vsel %vm4615_vm1, 0.0, %v792_v24 }
 0x186   :  { %v3195_v46 = vmul.f32 %v759_v21, %v756_v26  ;;  %v899_v28 = vmul.f32 %v873_v34, %v870_v27  ;;  %v842_v29 = vmul.f32 %v3064_v41, %v813_v20 }
 0x188   :  { %1112 = vrot.lane.b32.xlu2 %v899_v28, %s2780_s23  ;;  %1084 = vrot.lane.b32.xlu0 %v842_v29, %s2799_s14 }
 0x18e   :  { %v698_v33 = vpop.f32.mrf.mxu0 }
 0x18f   :  { %v699_v3 = vadd.f32 %v3188_v12, %v698_v33 }
 0x191   :  { %v3202_v36 = vmax.f32 %v699_v3, 0.0 }
 0x193   :  { %4626 = vst [vmem:[#allocation11_spill] sm:$0xff] %v3202_v36  ;;  %v422_v38 = vpop.permute.xlu1 %421  ;;  %1135 = vrot.lane.b32.xlu2 %v3202_v36, %s2798_s13  ;;  %v1021_v41 = vrot.slane %v3202_v36, 3  ;;  %v964_v34 = vrot.slane %v3202_v36, 2  ;;  %v907_v60 = vrot.slane %v3202_v36, 1  ;;  %v4557_v52 = vrot.slane %v3202_v36, 5 }
 0x194   :  { %v4569_v8 = vrot.slane %v3202_v36, 7  ;;  %v4568_v7 = vrot.slane %v3202_v36, 6  ;;  %v595_v0 = vsel %vm591_vm6, %v109_v5, %v422_v38 }
 0x195   :  { %v965_v55 = vsel %vm4614_vm4, %v963_v37, %v964_v34  ;;  %v908_v56 = vsel %vm4613_vm2, %v906_v39, %v907_v60  ;;  %v1022_v57 = vsel %vm4616_vm0, %v1020_v47, %v1021_v41  ;;  %v3226_v51 = vsel %vm81_vm5, %v735_v22, %v4557_v52  ;;  %v3504_v52 = vld [vmem:[#allocation4 + $0x198] sm:$0xff] }
 0x196   :  { %v1013_v61 = vmul.f32 %v3116_v31, %v965_v55  ;;  %v956_v63 = vmul.f32 %v3138_v42, %v908_v56  ;;  %v1048_v31 = vpop.permute.xlu0 %1047  ;;  %v1070_v9 = vmul.f32 %v1044_v32, %v1022_v57  ;;  %v478_v42 = vpop.permute.xlu2 %477  ;;  %v851_v13 = vsel %vm4617_vm3, %v849_v23, %v4569_v8 }
 0x197   :  { %v794_v18 = vsel %vm4615_vm1, %v792_v24, %v4568_v7  ;;  %v900_v22 = vmul.f32 %v877_v25, %v851_v13  ;;  %v3535_v7 = vld [vmem:[#allocation4 + $0xd0] sm:$0xff] }
 0x198   :  { %1189 = vrot.lane.b32.xlu1 %v1013_v61, %s2800_s15  ;;  %1161 = vrot.lane.b32.xlu0 %v956_v63, %s2801_s16  ;;  %v843_v26 = vmul.f32 %v3153_v58, %v794_v18 }
 0x19b   :  { %v454_v10 = vpop.permute.xlu1 %453  ;;  %1217 = vrot.lane.b32.xlu2 %v1070_v9, %s2802_s18 }
 0x19c   :  { %v604_v19 = vsel %vm600_vm7, %v595_v0, %v454_v10  ;;  %v124_v10 = vrot.slane %v3135_v50, 6 }
 0x19d   :  { %v613_v20 = vsel %vm609_vm8, %v604_v19, %v478_v42 }
 0x19e   :  { %v701_v21 = vpop.f32.mrf.mxu0  ;;  %v542_v23 = vpop.permute.xlu0 %541  ;;  %v125_v13 = vsel %vm4615_vm1, %v122_v43, %v124_v10 }
 0x19f   :  { %v702_v27 = vadd.f32 %v3188_v12, %v701_v21  ;;  %v574_v33 = vpop.permute.xlu2 %573  ;;  %v189_v21 = vrot.slane %v3135_v50, 7 }
 0x1a0   :  { %1114 = vrot.lane.b32.xlu0 %v900_v22, %s2780_s23  ;;  %1086 = vrot.lane.b32.xlu1 %v843_v26, %s2799_s14 }
 0x1a1   :  { %v3244_v28 = vmax.f32 %v702_v27, 0.0  ;;  %v190_v22 = vsel %vm4617_vm3, %v187_v35, %v189_v21 }
 0x1a3   :  { %v510_v29 = vpop.permute.xlu1 %509  ;;  %v4558_v24 = vrot.slane %v3244_v28, 2  ;;  %v4563_v32 = vrot.slane %v3244_v28, 3  ;;  %v4561_v25 = vrot.slane %v3244_v28, 1 }
 0x1a4   :  { %v622_v58 = vsel %vm4554_vm9, %v613_v20, %v510_v29  ;;  %v3322_v20 = vld [vmem:[%s4539_s0 + $0x30] sm:$0xff] }
 0x1a5   :  { %v631_v3 = vsel %vm4553_vm10, %v622_v58, %v542_v23  ;;  %v967_v37 = vsel %vm4614_vm4, %v964_v34, %v4558_v24  ;;  %v1024_v38 = vsel %vm4616_vm0, %v1021_v41, %v4563_v32  ;;  %v910_v39 = vsel %vm4613_vm2, %v907_v60, %v4561_v25  ;;  %v72_v41 = vld [vmem:[%s4540_s1 + $0x38] sm:$0xff]  ;;  %v3508_v24 = vld [vmem:[#allocation4 + $0x108] sm:$0xff] }
 0x1a6   :  { %v640_v44 = vsel %vm4552_vm11, %v631_v3, %v574_v33  ;;  %v1014_v47 = vmul.f32 %v3183_v48, %v967_v37  ;;  %v1071_v55 = vmul.f32 %v1048_v31, %v1024_v38  ;;  %v957_v56 = vmul.f32 %v934_v30, %v910_v39  ;;  %v3523_v32 = vld [vmem:[#allocation4 + $0xe8] sm:$0xff] }
 0x1a7   :  { %2415 = vmatmul.msk.f32.gmra.mxu0 %vm4551_vm12, %v640_v44  ;;  %v4562_v48 = vrot.slane %v3070_v45, 5  ;;  %v456_v60 = vpop.permute.xlu2 %455  ;;  %v126_v29 = vrot.slane %v3322_v20, 6  ;;  %v3584_v45 = vld [vmem:[#allocation4 + $0xd8] sm:$0xff] }
 0x1a8   :  { %1191 = vrot.lane.b32.xlu2 %v1014_v47, %s2800_s15  ;;  %1219 = vrot.lane.b32.xlu0 %v1071_v55, %s2802_s18 }
 0x1a9   :  { %1163 = vrot.lane.b32.xlu1 %v957_v56, %s2801_s16  ;;  %v90_v34 = vsel %vm81_vm5, %v87_v59, %v4562_v48  ;;  %v127_v35 = vsel %vm4615_vm1, %v124_v10, %v126_v29  ;;  %v3519_v48 = vld [vmem:[#allocation4 + $0x178] sm:$0xff] }
 0x1aa   :  { %v110_v57 = vmul.f32 %v90_v34, %v3021_v16 }
 0x1ab   :  { %v3286_v61 = vpop.permute.xlu1 %762 }
 0x1ac   :  { %v786_v10 = vmul.f32 %v3286_v61, %v3226_v51 }
 0x1af   :  { %v512_v49 = vpop.permute.xlu2 %511 }
 0x1b0   :  { %273 = vrot.lane.b32.xlu2 %v3179_v11, %s2782_s8  ;;  %216 = vrot.lane.b32.xlu0 %v3179_v11, %s2784_s28 }
 0x1b1   :  { %330 = vrot.lane.b32.xlu1 %v3179_v11, %s2785_s29 }
 0x1b4   :  { %v424_v30 = vpop.permute.xlu0 %423 }
 0x1b5   :  { %v596_v5 = vsel %vm591_vm6, %v110_v57, %v424_v30 }
 0x1b6   :  { %v605_v31 = vsel %vm600_vm7, %v596_v5, %v456_v60  ;;  %v3340_v60 = vld [vmem:[%s4539_s0 + $0x38] sm:$0xff] }
 0x1b7   :  { %v3324_v23 = vpop.permute.xlu2 %328  ;;  %4627 = vst [vmem:[#allocation12_spill] sm:$0xff] %v3340_v60 }
 0x1b8   :  { %161 = vrot.lane.b32.xlu2 %v72_v41, %s2781_s26  ;;  %387 = vrot.lane.b32.xlu0 %v3179_v11, %s2783_s27  ;;  %s2401_s26 = sshll.u32 %s4550_s11, 4  ;;  %s2402_s26 = int_to_ptr.hbm [resolvable:$true] %s2401_s26 }
 0x1b9   :  { %218 = vrot.lane.b32.xlu1 %v72_v41, %s2784_s28 }
 0x1bc   :  { %v480_v63 = vpop.permute.xlu0 %479 }
 0x1bd   :  { %v614_v59 = vsel %vm609_vm8, %v605_v31, %v480_v63  ;;  %v128_v31 = vrot.slane %v3340_v60, 6 }
 0x1be   :  { %v623_v16 = vsel %vm4554_vm9, %v614_v59, %v512_v49  ;;  %vm4609_vm9 = vcmask 916480  }
 0x1c0   :  { %332 = vrot.lane.b32.xlu2 %v72_v41, %s2785_s29  ;;  %275 = vrot.lane.b32.xlu0 %v72_v41, %s2782_s8 }
 0x1c1   :  { %389 = vrot.lane.b32.xlu1 %v72_v41, %s2783_s27 }
 0x1c4   :  { %v544_v11 = vpop.permute.xlu1 %543  ;;  %v576_v9 = vpop.permute.xlu0 %575 }
 0x1c5   :  { %v632_v42 = vsel %vm4553_vm10, %v623_v16, %v544_v11  ;;  %vm4610_vm10 = vcmask 785408   ;;  %v129_v16 = vsel %vm4615_vm1, %v126_v29, %v128_v31 }
 0x1c6   :  { %v641_v0 = vsel %vm4552_vm11, %v632_v42, %v576_v9  ;;  %vm4611_vm11 = vcmask 654336  }
 0x1c7   :  { %2416 = vmatmul.msk.f32.gmra.mxu0 %vm4551_vm12, %v641_v0  ;;  %vm4612_vm12 = vcmask 523264  }
 0x1c8   :  { %880 = vperm.xlu2 %2495, %v2900_v2   ;;  %823 = vperm.xlu0 %2494, %v2900_v2  }
 0x1cc   :  { %v158_v18 = vpop.permute.xlu0 %157  ;;  %v3330_v38 = vpop.permute.xlu1 %385 }
 0x1cd   :  { %v176_v19 = vmul.f32 %v158_v18, %v125_v13 }
 0x1cf   :  { %425 = vrot.lane.b32.xlu1 %v176_v19, %s2788_s24 }
 0x1d0   :  { %481 = vrot.lane.b32.xlu0 %v3135_v50, %s2786_s17  ;;  %2497 = vset.pattern.permute.xlu2 %v4575_v15  ;;  %v3529_v50 = vld [vmem:[#allocation4 + $0x158] sm:$0xff] }
 0x1d1   :  { %2498 = vset.pattern.permute.xlu0 %v4564_v40  ;;  %v3525_v40 = vld [vmem:[#allocation4 + $0xf0] sm:$0xff] }
 0x1d4   :  { %v215_v43 = vpop.permute.xlu0 %214 }
 0x1d5   :  { %v233_v26 = vmul.f32 %v215_v43, %v190_v22 }
 0x1d7   :  { %457 = vrot.lane.b32.xlu2 %v233_v26, %s2789_s25 }
 0x1d8   :  { %1051 = vperm.xlu0 %2498, %v2900_v2  }
 0x1dc   :  { %v3317_v27 = vpop.permute.xlu0 %271 }
 0x1e0   :  { %2502 = vset.pattern.permute.xlu0 %v4572_v53  ;;  %v3561_v53 = vld [vmem:[#allocation4 + $0x88] sm:$0xff] }
 0x1e2   :  { %v1113_v3 = vpop.permute.xlu2 %1112 }
 0x1e4   :  { %v160_v33 = vpop.permute.xlu0 %159 }
 0x1e5   :  { %v177_v58 = vmul.f32 %v160_v33, %v127_v35 }
 0x1e7   :  { %427 = vrot.lane.b32.xlu0 %v177_v58, %s2788_s24 }
 0x1ed   :  { %v1136_v37 = vpop.permute.xlu2 %1135 }
 0x1f5   :  { %v1218_v39 = vpop.permute.xlu2 %1217  ;;  %v1134_v44 = vpop.permute.xlu1 %1133 }
 0x1fa   :  { %v1085_v47 = vpop.permute.xlu0 %1084 }
 0x1fb   :  { %v1239_v56 = vsel %vm1238_vm13, %v3195_v46, %v1085_v47  ;;  %v2528_v46 = vld [vmem:[%s4543_s4] ss:$0 sm:$0xff] }
 0x1fc   :  { %v1247_v30 = vsel %vm1246_vm14, %v1239_v56, %v1113_v3  ;;  %v3370_v47 = vld [vmem:[#allocation4 + $0x1a0] sm:$0xff] }
 0x1fd   :  { %v1255_v57 = vsel %vm1254_vm15, %v1247_v30, %v1134_v44  ;;  %v3368_v44 = vld [vmem:[#allocation4 + $0x1c0] sm:$0xff]  ;;  %4629 = vst [vmem:[#allocation14_spill] sm:$0xff] %v3370_v47 }
 0x1fe   :  { %v3381_v30 = vld [vmem:[#allocation4 + $0x160] sm:$0xff] }
 0x202   :  { %v1192_v55 = vpop.permute.xlu2 %1191 }
 0x20a   :  { %v3335_v41 = vpop.permute.xlu2 %273  ;;  %v1190_v34 = vpop.permute.xlu1 %1189 }
 0x20b   :  { %v1162_v63 = vpop.permute.xlu0 %1161 }
 0x20c   :  { %v1263_v5 = vsel %vm4612_vm12, %v1255_v57, %v1162_v63  ;;  %v250_v63 = vrot.slane %v3340_v60, 1 }
 0x20d   :  { %v1271_v49 = vsel %vm4611_vm11, %v1263_v5, %v1190_v34  ;;  %v3383_v34 = vld [vmem:[#allocation4 + $0x140] sm:$0xff] }
 0x20e   :  { %v1279_v59 = vsel %vm4610_vm10, %v1271_v49, %v1218_v39  ;;  %v3365_v39 = vld [vmem:[#allocation4 + $0x1e0] sm:$0xff]  ;;  %v260_v31 = vsel %vm4613_vm2, %v250_v63, 0.0  ;;  %v4574_v49 = vrot.slane %v3322_v20, 3 }
 0x20f   :  { %v1290_v11 = vmul.f32 %v2528_v46, %v1279_v59  ;;  %1510 = vmatpush.msra.mxu1 %v3365_v39  ;;  %v3401_v59 = vld [vmem:[#allocation4 + $0x100] sm:$0xff] }
 0x211   :  { %v1298_v9 = vsel %vm4609_vm9, %v1290_v11, 0.0  ;;  %1511 = vmatpush.msra.mxu1 %v3368_v44 }
 0x212   :  { %1299 = vadd.xlane.f32.xlu1 %v1298_v9  ;;  %v162_v42 = vpop.permute.xlu2 %161  ;;  %v1087_v0 = vpop.permute.xlu1 %1086  ;;  %v363_v9 = vsel %vm4616_vm0, %v360_v1, %v4574_v49  ;;  %v3429_v1 = vld [vmem:[#allocation4 + $0x60] sm:$0xff]  ;;  %v3565_v49 = vld [vmem:[#allocation4 + $0x90] sm:$0xff] }
 0x213   :  { %v3354_v13 = vmul.f32 %v162_v42, %v129_v16  ;;  %v1115_v18 = vpop.permute.xlu0 %1114  ;;  %v1240_v19 = vsel %vm1238_vm13, %v786_v10, %v1087_v0  ;;  %1512 = vmatpush.msra.mxu1 %v3370_v47  ;;  %v3410_v16 = vld [vmem:[#allocation4 + $0xc0] sm:$0xff]  ;;  %v4571_v0 = vrot.slane %v3322_v20, 2  ;;  %v404_v10 = vmul.f32 %v3330_v38, %v363_v9  ;;  %v3488_v9 = vld [vmem:[#allocation4 + $0x150] sm:$0xff]  ;;  %4640 = vst [vmem:[#allocation25_spill] sm:$0xff] %v3565_v49 }
 0x214   :  { %v1248_v22 = vsel %vm1246_vm14, %v1240_v19, %v1115_v18  ;;  %v3418_v42 = vld [vmem:[#allocation4 + $0xa0] sm:$0xff]  ;;  %v3431_v19 = vld [vmem:[#allocation4 + $0x1e8] sm:$0xff]  ;;  %4639 = vst [vmem:[#allocation24_spill] sm:$0xff] %v3488_v9 }
 0x215   :  { %4628 = vst [vmem:[#allocation13_spill] sm:$0xff] %v3354_v13  ;;  %v1256_v35 = vsel %vm1254_vm15, %v1248_v22, %v1136_v37  ;;  %v248_v37 = vrot.slane %v3322_v20, 1  ;;  %v3425_v18 = vld [vmem:[#allocation4 + $0x80] sm:$0xff]  ;;  %v3433_v22 = vld [vmem:[#allocation4 + $0x1f0] sm:$0xff]  ;;  %1533 = vmatpush.msra.mxu2 %v3431_v19 }
 0x216   :  { %4631 = vst [vmem:[#allocation16_spill] sm:$0xff] %v3431_v19  ;;  %1556 = vmatpush.msra.mxu3 %v3433_v22  ;;  %v3442_v38 = vld [vmem:[#allocation4 + $0x40] sm:$0xff]  ;;  %1782 = vmatpush.msrb.mxu0 %v3433_v22 }
 0x217   :  { %v249_v57 = vsel %vm4613_vm2, %v246_v4, %v248_v37  ;;  %4632 = vst [vmem:[#allocation17_spill] sm:$0xff] %v3433_v22  ;;  %v251_v8 = vsel %vm4613_vm2, %v248_v37, %v250_v63  ;;  %v3559_v63 = vld [vmem:[#allocation4 + $0x118] sm:$0xff] }
 0x218   :  { %v290_v5 = vmul.f32 %v3317_v27, %v249_v57  ;;  %v3408_v27 = vld [vmem:[#allocation4 + $0xe0] sm:$0xff]  ;;  %v3477_v57 = vld [vmem:[#allocation4 + $0x168] sm:$0xff]  ;;  %v291_v37 = vmul.f32 %v3335_v41, %v251_v8  ;;  %v4641_v41 = vrot.slane %v3340_v60, 3  ;;  %v3616_v22 = vld [vmem:[#allocation4 + $0x78] sm:$0xff] }
 0x219   :  { %v3571_v8 = vld [vmem:[#allocation4 + $0x68] sm:$0xff] }
 0x21b   :  { %v1220_v43 = vpop.permute.xlu0 %1219  ;;  %v1164_v26 = vpop.permute.xlu1 %1163 }
 0x21c   :  { %v1264_v29 = vsel %vm4612_vm12, %v1256_v35, %v1164_v26  ;;  %v3446_v26 = vld [vmem:[#allocation4 + $0x1d0] sm:$0xff]  ;;  %v3449_v35 = vld [vmem:[#allocation4 + $0x1a8] sm:$0xff]  ;;  %vm4689_vm12 = vcmask 56320  }
 0x21d   :  { %v1272_v33 = vsel %vm4611_vm11, %v1264_v29, %v1192_v55  ;;  %v3375_v55 = vld [vmem:[#allocation4 + $0x180] sm:$0xff]  ;;  %4634 = vst [vmem:[#allocation19_spill] sm:$0xff] %v3446_v26  ;;  %v3451_v29 = vld [vmem:[#allocation4 + $0x1b0] sm:$0xff]  ;;  %1557 = vmatpush.msra.mxu3 %v3446_v26  ;;  %1783 = vmatpush.msrb.mxu0 %v3446_v26  ;;  %v3605_v26 = vld [vmem:[#allocation4 + $0x98] sm:$0xff]  ;;  %vm4688_vm11 = vcmask 48128  }
 0x21e   :  { %v1280_v58 = vsel %vm4610_vm10, %v1272_v33, %v1220_v43  ;;  %1513 = vmatpush.msra.mxu1 %v3375_v55  ;;  %v3444_v43 = vld [vmem:[#allocation4 + $0x1c8] sm:$0xff]  ;;  %4635 = vst [vmem:[#allocation20_spill] sm:$0xff] %v3451_v29  ;;  %vm4687_vm10 = vcmask 39936  }
 0x21f   :  { %v1291_v3 = vmul.f32 %v2528_v46, %v1280_v58  ;;  %v3392_v46 = vld [vmem:[#allocation4 + $0x120] sm:$0xff]  ;;  %4633 = vst [vmem:[#allocation18_spill] sm:$0xff] %v3444_v43  ;;  %1534 = vmatpush.msra.mxu2 %v3444_v43  ;;  %1558 = vmatpush.msra.mxu3 %v3451_v29 }
 0x220   :  { %1514 = vmatpush.msra.mxu1 %v3381_v30  ;;  %v3465_v58 = vld [vmem:[#allocation4] sm:$0xff]  ;;  %1784 = vmatpush.msrb.mxu0 %v3451_v29  ;;  %v3601_v29 = vld [vmem:[#allocation4 + $0x30] sm:$0xff] }
 0x221   :  { %v1301_v51 = vsel %vm4609_vm9, %v1291_v3, 0.0  ;;  %1535 = vmatpush.msra.mxu2 %v3449_v35  ;;  %4636 = vst [vmem:[#allocation21_spill] sm:$0xff] %v3465_v58  ;;  %v3467_v3 = vld [vmem:[#allocation4 + $0x188] sm:$0xff]  ;;  %vm4686_vm9 = vcmask 31744  }
 0x222   :  { %1302 = vadd.xlane.f32.xlu2 %v1301_v51  ;;  %1515 = vmatpush.msra.mxu1 %v3383_v34  ;;  %v3469_v51 = vld [vmem:[#allocation4 + $0x190] sm:$0xff]  ;;  %4647 = vst [vmem:[#allocation29_spill] sm:$0xff] %v3601_v29 }
 0x223   :  { %v3363_v61 = vpop.permute.xlu0 %216  ;;  %4637 = vst [vmem:[#allocation22_spill] sm:$0xff] %v3469_v51  ;;  %1536 = vmatpush.msra.mxu2 %v3467_v3  ;;  %1559 = vmatpush.msra.mxu3 %v3469_v51  ;;  %v331_v13 = vpop.permute.xlu1 %330 }
 0x224   :  { %1516 = vmatpush.msra.mxu1 %v3392_v46  ;;  %1785 = vmatpush.msrb.mxu0 %v3469_v51  ;;  %v3596_v51 = vld [vmem:[#allocation4 + $0x28] sm:$0xff] }
 0x225   :  { %1537 = vmatpush.msra.mxu2 %v3477_v57  ;;  %4645 = vst [vmem:[#allocation28_spill] sm:$0xff] %v3596_v51 }
 0x226   :  { %1517 = vmatpush.msra.mxu1 %v3401_v59 }
 0x228   :  { %1518 = vmatpush.msra.mxu1 %v3408_v27 }
 0x22a   :  { %1519 = vmatpush.msra.mxu1 %v3410_v16 }
 0x22b   :  { %v3377_v56 = vpop.permute.xlu0 %387  ;;  %937 = vperm.xlu1 %2496, %v2900_v2  }
 0x22c   :  { %1520 = vmatpush.msra.mxu1 %v3418_v42 }
 0x22e   :  { %1521 = vmatpush.msra.mxu1 %v3425_v18 }
 0x230   :  { %1522 = vmatpush.msra.mxu1 %v3429_v1 }
 0x232   :  { %1523 = vmatpush.msra.mxu1 %v3442_v38 }
 0x233   :  { %v276_v4 = vpop.permute.xlu0 %275  ;;  %513 = vrot.lane.b32.xlu1 %v290_v5, %s2790_s30  ;;  %v3479_v5 = vld [vmem:[#allocation4 + $0x170] sm:$0xff] }
 0x234   :  { %v3404_v11 = vmul.f32 %v276_v4, %v260_v31  ;;  %2500 = vset.pattern.permute.xlu1 %v4555_v54  ;;  %4638 = vst [vmem:[#allocation23_spill] sm:$0xff] %v3479_v5  ;;  %v3481_v31 = vld [vmem:[#allocation4 + $0x1d8] sm:$0xff]  ;;  %v3485_v4 = vld [vmem:[#allocation4 + $0x148] sm:$0xff]  ;;  %1560 = vmatpush.msra.mxu3 %v3479_v5  ;;  %v3499_v54 = vld [vmem:[#allocation4 + $0x130] sm:$0xff] }
 0x235   :  { %1538 = vmatpush.msra.mxu2 %v3485_v4  ;;  %1786 = vmatpush.msrb.mxu0 %v3479_v5  ;;  %v3594_v5 = vld [vmem:[#allocation4 + $0xb8] sm:$0xff] }
 0x236   :  { %4630 = vst [vmem:[#allocation15_spill] sm:$0xff] %v3404_v11  ;;  %1561 = vmatpush.msra.mxu3 %v3488_v9 }
 0x237   :  { %1787 = vmatpush.msrb.mxu0 %v3488_v9  ;;  %v3586_v9 = vld [vmem:[#allocation4 + $0x48] sm:$0xff] }
 0x238   :  { %1562 = vmatpush.msra.mxu3 %v3499_v54 }
 0x239   :  { %1788 = vmatpush.msrb.mxu0 %v3499_v54 }
 0x23a   :  { %994 = vperm.xlu2 %2497, %v2900_v2   ;;  %v306_v2 = vsel %vm4614_vm4, %v303_v62, %v4571_v0  ;;  %v3456_v62 = vld [vmem:[#allocation4 + $0x20] sm:$0xff]  ;;  %v3554_v0 = vld [vmem:[#allocation4 + $0xb0] sm:$0xff] }
 0x23b   :  { %577 = vrot.lane.b32.xlu1 %v404_v10, %s2787_s22  ;;  %v347_v33 = vmul.f32 %v3324_v23, %v306_v2  ;;  %1524 = vmatpush.msra.mxu1 %v3456_v62  ;;  %v3473_v23 = vld [vmem:[#allocation4 + $0x1f8] sm:$0xff]  ;;  %v4570_v2 = vrot.slane %v3322_v20, 7 }
 0x23c   :  { %v3490_v10 = vld [vmem:[#allocation4 + $0x1b8] sm:$0xff] }
 0x23d   :  { %1525 = vmatpush.msra.mxu1 %v3465_v58  ;;  %v192_v25 = vsel %vm4617_vm3, %v189_v21, %v4570_v2  ;;  %v3545_v2 = vld [vmem:[#allocation4 + $0x138] sm:$0xff] }
 0x23e   :  { %v234_v21 = vmul.f32 %v3363_v61, %v192_v25  ;;  %v3548_v25 = vld [vmem:[#allocation4 + $0xa8] sm:$0xff]  ;;  %v3569_v61 = vld [vmem:[#allocation4 + $0xf8] sm:$0xff] }
 0x23f   :  { %1579 = vmatpush.msrb.mxu1 %v3473_v23 }
 0x241   :  { %1580 = vmatpush.msrb.mxu1 %v3481_v31 }
 0x242   :  { %545 = vrot.lane.b32.xlu2 %v347_v33, %s2791_s12  ;;  %v3496_v33 = vld [vmem:[#allocation4 + $0x128] sm:$0xff] }
 0x243   :  { %884 = vperm.xlu1 %2500, %v3004_v14   ;;  %2499 = vset.pattern.permute.xlu2 %v4559_v6  ;;  %v3510_v6 = vld [vmem:[#allocation4 + $0x110] sm:$0xff] }
 0x244   :  { %1581 = vmatpush.msrb.mxu1 %v3490_v10  ;;  %1539 = vmatpush.msra.mxu2 %v3496_v33 }
 0x245   :  { %1563 = vmatpush.msra.mxu3 %v3510_v6  ;;  %1789 = vmatpush.msrb.mxu0 %v3510_v6 }
 0x246   :  { %1582 = vmatpush.msrb.mxu1 %v3504_v52  ;;  %1540 = vmatpush.msra.mxu2 %v3508_v24 }
 0x247   :  { %1564 = vmatpush.msra.mxu3 %v3525_v40  ;;  %1790 = vmatpush.msrb.mxu0 %v3525_v40 }
 0x248   :  { %1583 = vmatpush.msrb.mxu1 %v3519_v48  ;;  %1541 = vmatpush.msra.mxu2 %v3523_v32 }
 0x249   :  { %1565 = vmatpush.msra.mxu3 %v3535_v7  ;;  %1791 = vmatpush.msrb.mxu0 %v3535_v7 }
 0x24a   :  { %827 = vperm.xlu2 %2499, %v3004_v14   ;;  %1584 = vmatpush.msrb.mxu1 %v3529_v50 }
 0x24b   :  { %2501 = vset.pattern.permute.xlu1 %v4566_v17  ;;  %v3533_v17 = vld [vmem:[#allocation4 + $0xc8] sm:$0xff]  ;;  %1566 = vmatpush.msra.mxu3 %v3554_v0 }
 0x24c   :  { %941 = vperm.xlu1 %2501, %v3004_v14   ;;  %1542 = vmatpush.msra.mxu2 %v3533_v17 }
 0x24d   :  { %1585 = vmatpush.msrb.mxu1 %v3545_v2  ;;  %1567 = vmatpush.msra.mxu3 %v3565_v49  ;;  %v3625_v49 = vld [vmem:[#allocation4 + $0x58] sm:$0xff] }
 0x24e   :  { %1543 = vmatpush.msra.mxu2 %v3548_v25  ;;  %1792 = vmatpush.msrb.mxu0 %v3554_v0 }
 0x24f   :  { %1586 = vmatpush.msrb.mxu1 %v3559_v63 }
 0x250   :  { %1544 = vmatpush.msra.mxu2 %v3561_v53 }
 0x251   :  { %1587 = vmatpush.msrb.mxu1 %v3569_v61 }
 0x252   :  { %459 = vrot.lane.b32.xlu2 %v234_v21, %s2789_s25  ;;  %v4642_v21 = vrot.slane %v3322_v20, 3  ;;  %1545 = vmatpush.msra.mxu2 %v3571_v8 }
 0x253   :  { %2503 = vset.pattern.permute.xlu2 %v4575_v15  ;;  %v3580_v15 = vld [vmem:[#allocation4 + $0x70] sm:$0xff]  ;;  %1588 = vmatpush.msrb.mxu1 %v3584_v45 }
 0x254   :  { %515 = vrot.lane.b32.xlu1 %v291_v37, %s2790_s30  ;;  %v365_v11 = vsel %vm4616_vm0, %v4642_v21, %v4641_v41  ;;  %4643 = vst [vmem:[#allocation26_spill] sm:$0xff] %v3580_v15  ;;  %v4581_v37 = vmov 0.0   ;;  %v3590_v41 = vld [vmem:[#allocation4 + $0x50] sm:$0xff]  ;;  %1568 = vmatpush.msra.mxu3 %v3580_v15  ;;  %v4651_v15 = vmov 0.0  }
 0x255   :  { %1526 = vmatmul.f32.vlgmr.msra.gmra.mxu1 %v4581_v37  ;;  %4644 = vst [vmem:[#allocation27_spill] sm:$0xff] %v3590_v41  ;;  %v405_v21 = vmul.f32 %v3377_v56, %v365_v11  ;;  %v4646_v37 = vmov 0   ;;  %1546 = vmatpush.msra.mxu2 %v3586_v9  ;;  %v3607_v56 = vld [vmem:[#allocation4 + $0x8] sm:$0xff]  ;;  %v307_v11 = vrot.slane %v3340_v60, 2 }
 0x256   :  { %2506 = vset.pattern.permute.xlu1 %v4646_v37  ;;  %1569 = vmatpush.msra.mxu3 %v3590_v41  ;;  %4648 = vst [vmem:[#allocation30_spill] sm:$0xff] %v3607_v56  ;;  %v3612_v37 = vld [vmem:[#allocation4 + $0x10] sm:$0xff] }
 0x257   :  { %1589 = vmatpush.msrb.mxu1 %v3594_v5  ;;  %1547 = vmatpush.msra.mxu2 %v3596_v51  ;;  %4649 = vst [vmem:[#allocation31_spill] sm:$0xff] %v3612_v37  ;;  %v219_v51 = vpop.permute.xlu1 %218 }
 0x258   :  { %1570 = vmatpush.msra.mxu3 %v3601_v29  ;;  %v3630_v29 = vld [vmem:[#allocation4 + $0x38] sm:$0xff] }
 0x259   :  { %1590 = vmatpush.msrb.mxu1 %v3605_v26  ;;  %1548 = vmatpush.msra.mxu2 %v3607_v56  ;;  %4652 = vst [vmem:[#allocation32_spill] sm:$0xff] %v3630_v29 }
 0x25a   :  { %998 = vperm.xlu2 %2503, %v3004_v14   ;;  %v4650_v14 = vrot.slane %v3322_v20, 2  ;;  %1571 = vmatpush.msra.mxu3 %v3612_v37  ;;  %v3637_v37 = vld [vmem:[#allocation4 + $0x18] sm:$0xff] }
 0x25b   :  { %1591 = vmatpush.msrb.mxu1 %v3616_v22  ;;  %1549 = vmatmul.f32.vlgmr.msra.gmra.mxu2 %v4651_v15  ;;  %4653 = vst [vmem:[#allocation33_spill] sm:$0xff] %v3637_v37 }
 0x25c   :  { %579 = vrot.lane.b32.xlu1 %v405_v21, %s2787_s22  ;;  %v308_v41 = vsel %vm4614_vm4, %v4650_v14, %v307_v11  ;;  %1572 = vmatmul.f32.vlgmr.msra.gmra.mxu3 %v4651_v15  ;;  %v193_v14 = vrot.slane %v3340_v60, 7 }
 0x25d   :  { %1529 = vmatmul.f32.gmra.mxu1 %v4651_v15  ;;  %v348_v21 = vmul.f32 %v331_v13, %v308_v41  ;;  %1736 = vmatpush.msrb.mxu2 %v3365_v39  ;;  %v333_v13 = vpop.permute.xlu2 %332  ;;  %v4654_v41 = vrot.slane %v3322_v20, 7 }
 0x25e   :  { %1592 = vmatpush.msrb.mxu1 %v3625_v49  ;;  %1759 = vmatpush.msrb.mxu3 %v3431_v19 }
 0x25f   :  { %1737 = vmatpush.msrb.mxu2 %v3368_v44  ;;  %v194_v19 = vsel %vm4617_vm3, %v4654_v41, %v193_v14  ;;  %v390_v14 = vpop.permute.xlu1 %389 }
 0x260   :  { %1593 = vmatpush.msrb.mxu1 %v3630_v29  ;;  %1760 = vmatpush.msrb.mxu3 %v3444_v43 }
 0x261   :  { %1738 = vmatpush.msrb.mxu2 %v3370_v47  ;;  %v235_v47 = vmul.f32 %v219_v51, %v194_v19  ;;  %v317_v19 = vsel %vm4614_vm4, %v307_v11, 0.0  ;;  %v4602_v51 = vrot.slane %v3244_v28, 7  ;;  %v4656_v11 = vrot.slane %v3202_v36, 7 }
 0x262   :  { %547 = vrot.lane.b32.xlu2 %v348_v21, %s2791_s12  ;;  %1594 = vmatpush.msrb.mxu1 %v3637_v37  ;;  %v4655_v21 = vrot.slane %v3340_v60, 3 }
 0x263   :  { %1761 = vmatpush.msrb.mxu3 %v3449_v35  ;;  %1739 = vmatpush.msrb.mxu2 %v3375_v55 }
 0x264   :  { %485 = vrot.lane.b32.xlu1 %v3340_v60, %s2786_s17  ;;  %v374_v43 = vsel %vm4616_vm0, %v4655_v21, 0.0  ;;  %1552 = vmatmul.f32.gmra.mxu2 %v4651_v15  ;;  %v853_v21 = vsel %vm4617_vm3, %v4656_v11, %v4602_v51  ;;  %v4664_v51 = vld [vmem:[#allocation16_spill] sm:$0xff] }
 0x265   :  { %1595 = vmatmul.f32.vlgmr.msrb.gmra.mxu1 %v4651_v15  ;;  %1575 = vmatmul.f32.gmra.mxu3 %v4651_v15  ;;  %v406_v41 = vmul.f32 %v390_v14, %v374_v43  ;;  %v349_v43 = vmul.f32 %v333_v13, %v317_v19  ;;  %v824_v14 = vpop.permute.xlu0 %823  ;;  %v4601_v13 = vrot.slane %v3244_v28, 6 }
 0x266   :  { %1805 = vmatpush.msra.mxu1 %v3473_v23  ;;  %1740 = vmatpush.msrb.mxu2 %v3381_v30 }
 0x267   :  { %1762 = vmatpush.msrb.mxu3 %v3467_v3 }
 0x268   :  { %1806 = vmatpush.msra.mxu1 %v3481_v31  ;;  %1741 = vmatpush.msrb.mxu2 %v3383_v34 }
 0x269   :  { %1763 = vmatpush.msrb.mxu3 %v3477_v57 }
 0x26a   :  { %461 = vrot.lane.b32.xlu2 %v235_v47, %s2789_s25  ;;  %1807 = vmatpush.msra.mxu1 %v3490_v10  ;;  %v881_v47 = vpop.permute.xlu2 %880 }
 0x26b   :  { %1742 = vmatpush.msrb.mxu2 %v3392_v46  ;;  %1764 = vmatpush.msrb.mxu3 %v3485_v4 }
 0x26c   :  { %581 = vrot.lane.b32.xlu1 %v406_v41, %s2787_s22  ;;  %1808 = vmatpush.msra.mxu1 %v3504_v52  ;;  %v4657_v41 = vrot.slane %v3202_v36, 6 }
 0x26d   :  { %1598 = vmatmul.f32.gmra.mxu1 %v4651_v15  ;;  %1743 = vmatpush.msrb.mxu2 %v3401_v59  ;;  %v901_v15 = vmul.f32 %v881_v47, %v853_v21  ;;  %v704_v47 = vpop.f32.mrf.mxu0  ;;  %v3709_v21 = vpop.permute.xlu0 %481 }
 0x26e   :  { %1809 = vmatpush.msra.mxu1 %v3519_v48  ;;  %1765 = vmatpush.msrb.mxu3 %v3496_v33  ;;  %v796_v19 = vsel %vm4615_vm1, %v4657_v41, %v4601_v13  ;;  %v705_v11 = vadd.f32 %v3188_v12, %v704_v47  ;;  %4658 = vst [vmem:[#allocation34_spill] sm:$0xff] %v3709_v21  ;;  %v4660_v41 = vld [vmem:[#allocation25_spill] sm:$0xff]  ;;  %v4662_v47 = vld [vmem:[#allocation26_spill] sm:$0xff]  ;;  %v4663_v13 = vld [vmem:[#allocation27_spill] sm:$0xff] }
 0x26f   :  { %1744 = vmatpush.msrb.mxu2 %v3408_v27  ;;  %1793 = vmatpush.msrb.mxu0 %v4660_v41  ;;  %v4665_v21 = vld [vmem:[#allocation29_spill] sm:$0xff] }
 0x270   :  { %1810 = vmatpush.msra.mxu1 %v3529_v50  ;;  %1766 = vmatpush.msrb.mxu3 %v3508_v24  ;;  %v3721_v12 = vmax.f32 %v705_v11, 0.0  ;;  %v3736_v11 = vstv %s4544_s5 }
 0x271   :  { %1745 = vmatpush.msrb.mxu2 %v3410_v16  ;;  %1794 = vmatpush.msrb.mxu0 %v4662_v47 }
 0x272   :  { %549 = vrot.lane.b32.xlu2 %v349_v43, %s2791_s12  ;;  %1811 = vmatpush.msra.mxu1 %v3545_v2  ;;  %v844_v43 = vmul.f32 %v824_v14, %v796_v19  ;;  %v3715_v14 = vpop.permute.xlu1 %425  ;;  %v4661_v19 = vmov 6  }
 0x273   :  { %1767 = vmatpush.msrb.mxu3 %v3523_v32  ;;  %1746 = vmatpush.msrb.mxu2 %v3418_v42 }
 0x274   :  { %1116 = vrot.lane.b32.xlu1 %v901_v15, %s2780_s23  ;;  %1812 = vmatpush.msra.mxu1 %v3559_v63  ;;  %v4659_v15 = vld [vmem:[#allocation28_spill] sm:$0xff] }
 0x275   :  { %1768 = vmatpush.msrb.mxu3 %v3533_v17  ;;  %1747 = vmatpush.msrb.mxu2 %v3425_v18  ;;  %v1052_v36 = vpop.permute.xlu0 %1051 }
 0x276   :  { %1813 = vmatpush.msra.mxu1 %v3569_v61  ;;  %2512 = vset.pattern.permute.xlu2 %v4661_v19 }
 0x277   :  { %1769 = vmatpush.msrb.mxu3 %v3548_v25  ;;  %1748 = vmatpush.msrb.mxu2 %v3429_v1 }
 0x278   :  { %1814 = vmatpush.msra.mxu1 %v3584_v45  ;;  %1795 = vmatpush.msrb.mxu0 %v4663_v13 }
 0x279   :  { %1770 = vmatpush.msrb.mxu3 %v3561_v53  ;;  %1749 = vmatpush.msrb.mxu2 %v3442_v38 }
 0x27a   :  { %1088 = vrot.lane.b32.xlu2 %v844_v43, %s2799_s14  ;;  %1815 = vmatpush.msra.mxu1 %v3594_v5 }
 0x27b   :  { %1771 = vmatpush.msrb.mxu3 %v3571_v8  ;;  %1750 = vmatpush.msrb.mxu2 %v3456_v62 }
 0x27c   :  { %1816 = vmatpush.msra.mxu1 %v3605_v26  ;;  %1796 = vmatpush.msrb.mxu0 %v4665_v21 }
 0x27d   :  { %1772 = vmatpush.msrb.mxu3 %v3586_v9  ;;  %1751 = vmatpush.msrb.mxu2 %v3465_v58 }
 0x27e   :  { %1817 = vmatpush.msra.mxu1 %v3616_v22 }
 0x27f   :  { %1773 = vmatpush.msrb.mxu3 %v4659_v15  ;;  %1962 = vmatpush.msra.mxu2 %v3365_v39  ;;  %v4667_v39 = vrot.slane %v3244_v28, 3 }
 0x280   :  { %1818 = vmatpush.msra.mxu1 %v3625_v49 }
 0x281   :  { %1774 = vmatpush.msrb.mxu3 %v3607_v56  ;;  %1963 = vmatpush.msra.mxu2 %v3368_v44  ;;  %v4666_v56 = vrot.slane %v3721_v12, 3  ;;  %v2642_v44 = vld [vmem:[%s4539_s0] sm:$0xff] }
 0x282   :  { %1137 = vrot.lane.b32.xlu2 %v3244_v28, %s2798_s13  ;;  %1819 = vmatpush.msra.mxu1 %v3630_v29  ;;  %v4668_v29 = vld [vmem:[#allocation18_spill] sm:$0xff] }
 0x283   :  { %1985 = vmatpush.msra.mxu3 %v4664_v51  ;;  %v1026_v58 = vsel %vm4616_vm0, %v4667_v39, %v4666_v56  ;;  %v4669_v51 = vld [vmem:[#allocation14_spill] sm:$0xff]  ;;  %v4693_v39 = vrot.slane %v3244_v28, 7 }
 0x284   :  { %1820 = vmatpush.msra.mxu1 %v3637_v37  ;;  %1964 = vmatpush.msra.mxu2 %v4669_v51  ;;  %v1072_v15 = vmul.f32 %v1052_v36, %v1026_v58  ;;  %v4670_v37 = vld [vmem:[#allocation31_spill] sm:$0xff]  ;;  %v3766_v36 = vpop.permute.xlu2 %457  ;;  %v4673_v58 = vld [vmem:[#allocation20_spill] sm:$0xff] }
 0x285   :  { %v1300_v60 = vpop.xlane.xlu1 %1299  ;;  %1986 = vmatpush.msra.mxu3 %v4668_v29  ;;  %1797 = vmatpush.msrb.mxu0 %v4670_v37  ;;  %v4672_v29 = vld [vmem:[#allocation19_spill] sm:$0xff] }
 0x286   :  { %v1321_v43 = vadd.f32 %v3736_v11, %v1300_v60  ;;  %2031 = vmatpush.msrb.mxu1 %v3473_v23  ;;  %v4671_v23 = vld [vmem:[#allocation17_spill] sm:$0xff]  ;;  %1965 = vmatpush.msra.mxu2 %v3375_v55  ;;  %v4675_v55 = vld [vmem:[#allocation23_spill] sm:$0xff] }
 0x287   :  { %2008 = vmatpush.msra.mxu0 %v4671_v23  ;;  %1987 = vmatpush.msra.mxu3 %v3449_v35  ;;  %v4674_v35 = vld [vmem:[#allocation22_spill] sm:$0xff] }
 0x288   :  { %v1328_v60 = vsub.f32 %v2642_v44, %v1321_v43  ;;  %2032 = vmatpush.msrb.mxu1 %v3481_v31  ;;  %1966 = vmatpush.msra.mxu2 %v3381_v30 }
 0x289   :  { %2009 = vmatpush.msra.mxu0 %v4672_v29  ;;  %1988 = vmatpush.msra.mxu3 %v3467_v3  ;;  %v4682_v3 = vld [vmem:[#allocation21_spill] sm:$0xff] }
 0x28a   :  { %1339 = vperm.xlu0 %2502, %v1328_v60   ;;  %1221 = vrot.lane.b32.xlu2 %v1072_v15, %s2802_s18  ;;  %v4691_v15 = vld [vmem:[#allocation13_spill] sm:$0xff] }
 0x28b   :  { %2033 = vmatpush.msrb.mxu1 %v3490_v10  ;;  %2010 = vmatpush.msra.mxu0 %v4673_v58  ;;  %v4694_v58 = vld [vmem:[#allocation15_spill] sm:$0xff] }
 0x28c   :  { %1989 = vmatpush.msra.mxu3 %v3477_v57  ;;  %1967 = vmatpush.msra.mxu2 %v3383_v34  ;;  %v4683_v57 = vld [vmem:[#allocation30_spill] sm:$0xff] }
 0x28d   :  { %2034 = vmatpush.msrb.mxu1 %v3504_v52  ;;  %2011 = vmatpush.msra.mxu0 %v4674_v35  ;;  %v4676_v52 = vld [vmem:[#allocation24_spill] sm:$0xff]  ;;  %v968_v35 = vrot.slane %v3721_v12, 2 }
 0x28e   :  { %1990 = vmatpush.msra.mxu3 %v3485_v4  ;;  %1968 = vmatpush.msra.mxu2 %v3392_v46  ;;  %v93_v4 = vrot.slane %v3322_v20, 5 }
 0x28f   :  { %2035 = vmatpush.msrb.mxu1 %v3519_v48  ;;  %2012 = vmatpush.msra.mxu0 %v4675_v55 }
 0x290   :  { %1991 = vmatpush.msra.mxu3 %v3496_v33  ;;  %1969 = vmatpush.msra.mxu2 %v3401_v59 }
 0x291   :  { %2036 = vmatpush.msrb.mxu1 %v3529_v50  ;;  %2013 = vmatpush.msra.mxu0 %v4676_v52  ;;  %v707_v50 = vpop.f32.mrf.mxu0 }
 0x292   :  { %1992 = vmatpush.msra.mxu3 %v3508_v24  ;;  %1970 = vmatpush.msra.mxu2 %v3408_v27  ;;  %v2643_v24 = vld [vmem:[%s4539_s0 + $0x28] sm:$0xff] }
 0x293   :  { %2037 = vmatpush.msrb.mxu1 %v3545_v2  ;;  %2014 = vmatpush.msra.mxu0 %v3499_v54  ;;  %v91_v34 = vrot.slane %v2643_v24, 5  ;;  %v2644_v54 = vld [vmem:[%s4539_s0 + $0x8] sm:$0xff]  ;;  %v2649_v24 = vld [vmem:[%s4540_s1 + $0x10] sm:$0xff] }
 0x294   :  { %1993 = vmatpush.msra.mxu3 %v3523_v32  ;;  %1971 = vmatpush.msra.mxu2 %v3410_v16  ;;  %v911_v32 = vrot.slane %v3721_v12, 1 }
 0x295   :  { %v1303_v48 = vpop.xlane.xlu2 %1302  ;;  %2038 = vmatpush.msrb.mxu1 %v3559_v63  ;;  %2015 = vmatpush.msra.mxu0 %v3510_v6  ;;  %v4677_v6 = vld [vmem:[#allocation10_spill] sm:$0xff]  ;;  %v3872_v63 = vld [vmem:[%s4542_s3] ss:$0 sm:$0xff] }
 0x296   :  { %v3787_v30 = vadd.f32 %v3736_v11, %v1303_v48  ;;  %1994 = vmatpush.msra.mxu3 %v3533_v17  ;;  %1972 = vmatpush.msra.mxu2 %v3418_v42  ;;  %v4678_v59 = vrot.slane %v4677_v6, 5  ;;  %v4679_v17 = vrot.slane %v3244_v28, 1  ;;  %v3827_v42 = vld [vmem:[%s4540_s1 + $0x28] sm:$0xff]  ;;  %v797_v6 = vrot.slane %v3721_v12, 6 }
 0x297   :  { %2039 = vmatpush.msrb.mxu1 %v3569_v61  ;;  %2016 = vmatpush.msra.mxu0 %v3525_v40 }
 0x298   :  { %v1329_v46 = vsub.f32 %v2644_v54, %v3787_v30  ;;  %1995 = vmatpush.msra.mxu3 %v3548_v25  ;;  %v92_v27 = vsel %vm81_vm5, %v4678_v59, %v91_v34  ;;  %1973 = vmatpush.msra.mxu2 %v3425_v18  ;;  %v912_v40 = vsel %vm4613_vm2, %v4679_v17, %v911_v32  ;;  %v4696_v59 = vmov 5  }
 0x299   :  { %2040 = vmatpush.msrb.mxu1 %v3584_v45  ;;  %2017 = vmatpush.msra.mxu0 %v3535_v7  ;;  %v111_v18 = vmul.f32 %v3827_v42, %v92_v27  ;;  %v94_v25 = vsel %vm81_vm5, %v91_v34, %v93_v4  ;;  %v4695_v34 = vrot.slane %v3244_v28, 2  ;;  %v4697_v27 = vrot.slane %v3244_v28, 6 }
 0x29a   :  { %1344 = vperm.xlu0 %2502, %v1329_v46   ;;  %1996 = vmatpush.msra.mxu3 %v3561_v53 }
 0x29b   :  { %2041 = vmatpush.msrb.mxu1 %v3594_v5  ;;  %2018 = vmatpush.msra.mxu0 %v3554_v0  ;;  %v597_v53 = vsel %vm591_vm6, %v111_v18, %v3715_v14  ;;  %v4685_v5 = vld [vmem:[#allocation34_spill] sm:$0xff]  ;;  %v428_v14 = vpop.permute.xlu0 %427  ;;  %v969_v54 = vsel %vm4614_vm4, %v4695_v34, %v968_v35  ;;  %v798_v17 = vsel %vm4615_vm1, %v4697_v27, %v797_v6 }
 0x29c   :  { %1974 = vmatpush.msra.mxu2 %v3429_v1  ;;  %1997 = vmatpush.msra.mxu3 %v3571_v8  ;;  %v708_v8 = vadd.f32 %v3872_v63, %v707_v50 }
 0x29d   :  { %v938_v45 = vpop.permute.xlu1 %937  ;;  %v3818_v16 = vpop.permute.xlu2 %994  ;;  %2042 = vmatpush.msrb.mxu1 %v3605_v26  ;;  %2019 = vmatpush.msra.mxu0 %v4660_v41  ;;  %v4681_v26 = vld [vmem:[#allocation32_spill] sm:$0xff]  ;;  %v4692_v41 = vmov 0  }
 0x29e   :  { %v958_v7 = vmul.f32 %v938_v45, %v912_v40  ;;  %1975 = vmatpush.msra.mxu2 %v3442_v38  ;;  %1998 = vmatpush.msra.mxu3 %v3586_v9  ;;  %v606_v38 = vsel %vm600_vm7, %v597_v53, %v3766_v36  ;;  %v1015_v46 = vmul.f32 %v3818_v16, %v969_v54 }
 0x29f   :  { %2043 = vmatpush.msrb.mxu1 %v3616_v22  ;;  %2020 = vmatpush.msra.mxu0 %v4662_v47  ;;  %v4680_v22 = vld [vmem:[#allocation28_spill] sm:$0xff]  ;;  %v615_v31 = vsel %vm609_vm8, %v606_v38, %v4685_v5  ;;  %v3883_v47 = vmax.f32 %v708_v8, 0.0 }
 0x2a0   :  { %1165 = vrot.lane.b32.xlu1 %v958_v7, %s2801_s16  ;;  %1976 = vmatpush.msra.mxu2 %v3456_v62  ;;  %v4684_v62 = vld [vmem:[#allocation33_spill] sm:$0xff] }
 0x2a1   :  { %2021 = vmatpush.msra.mxu0 %v4663_v13  ;;  %2044 = vmatpush.msrb.mxu1 %v3625_v49  ;;  %v2646_v49 = vld [vmem:[%s4540_s1 + $0x18] sm:$0xff]  ;;  %v4622_v13 = vrot.slane %v3721_v12, 7  ;;  %v4621_v36 = vrot.slane %v3883_v47, 2  ;;  %v4620_v45 = vrot.slane %v3883_v47, 1  ;;  %v1027_v27 = vrot.slane %v3883_v47, 3 }
 0x2a2   :  { %483 = vrot.lane.b32.xlu0 %v3322_v20, %s2786_s17  ;;  %1999 = vmatpush.msra.mxu3 %v4680_v22  ;;  %v1336_v22 = vld [vmem:[%s4546_s7] sm:$0xf] }
 0x2a3   :  { %2504 = vset.pattern.permute.xlu0 %v4661_v19  ;;  %2022 = vmatpush.msra.mxu0 %v4665_v21  ;;  %v4690_v21 = vmov 1   ;;  %v855_v51 = vsel %vm4617_vm3, %v4693_v39, %v4622_v13  ;;  %v971_v55 = vsel %vm4614_vm4, %v968_v35, %v4621_v36  ;;  %v914_v16 = vsel %vm4613_vm2, %v911_v32, %v4620_v45 }
 0x2a4   :  { %2045 = vmatpush.msrb.mxu1 %v4681_v26  ;;  %1977 = vmatpush.msra.mxu2 %v4682_v3  ;;  %v3938_v32 = vperm.slane %v1336_v22, 0  ;;  %vm4701_vm2 = vcmask 48128  }
 0x2a5   :  { %v514_v0 = vpop.permute.xlu1 %513  ;;  %v546_v1 = vpop.permute.xlu2 %545  ;;  %2000 = vmatpush.msra.mxu3 %v4683_v57  ;;  %2023 = vmatpush.msra.mxu0 %v4670_v37  ;;  %v2648_v37 = vld [vmem:[%s4540_s1 + $0x30] sm:$0xff]  ;;  %v3940_v57 = vperm.slane %v1336_v22, 1 }
 0x2a6   :  { %2046 = vmatpush.msrb.mxu1 %v4684_v62  ;;  %v624_v9 = vsel %vm4686_vm9, %v615_v31, %v514_v0  ;;  %v112_v56 = vmul.f32 %v2648_v37, %v94_v25 }
 0x2a7   :  { %v633_v10 = vsel %vm4687_vm10, %v624_v9, %v546_v1  ;;  %v1335_v1 = vld [vmem:[%s4545_s6] sm:$0xf] }
 0x2a8   :  { %770 = vperm.xlu1 %2506, %v2646_v49   ;;  %v598_v43 = vsel %vm591_vm6, %v112_v56, %v428_v14  ;;  %v3932_v38 = vperm.slane %v1335_v1, 0  ;;  %v3934_v26 = vperm.slane %v1335_v1, 1  ;;  %v3936_v3 = vperm.slane %v1335_v1, 3 }
 0x2aa   :  { %1055 = vperm.xlu0 %2504, %v2646_v49   ;;  %v3942_v49 = vperm.slane %v1336_v22, 3 }
 0x2ad   :  { %v578_v2 = vpop.permute.xlu1 %577  ;;  %v828_v33 = vpop.permute.xlu2 %827 }
 0x2ae   :  { %v642_v61 = vsel %vm4688_vm11, %v633_v10, %v578_v2  ;;  %v845_v40 = vmul.f32 %v828_v33, %v798_v17  ;;  %vm4700_vm11 = vcmask 39936  }
 0x2af   :  { %2417 = vmatmul.msk.f32.gmra.mxu0 %vm4689_vm12, %v642_v61 }
 0x2b0   :  { %1139 = vrot.lane.b32.xlu1 %v3721_v12, %s2798_s13 }
 0x2b1   :  { %2507 = vset.pattern.permute.xlu1 %v4690_v21 }
 0x2b2   :  { %429 = vrot.lane.b32.xlu0 %v4691_v15, %s2788_s24 }
 0x2b3   :  { %2505 = vset.pattern.permute.xlu0 %v4692_v41 }
 0x2b5   :  { %v885_v44 = vpop.permute.xlu1 %884  ;;  %v460_v60 = vpop.permute.xlu2 %459 }
 0x2b6   :  { %v902_v23 = vmul.f32 %v885_v44, %v855_v51  ;;  %v3892_v29 = vsel %vm600_vm7, %v598_v43, %v460_v60  ;;  %v3950_v43 = vperm.slane %v1335_v1, 2  ;;  %v3953_v51 = vperm.slane %v1336_v22, 2 }
 0x2b8   :  { %1118 = vrot.lane.b32.xlu2 %v902_v23, %s2780_s23 }
 0x2ba   :  { %517 = vrot.lane.b32.xlu0 %v4694_v58, %s2790_s30 }
 0x2bd   :  { %v999_v52 = vpop.permute.xlu2 %998 }
 0x2be   :  { %v1016_v48 = vmul.f32 %v999_v52, %v971_v55  ;;  %v942_v7 = vpop.permute.xlu1 %941 }
 0x2bf   :  { %v959_v18 = vmul.f32 %v942_v7, %v914_v16 }
 0x2c0   :  { %1195 = vrot.lane.b32.xlu2 %v1016_v48, %s2800_s15 }
 0x2c2   :  { %766 = vperm.xlu0 %2505, %v2649_v24  }
 0x2c5   :  { %v548_v60 = vpop.permute.xlu2 %547 }
 0x2c6   :  { %v516_v23 = vpop.permute.xlu1 %515 }
 0x2ca   :  { %1193 = vrot.lane.b32.xlu0 %v1015_v46, %s2800_s15 }
 0x2cb   :  { %2511 = vset.pattern.permute.xlu0 %v4696_v59 }
 0x2d2   :  { %1090 = vrot.lane.b32.xlu0 %v845_v40, %s2799_s14  ;;  %v1527_v53 = vpop.f32.mrf.mxu1 }
 0x2da   :  { %1167 = vrot.lane.b32.xlu0 %v959_v18, %s2801_s16  ;;  %v1530_v0 = vpop.f32.mrf.mxu1  ;;  %v4698_v18 = vld [vmem:[#allocation12_spill] sm:$0xff] }
 0x2de   :  { %v1550_v10 = vpop.f32.mrf.mxu2 }
 0x2df   :  { %v1573_v34 = vpop.f32.mrf.mxu3 }
 0x2e2   :  { %v1596_v2 = vpop.f32.mrf.mxu1 }
 0x2e7   :  { %v1553_v16 = vpop.f32.mrf.mxu2 }
 0x2fc   :  { %v1340_v62 = vpop.permute.xlu0 %1339 }
 0x2fd   :  { %v1356_v5 = vmul.f32 %v3932_v38, %v1340_v62  ;;  %v1357_v31 = vmul.f32 %v3934_v26, %v1340_v62  ;;  %v1359_v9 = vmul.f32 %v3936_v3, %v1340_v62  ;;  %v1358_v39 = vmul.f32 %v3950_v43, %v1340_v62 }
 0x2ff   :  { %v1373_v33 = vadd.f32 %v3938_v32, %v1356_v5  ;;  %v1374_v50 = vadd.f32 %v3940_v57, %v1357_v31  ;;  %v1376_v25 = vadd.f32 %v3942_v49, %v1359_v9  ;;  %v1375_v55 = vadd.f32 %v3953_v51, %v1358_v39  ;;  %v1599_v31 = vpop.f32.mrf.mxu1 }
 0x300   :  { %v4699_v9 = vrot.slane %v3721_v12, 3 }
 0x301   :  { %v1602_v61 = vadd.f32 %v1527_v53, %v1373_v33  ;;  %v1603_v8 = vadd.f32 %v1550_v10, %v1374_v50  ;;  %v1605_v37 = vadd.f32 %v1596_v2, %v1376_v25  ;;  %v1604_v17 = vadd.f32 %v1573_v34, %v1375_v55 }
 0x302   :  { %v95_v53 = vrot.slane %v4698_v18, 5  ;;  %v1028_v10 = vsel %vm4616_vm0, %v4699_v9, %v1027_v27 }
 0x303   :  { %v2420_v56 = vmul.f32 -1.442695, %v1602_v61  ;;  %v2422_v14 = vmul.f32 -1.442695, %v1603_v8  ;;  %v2424_v15 = vmul.f32 -1.442695, %v1605_v37  ;;  %v3983_v8 = vpop.permute.xlu2 %461  ;;  %v580_v37 = vpop.permute.xlu1 %579 }
 0x305   :  { %2530 = vpow2.f32 %v2420_v56 }
 0x306   :  { %2532 = vpow2.f32 %v2422_v14 }
 0x307   :  { %2534 = vpow2.f32 %v2424_v15 }
 0x30b   :  { %v2531_v44 = vpop.eup %2530 }
 0x30c   :  { %v2533_v58 = vpop.eup %2532  ;;  %v3955_v35 = vadd.f32 1.0, %v2531_v44  ;;  %v1345_v52 = vpop.permute.xlu0 %1344 }
 0x30d   :  { %v2535_v48 = vpop.eup %2534  ;;  %v3958_v24 = vadd.f32 1.0, %v2533_v58  ;;  %v1360_v54 = vmul.f32 %v3932_v38, %v1345_v52  ;;  %v1361_v46 = vmul.f32 %v3934_v26, %v1345_v52  ;;  %v1363_v62 = vmul.f32 %v3936_v3, %v1345_v52 }
 0x30e   :  { %2536 = vrcp.f32 %v3955_v35  ;;  %v3965_v40 = vadd.f32 1.0, %v2535_v48  ;;  %v1627_v14 = vand.u32 2147483647, %v3955_v35  ;;  %v1362_v39 = vmul.f32 %v3950_v43, %v1345_v52 }
 0x30f   :  { %2538 = vrcp.f32 %v3958_v24  ;;  %v1377_v7 = vadd.f32 %v3938_v32, %v1360_v54  ;;  %v1378_v1 = vadd.f32 %v3940_v57, %v1361_v46  ;;  %v1380_v50 = vadd.f32 %v3942_v49, %v1363_v62 }
 0x310   :  { %2540 = vrcp.f32 %v3965_v40  ;;  %v1629_v58 = vand.u32 2147483648, %v3955_v35  ;;  %v1665_v46 = vand.u32 2147483647, %v3958_v24  ;;  %vm1661_vm4 = vweird.f32 %v3958_v24 }
 0x311   :  { %v1606_v22 = vadd.f32 %v1530_v0, %v1377_v7  ;;  %v1607_v5 = vadd.f32 %v1553_v16, %v1378_v1  ;;  %2542 = vtanh.f32 %v1604_v17  ;;  %v3981_v0 = vsel %vm81_vm5, %v93_v4, %v95_v53 }
 0x312   :  { %v1609_v20 = vadd.f32 %v1599_v31, %v1380_v50  ;;  %v1667_v4 = vand.u32 2147483648, %v3958_v24  ;;  %vm1623_vm1 = vweird.f32 %v3955_v35  ;;  %vm1628_vm3 = vcmp.eq.f32.partialorder %v1627_v14, 8.507059e+37  ;;  %v486_v14 = vpop.permute.xlu1 %485 }
 0x313   :  { %v2421_v33 = vmul.f32 -1.442695, %v1606_v22  ;;  %v2423_v15 = vmul.f32 -1.442695, %v1607_v5 }
 0x314   :  { %v2537_v2 = vpop.eup %2536  ;;  %v484_v25 = vpop.permute.xlu0 %483  ;;  %v2425_v17 = vmul.f32 -1.442695, %v1609_v20  ;;  %v1668_v5 = vor.u32 1.1754944e-38, %v1667_v4 }
 0x315   :  { %v2539_v61 = vpop.eup %2538  ;;  %v1619_v56 = vmul.f32 %v2537_v2, %v3955_v35  ;;  %2544 = vpow2.f32 %v2421_v33  ;;  %v616_v48 = vsel %vm609_vm8, %v3892_v29, %v484_v25  ;;  %vm1624_vm10 = vweird.f32 %v2537_v2 }
 0x316   :  { %v1657_v44 = vmul.f32 %v2539_v61, %v3958_v24  ;;  %2546 = vpow2.f32 %v2423_v15  ;;  %v3993_v34 = vpop.eup %2540  ;;  %v625_v52 = vsel %vm4686_vm9, %v616_v48, %v516_v23  ;;  %vm1662_vm12 = vweird.f32 %v2539_v61  ;;  %vm1625_vm0 = vmor %vm1623_vm1, %vm1624_vm10 }
 0x317   :  { %v1620_v55 = vsub.f32 1.0, %v1619_v56  ;;  %v1697_v16 = vmul.f32 %v3993_v34, %v3965_v40  ;;  %v634_v18 = vsel %vm4700_vm11, %v625_v52, %v548_v60  ;;  %v2543_v53 = vpop.eup %2542  ;;  %2548 = vpow2.f32 %v2425_v17 }
 0x318   :  { %v1658_v54 = vsub.f32 1.0, %v1657_v44  ;;  %v643_v29 = vsel %vm4701_vm2, %v634_v18, %v580_v37  ;;  %vm4702_vm9 = vcmask 56320   ;;  %v1630_v60 = vor.u32 1.1754944e-38, %v1629_v58  ;;  %vm1663_vm2 = vmor %vm1661_vm4, %vm1662_vm12  ;;  %v4011_v44 = vpop.permute.xlu2 %549 }
 0x319   :  { %v1621_v7 = vmul.f32 %v2537_v2, %v1620_v55  ;;  %v1698_v62 = vsub.f32 1.0, %v1697_v16  ;;  %2418 = vmatmul.msk.f32.gmra.mxu0 %vm4702_vm9, %v643_v29  ;;  %vm1666_vm11 = vcmp.eq.f32.partialorder %v1665_v46, 8.507059e+37  ;;  %v1379_v15 = vadd.f32 %v3953_v51, %v1362_v39  ;;  %v4024_v39 = vld [vmem:[%s4540_s1 + $0x38] sm:$0xff] }
 0x31a   :  { %v1659_v1 = vmul.f32 %v2539_v61, %v1658_v54  ;;  %v113_v54 = vmul.f32 %v4024_v39, %v3981_v0  ;;  %v1707_v16 = vand.u32 2147483648, %v3965_v40  ;;  %vm1701_vm1 = vweird.f32 %v3965_v40 }
 0x31b   :  { %v1622_v22 = vadd.f32 %v2537_v2, %v1621_v7  ;;  %v2545_v23 = vpop.eup %2544  ;;  %v1705_v7 = vand.u32 2147483647, %v3965_v40 }
 0x31c   :  { %v1660_v31 = vadd.f32 %v2539_v61, %v1659_v1  ;;  %v1056_v9 = vpop.permute.xlu0 %1055  ;;  %v2547_v33 = vpop.eup %2546  ;;  %v4006_v24 = vadd.f32 1.0, %v2545_v23 }
 0x31d   :  { %v1626_v50 = vsel %vm1625_vm0, %v2537_v2, %v1622_v22  ;;  %v1073_v25 = vmul.f32 %v1056_v9, %v1028_v10  ;;  %v4008_v56 = vadd.f32 1.0, %v2547_v33  ;;  %v1699_v2 = vmul.f32 %v3993_v34, %v1698_v62  ;;  %v2549_v4 = vpop.eup %2548  ;;  %v1576_v10 = vpop.f32.mrf.mxu3  ;;  %v4045_v62 = vld [vmem:[%s4540_s1 + $0x20] sm:$0xff] }
 0x31e   :  { %v1631_v35 = vsel %vm1628_vm3, %v1630_v60, %v1626_v50  ;;  %v1664_v37 = vsel %vm1663_vm2, %v2539_v61, %v1660_v31  ;;  %2550 = vrcp.f32 %v4006_v24  ;;  %v4017_v61 = vadd.f32 1.0, %v2549_v4  ;;  %v582_v33 = vpop.permute.xlu1 %581 }
 0x31f   :  { %v1669_v58 = vsel %vm1666_vm11, %v1668_v5, %v1664_v37  ;;  %v1728_v20 = vmul.f32 %v2543_v53, %v1631_v35  ;;  %1223 = vrot.lane.b32.xlu1 %v1073_v25, %s2802_s18  ;;  %2552 = vrcp.f32 %v4008_v56  ;;  %v1608_v46 = vadd.f32 %v1576_v10, %v1379_v15 }
 0x320   :  { %v1726_v55 = vmul.f32 0.0, %v1669_v58  ;;  %2554 = vrcp.f32 %v4017_v61  ;;  %v1700_v17 = vadd.f32 %v3993_v34, %v1699_v2  ;;  %vm1702_vm0 = vweird.f32 %v3993_v34  ;;  %v4054_v9 = vpop.permute.xlu2 %1088 }
 0x321   :  { %vm4037_vm3 = vmor %vm1701_vm1, %vm1702_vm0  ;;  %v1682_v23 = vand.u32 2147483648, %v4008_v56  ;;  %vm1706_vm4 = vcmp.eq.f32.partialorder %v1705_v7, 8.507059e+37  ;;  %v1708_v60 = vor.u32 1.1754944e-38, %v1707_v16  ;;  %v1642_v25 = vand.u32 2147483647, %v4006_v24 }
 0x322   :  { %v4019_v48 = vadd.f32 %v1728_v20, %v1726_v55  ;;  %v1704_v40 = vsel %vm4037_vm3, %v3993_v34, %v1700_v17  ;;  %v1644_v35 = vand.u32 2147483648, %v4006_v24  ;;  %v1680_v4 = vand.u32 2147483647, %v4008_v56 }
 0x323   :  { %v1709_v20 = vsel %vm1706_vm4, %v1708_v60, %v1704_v40  ;;  %vm1638_vm9 = vweird.f32 %v4006_v24  ;;  %vm1676_vm2 = vweird.f32 %v4008_v56  ;;  %vm4705_vm0 = vcmask 31744   ;;  %v2653_v40 = vld [vmem:[#allocation4 + $0x1e8] sm:$0xff] }
 0x324   :  { %2556 = vtanh.f32 %v4019_v48  ;;  %v430_v52 = vpop.permute.xlu0 %429  ;;  %v2551_v18 = vpop.eup %2550  ;;  %vm1643_vm1 = vcmp.eq.f32.partialorder %v1642_v25, 8.507059e+37  ;;  %vm4706_vm4 = vcmask 39936   ;;  %v738_v60 = vrot.slane %v3244_v28, 5  ;;  %v4083_v25 = vld [vmem:[#allocation4 + $0x1d8] sm:$0xff] }
 0x325   :  { %v2553_v53 = vpop.eup %2552  ;;  %v1634_v0 = vmul.f32 %v2551_v18, %v4006_v24  ;;  %v599_v1 = vsel %vm591_vm6, %v113_v54, %v430_v52  ;;  %2558 = vtanh.f32 %v1608_v46  ;;  %vm1639_vm10 = vweird.f32 %v2551_v18 }
 0x326   :  { %v1672_v22 = vmul.f32 %v2553_v53, %v4008_v56  ;;  %v4052_v31 = vpop.eup %2554  ;;  %v608_v37 = vsel %vm600_vm7, %v599_v1, %v3983_v8  ;;  %vm1677_vm12 = vweird.f32 %v2553_v53  ;;  %vm1640_vm11 = vmor %vm1638_vm9, %vm1639_vm10  ;;  %v1645_v52 = vor.u32 1.1754944e-38, %v1644_v35  ;;  %v2652_v56 = vld [vmem:[#allocation4 + $0x1e0] sm:$0xff] }
 0x327   :  { %831 = vperm.xlu1 %2507, %v4045_v62   ;;  %v1635_v5 = vsub.f32 1.0, %v1634_v0  ;;  %v1712_v58 = vmul.f32 %v4052_v31, %v4017_v61  ;;  %v617_v8 = vsel %vm609_vm8, %v608_v37, %v486_v14  ;;  %v1683_v0 = vor.u32 1.1754944e-38, %v1682_v23  ;;  %vm1678_vm3 = vmor %vm1676_vm2, %vm1677_vm12  ;;  %v1117_v37 = vpop.permute.xlu1 %1116 }
 0x328   :  { %v1673_v50 = vsub.f32 1.0, %v1672_v22  ;;  %vm1681_vm10 = vcmp.eq.f32.partialorder %v1680_v4, 8.507059e+37  ;;  %vm4707_vm9 = vcmask 48128   ;;  %vm4708_vm12 = vcmask 56320   ;;  %v1138_v35 = vpop.permute.xlu2 %1137 }
 0x329   :  { %v1636_v34 = vmul.f32 %v2551_v18, %v1635_v5  ;;  %v1713_v54 = vsub.f32 1.0, %v1712_v58  ;;  %vm1717_vm2 = vweird.f32 %v4052_v31  ;;  %v4709_v58 = vld [vmem:[#allocation11_spill] sm:$0xff] }
 0x32a   :  { %v2557_v15 = vpop.eup %2556  ;;  %v1674_v2 = vmul.f32 %v2553_v53, %v1673_v50  ;;  %v2655_v50 = vld [vmem:[#allocation4 + $0x1c0] sm:$0xff] }
 0x32b   :  { %v4063_v55 = vmul.f32 %v2557_v15, %v1709_v20  ;;  %v1637_v10 = vadd.f32 %v2551_v18, %v1636_v34  ;;  %v2559_v17 = vpop.eup %2558  ;;  %v1714_v5 = vmul.f32 %v4052_v31, %v1713_v54  ;;  %v2658_v34 = vld [vmem:[#allocation4 + $0x1a0] sm:$0xff]  ;;  %v4710_v20 = vrot.slane %v4709_v58, 5  ;;  %v2659_v54 = vld [vmem:[#allocation4 + $0x1a8] sm:$0xff] }
 0x32c   :  { %v518_v46 = vpop.permute.xlu0 %517  ;;  %v1675_v7 = vadd.f32 %v2553_v53, %v1674_v2  ;;  %v2672_v58 = vld [vmem:[#allocation4 + $0x120] sm:$0xff] }
 0x32d   :  { %1752 = vmatmul.f32.vlgmr.msrb.gmra.mxu2 %v4063_v55  ;;  %1775 = vmatmul.f32.vlgmr.msrb.gmra.mxu3 %v4063_v55  ;;  %v626_v16 = vsel %vm4705_vm0, %v617_v8, %v518_v46  ;;  %v1641_v1 = vsel %vm1640_vm11, %v2551_v18, %v1637_v10  ;;  %v739_v2 = vsel %vm81_vm5, %v4710_v20, %v738_v60  ;;  %v1722_v46 = vand.u32 2147483648, %v4017_v61  ;;  %v2673_v20 = vld [vmem:[#allocation4 + $0x128] sm:$0xff] }
 0x32e   :  { %1821 = vmatmul.f32.vlgmr.msra.gmra.mxu1 %v4063_v55  ;;  %v635_v24 = vsel %vm4706_vm4, %v626_v16, %v4011_v44  ;;  %2188 = vmatpush.msrb.mxu2 %v2652_v56  ;;  %v1646_v14 = vsel %vm1643_vm1, %v1645_v52, %v1641_v1  ;;  %v1679_v29 = vsel %vm1678_vm3, %v2553_v53, %v1675_v7  ;;  %v4080_v44 = vld [vmem:[#allocation4 + $0x1f8] sm:$0xff]  ;;  %v2661_v52 = vld [vmem:[#allocation4 + $0x180] sm:$0xff]  ;;  %vm1716_vm11 = vweird.f32 %v4017_v61  ;;  %v2662_v16 = vld [vmem:[#allocation4 + $0x188] sm:$0xff] }
 0x32f   :  { %v644_v22 = vsel %vm4707_vm9, %v635_v24, %v582_v33  ;;  %2508 = vset.pattern.permute.xlu1 %v4692_v41  ;;  %2210 = vmatpush.msrb.mxu3 %v2653_v40  ;;  %v1684_v18 = vsel %vm1681_vm10, %v1683_v0, %v1679_v29  ;;  %v1729_v23 = vmul.f32 %v2559_v17, %v1646_v14  ;;  %v2656_v33 = vld [vmem:[#allocation4 + $0x1c8] sm:$0xff]  ;;  %v4097_v17 = vld [vmem:[#allocation4 + $0x1b8] sm:$0xff]  ;;  %v1720_v7 = vand.u32 2147483647, %v4017_v61  ;;  %vm4104_vm0 = vmor %vm1716_vm11, %vm1717_vm2 }
 0x330   :  { %2419 = vmatmul.msk.f32.gmra.mxu0 %vm4708_vm12, %v644_v22  ;;  %2254 = vmatpush.msra.mxu1 %v4080_v44  ;;  %v1727_v53 = vmul.f32 0.0, %v1684_v18  ;;  %v1715_v10 = vadd.f32 %v4052_v31, %v1714_v5  ;;  %v4110_v24 = vld [vmem:[#allocation4 + $0x198] sm:$0xff]  ;;  %v2664_v56 = vld [vmem:[#allocation4 + $0x160] sm:$0xff]  ;;  %v2665_v29 = vld [vmem:[#allocation4 + $0x168] sm:$0xff]  ;;  %v1723_v22 = vor.u32 1.1754944e-38, %v1722_v46  ;;  %vm4713_vm3 = vcmask 523264  }
 0x331   :  { %2189 = vmatpush.msrb.mxu2 %v2655_v50  ;;  %2211 = vmatpush.msrb.mxu3 %v2656_v33  ;;  %v4119_v18 = vld [vmem:[#allocation4 + $0x178] sm:$0xff]  ;;  %vm1721_vm1 = vcmp.eq.f32.partialorder %v1720_v7, 8.507059e+37  ;;  %v2669_v5 = vld [vmem:[#allocation4 + $0x148] sm:$0xff]  ;;  %vm4714_vm4 = vcmask 654336   ;;  %vm4715_vm10 = vcmask 785408   ;;  %v2677_v7 = vld [vmem:[#allocation4 + $0x190] sm:$0xff] }
 0x332   :  { %2255 = vmatpush.msra.mxu1 %v4083_v25  ;;  %v4086_v15 = vadd.f32 %v1729_v23, %v1727_v53  ;;  %v1719_v61 = vsel %vm4104_vm0, %v4052_v31, %v1715_v10  ;;  %v2668_v23 = vld [vmem:[#allocation4 + $0x140] sm:$0xff]  ;;  %v1166_v53 = vpop.permute.xlu1 %1165  ;;  %v2670_v31 = vld [vmem:[#allocation4 + $0x1d0] sm:$0xff]  ;;  %v4122_v33 = vld [vmem:[#allocation4 + $0x158] sm:$0xff]  ;;  %vm4716_vm9 = vcmask 916480  }
 0x333   :  { %2190 = vmatpush.msrb.mxu2 %v2658_v34  ;;  %2212 = vmatpush.msrb.mxu3 %v2659_v54  ;;  %v1724_v50 = vsel %vm1721_vm1, %v1723_v22, %v1719_v61  ;;  %v2674_v10 = vld [vmem:[#allocation4 + $0x1b0] sm:$0xff]  ;;  %v4129_v54 = vld [vmem:[#allocation4 + $0x138] sm:$0xff]  ;;  %v2684_v22 = vld [vmem:[#allocation4 + $0xe8] sm:$0xff]  ;;  %vm4721_vm1 = vcmask 1040384  }
 0x334   :  { %v767_v4 = vpop.permute.xlu0 %766  ;;  %2560 = vtanh.f32 %v4086_v15  ;;  %2256 = vmatpush.msra.mxu1 %v4097_v17  ;;  %v2682_v61 = vld [vmem:[#allocation4 + $0x150] sm:$0xff]  ;;  %vm4717_vm12 = vmmov %vm4713_vm3 }
 0x335   :  { %v787_v8 = vmul.f32 %v767_v4, %v739_v2  ;;  %2191 = vmatpush.msrb.mxu2 %v2661_v52  ;;  %2213 = vmatpush.msrb.mxu3 %v2662_v16  ;;  %v1222_v2 = vpop.permute.xlu2 %1221  ;;  %v2678_v16 = vld [vmem:[#allocation4 + $0x100] sm:$0xff]  ;;  %vm4718_vm2 = vmmov %vm4714_vm4 }
 0x336   :  { %2257 = vmatpush.msra.mxu1 %v4110_v24  ;;  %vm4719_vm11 = vmmov %vm4715_vm10 }
 0x337   :  { %v1241_v1 = vsel %vm1238_vm13, %v787_v8, %v4054_v9  ;;  %2192 = vmatpush.msrb.mxu2 %v2664_v56  ;;  %2214 = vmatpush.msrb.mxu3 %v2665_v29  ;;  %v2666_v9 = vld [vmem:[#allocation4 + $0x1f0] sm:$0xff]  ;;  %v4139_v8 = vld [vmem:[%s4543_s4] ss:$0 sm:$0xff]  ;;  %v2680_v56 = vld [vmem:[#allocation4 + $0x108] sm:$0xff] }
 0x338   :  { %v1249_v14 = vsel %vm1246_vm14, %v1241_v1, %v1117_v37  ;;  %1798 = vmatmul.f32.vlgmr.msrb.gmra.mxu0 %v4063_v55  ;;  %2258 = vmatpush.msra.mxu1 %v4119_v18  ;;  %v2679_v1 = vld [vmem:[#allocation4 + $0x170] sm:$0xff]  ;;  %v2683_v29 = vld [vmem:[#allocation4 + $0xe0] sm:$0xff]  ;;  %vm4720_vm0 = vmmov %vm4716_vm9 }
 0x339   :  { %v1257_v40 = vsel %vm1254_vm15, %v1249_v14, %v1138_v35  ;;  %2232 = vmatpush.msrb.mxu0 %v2666_v9  ;;  %2193 = vmatpush.msrb.mxu2 %v2668_v23  ;;  %v4144_v14 = vld [vmem:[#allocation4 + $0x118] sm:$0xff]  ;;  %v2686_v9 = vld [vmem:[#allocation4 + $0x130] sm:$0xff]  ;;  %v2687_v23 = vld [vmem:[#allocation4 + $0xc0] sm:$0xff] }
 0x33a   :  { %2215 = vmatpush.msrb.mxu3 %v2669_v5  ;;  %v2561_v55 = vpop.eup %2560  ;;  %2259 = vmatpush.msra.mxu1 %v4122_v33  ;;  %v1265_v34 = vsel %vm4713_vm3, %v1257_v40, %v1166_v53  ;;  %v4147_v40 = vld [vmem:[#allocation4 + $0xf8] sm:$0xff]  ;;  %v2688_v5 = vld [vmem:[#allocation4 + $0xc8] sm:$0xff]  ;;  %v2690_v53 = vld [vmem:[#allocation4 + $0x110] sm:$0xff]  ;;  %vm4722_vm3 = vcmask 1044480  }
 0x33b   :  { %2233 = vmatpush.msrb.mxu0 %v2670_v31  ;;  %v4125_v35 = vmul.f32 %v2561_v55, %v1724_v50  ;;  %2194 = vmatpush.msrb.mxu2 %v2672_v58  ;;  %v4150_v55 = vld [vmem:[#allocation4 + $0xd8] sm:$0xff]  ;;  %v2691_v50 = vld [vmem:[#allocation4 + $0xa0] sm:$0xff]  ;;  %v2692_v31 = vld [vmem:[#allocation4 + $0xa8] sm:$0xff] }
 0x33c   :  { %v1194_v37 = vpop.permute.xlu0 %1193  ;;  %2216 = vmatpush.msrb.mxu3 %v2673_v20  ;;  %2260 = vmatpush.msra.mxu1 %v4129_v54  ;;  %v2695_v58 = vld [vmem:[#allocation4 + $0x80] sm:$0xff]  ;;  %v2696_v20 = vld [vmem:[#allocation4 + $0x88] sm:$0xff] }
 0x33d   :  { %v1273_v4 = vsel %vm4714_vm4, %v1265_v34, %v1194_v37  ;;  %2234 = vmatpush.msrb.mxu0 %v2674_v10  ;;  %1755 = vmatmul.f32.gmra.mxu2 %v4125_v35  ;;  %v4153_v37 = vld [vmem:[#allocation4 + $0xb8] sm:$0xff]  ;;  %v2694_v34 = vld [vmem:[#allocation4 + $0xf0] sm:$0xff]  ;;  %v2699_v10 = vld [vmem:[#allocation4 + $0x60] sm:$0xff]  ;;  %vm4726_vm4 = vcmask 1041408  }
 0x33e   :  { %1778 = vmatmul.f32.gmra.mxu3 %v4125_v35  ;;  %v1281_v46 = vsel %vm4715_vm10, %v1273_v4, %v1222_v2  ;;  %1824 = vmatmul.f32.gmra.mxu1 %v4125_v35  ;;  %v4156_v2 = vld [vmem:[#allocation4 + $0x98] sm:$0xff]  ;;  %v2698_v4 = vld [vmem:[#allocation4 + $0xd0] sm:$0xff] }
 0x33f   :  { %v1292_v52 = vmul.f32 %v4139_v8, %v1281_v46  ;;  %2235 = vmatpush.msrb.mxu0 %v2677_v7  ;;  %2195 = vmatpush.msrb.mxu2 %v2678_v16  ;;  %v2700_v46 = vld [vmem:[#allocation4 + $0x68] sm:$0xff]  ;;  %v2702_v7 = vld [vmem:[#allocation4 + $0xb0] sm:$0xff]  ;;  %v2703_v16 = vld [vmem:[#allocation4 + $0x40] sm:$0xff] }
 0x340   :  { %1801 = vmatmul.f32.gmra.mxu0 %v4125_v35  ;;  %2217 = vmatpush.msrb.mxu3 %v2680_v56  ;;  %v2706_v56 = vld [vmem:[#allocation4 + $0x90] sm:$0xff] }
 0x341   :  { %v1304_v0 = vsel %vm4716_vm9, %v1292_v52, 0.0  ;;  %2236 = vmatpush.msrb.mxu0 %v2679_v1  ;;  %2261 = vmatpush.msra.mxu1 %v4144_v14  ;;  %v4159_v52 = vld [vmem:[#allocation4 + $0x78] sm:$0xff] }
 0x342   :  { %1305 = vadd.xlane.f32.xlu0 %v1304_v0  ;;  %2196 = vmatpush.msrb.mxu2 %v2683_v29  ;;  %v2704_v0 = vld [vmem:[#allocation4 + $0x48] sm:$0xff]  ;;  %v4162_v1 = vld [vmem:[#allocation4 + $0x58] sm:$0xff] }
 0x343   :  { %2237 = vmatpush.msrb.mxu0 %v2682_v61  ;;  %2218 = vmatpush.msrb.mxu3 %v2684_v22  ;;  %v2707_v61 = vld [vmem:[#allocation4 + $0x20] sm:$0xff]  ;;  %v2708_v29 = vld [vmem:[#allocation4 + $0x28] sm:$0xff]  ;;  %v4165_v22 = vld [vmem:[#allocation4 + $0x38] sm:$0xff] }
 0x344   :  { %2262 = vmatpush.msra.mxu1 %v4147_v40  ;;  %2197 = vmatpush.msrb.mxu2 %v2687_v23  ;;  %v2711_v23 = vld [vmem:[#allocation4] sm:$0xff] }
 0x345   :  { %2238 = vmatpush.msrb.mxu0 %v2686_v9  ;;  %2219 = vmatpush.msrb.mxu3 %v2688_v5  ;;  %v2710_v9 = vld [vmem:[#allocation4 + $0x70] sm:$0xff]  ;;  %v2712_v5 = vld [vmem:[#allocation4 + $0x8] sm:$0xff] }
 0x346   :  { %2263 = vmatpush.msra.mxu1 %v4150_v55  ;;  %2198 = vmatpush.msrb.mxu2 %v2691_v50  ;;  %v2714_v50 = vld [vmem:[#allocation4 + $0x50] sm:$0xff] }
 0x347   :  { %2239 = vmatpush.msrb.mxu0 %v2690_v53  ;;  %2220 = vmatpush.msrb.mxu3 %v2692_v31  ;;  %v4168_v53 = vld [vmem:[#allocation4 + $0x18] sm:$0xff]  ;;  %v2715_v31 = vld [vmem:[#allocation4 + $0x30] sm:$0xff] }
 0x348   :  { %2264 = vmatpush.msra.mxu1 %v4153_v37  ;;  %2199 = vmatpush.msrb.mxu2 %v2695_v58  ;;  %v771_v58 = vpop.permute.xlu1 %770 }
 0x349   :  { %2240 = vmatpush.msrb.mxu0 %v2694_v34  ;;  %2221 = vmatpush.msrb.mxu3 %v2696_v20  ;;  %v2716_v34 = vld [vmem:[#allocation4 + $0x10] sm:$0xff]  ;;  %v4618_v20 = vrot.slane %v3721_v12, 5 }
 0x34a   :  { %2265 = vmatpush.msra.mxu1 %v4156_v2  ;;  %2200 = vmatpush.msrb.mxu2 %v2699_v10 }
 0x34b   :  { %2241 = vmatpush.msrb.mxu0 %v2698_v4  ;;  %2222 = vmatpush.msrb.mxu3 %v2700_v46  ;;  %v1091_v4 = vpop.permute.xlu0 %1090  ;;  %v741_v10 = vsel %vm81_vm5, %v738_v60, %v4618_v20 }
 0x34c   :  { %2266 = vmatpush.msra.mxu1 %v4159_v52  ;;  %2201 = vmatpush.msrb.mxu2 %v2703_v16  ;;  %v788_v46 = vmul.f32 %v771_v58, %v741_v10 }
 0x34d   :  { %2242 = vmatpush.msrb.mxu0 %v2702_v7  ;;  %2223 = vmatpush.msrb.mxu3 %v2704_v0  ;;  %v1119_v7 = vpop.permute.xlu2 %1118 }
 0x34e   :  { %2267 = vmatpush.msra.mxu1 %v4162_v1  ;;  %2202 = vmatpush.msrb.mxu2 %v2707_v61  ;;  %v1242_v16 = vsel %vm1238_vm13, %v788_v46, %v1091_v4  ;;  %v2717_v4 = vld [vmem:[%s4539_s0 + $0x10] sm:$0xff]  ;;  %v710_v46 = vpop.f32.mrf.mxu0 }
 0x34f   :  { %2243 = vmatpush.msrb.mxu0 %v2706_v56  ;;  %2224 = vmatpush.msrb.mxu3 %v2708_v29  ;;  %v1250_v56 = vsel %vm1246_vm14, %v1242_v16, %v1119_v7  ;;  %v711_v7 = vadd.f32 %v3872_v63, %v710_v46 }
 0x350   :  { %2268 = vmatpush.msra.mxu1 %v4165_v22  ;;  %2203 = vmatpush.msrb.mxu2 %v2711_v23  ;;  %v1140_v0 = vpop.permute.xlu1 %1139 }
 0x351   :  { %2244 = vmatpush.msrb.mxu0 %v2710_v9  ;;  %2225 = vmatpush.msrb.mxu3 %v2712_v5  ;;  %v1258_v29 = vsel %vm1254_vm15, %v1250_v56, %v1140_v0  ;;  %v4200_v16 = vmax.f32 %v711_v7, 0.0 }
 0x352   :  { %2269 = vmatpush.msra.mxu1 %v4168_v53 }
 0x353   :  { %2245 = vmatpush.msrb.mxu0 %v2714_v50  ;;  %v1168_v61 = vpop.permute.xlu0 %1167 }
 0x354   :  { %v1266_v9 = vsel %vm4717_vm12, %v1258_v29, %v1168_v61  ;;  %v2371_v61 = vrot.slane %v3787_v30, 7  ;;  %v2718_v29 = vld [vmem:[%s4539_s0 + $0x18] sm:$0xff] }
 0x355   :  { %2246 = vmatpush.msrb.mxu0 %v2715_v31  ;;  %v1196_v23 = vpop.permute.xlu2 %1195 }
 0x356   :  { %1002 = vperm.xlu0 %2511, %v4045_v62   ;;  %v1274_v50 = vsel %vm4718_vm2, %v1266_v9, %v1196_v23 }
 0x357   :  { %2247 = vmatpush.msrb.mxu0 %v2716_v34 }
 0x35e   :  { %2525 = vset.pattern.permute.xlu0 %v4692_v41 }
 0x391   :  { %v1224_v5 = vpop.permute.xlu1 %1223 }
 0x392   :  { %v1282_v28 = vsel %vm4719_vm11, %v1274_v50, %v1224_v5  ;;  %v4619_v5 = vrot.slane %v4200_v16, 3 }
 0x393   :  { %v1293_v60 = vmul.f32 %v4139_v8, %v1282_v28 }
 0x394   :  { %v1030_v63 = vsel %vm4722_vm3, %v1027_v27, %v4619_v5 }
 0x395   :  { %v1307_v31 = vsel %vm4720_vm0, %v1293_v60, 0.0  ;;  %v4723_v60 = vmov 2  }
 0x396   :  { %1308 = vadd.xlane.f32.xlu2 %v1307_v31  ;;  %v4724_v31 = vmov 4  }
 0x3ab   :  { %v1822_v46 = vpop.f32.mrf.mxu1 }
 0x3ae   :  { %1059 = vperm.xlu2 %2512, %v4045_v62  }
 0x3b5   :  { %v1306_v34 = vpop.xlane.xlu0 %1305 }
 0x3b6   :  { %v1323_v58 = vadd.f32 %v3736_v11, %v1306_v34  ;;  %2516 = vset.pattern.permute.xlu2 %v4696_v59  ;;  %v832_v34 = vpop.permute.xlu1 %831 }
 0x3b7   :  { %1006 = vperm.xlu2 %2516, %v3827_v42  }
 0x3b8   :  { %v1330_v10 = vsub.f32 %v2717_v4, %v1323_v58 }
 0x3ba   :  { %1383 = vperm.xlu1 %2508, %v1330_v10  }
 0x3bf   :  { %2518 = vset.pattern.permute.xlu2 %v4692_v41 }
 0x3c0   :  { %774 = vperm.xlu2 %2518, %v4045_v62  }
 0x3c8   :  { %1141 = vrot.lane.b32.xlu2 %v3883_v47, %s2798_s13 }
 0x3c9   :  { %2524 = vset.pattern.permute.xlu2 %v4661_v19 }
 0x409   :  { %v1309_v0 = vpop.xlane.xlu2 %1308 }
 0x40a   :  { %v1324_v56 = vadd.f32 %v3736_v11, %v1309_v0 }
 0x40c   :  { %v1331_v9 = vsub.f32 %v2718_v29, %v1324_v56  ;;  %v2374_v23 = vrot.slane %v1324_v56, 6  ;;  %v4229_v29 = vpop.f32.mrf.mxu0 }
 0x40e   :  { %v4209_v50 = vsel %vm4721_vm1, %v2371_v61, %v2374_v23  ;;  %1388 = vperm.xlu1 %2508, %v1331_v9   ;;  %v1776_v61 = vpop.f32.mrf.mxu3 }
 0x411   :  { %v1060_v28 = vpop.permute.xlu2 %1059 }
 0x412   :  { %v1074_v30 = vmul.f32 %v1060_v28, %v1030_v63 }
 0x414   :  { %1225 = vrot.lane.b32.xlu2 %v1074_v30, %s2802_s18 }
 0x416   :  { %2509 = vset.pattern.permute.xlu1 %v4723_v60 }
 0x417   :  { %888 = vperm.xlu1 %2509, %v4045_v62  }
 0x41f   :  { %2510 = vset.pattern.permute.xlu1 %v4724_v31 }
 0x420   :  { %945 = vperm.xlu1 %2510, %v4045_v62   ;;  %v1753_v62 = vpop.f32.mrf.mxu2 }
 0x428   :  { %2513 = vset.pattern.permute.xlu1 %v4690_v21 }
 0x429   :  { %835 = vperm.xlu1 %2513, %v3827_v42  }
 0x42c   :  { %v1384_v58 = vpop.permute.xlu1 %1383 }
 0x42d   :  { %v1391_v27 = vmul.f32 %v1384_v58, %v3932_v38  ;;  %v1392_v4 = vmul.f32 %v1384_v58, %v3934_v26  ;;  %v1394_v10 = vmul.f32 %v1384_v58, %v3936_v3 }
 0x42f   :  { %v1399_v7 = vadd.f32 %v1391_v27, %v3938_v32  ;;  %v1400_v0 = vadd.f32 %v1392_v4, %v3940_v57  ;;  %v1402_v56 = vadd.f32 %v1394_v10, %v3942_v49  ;;  %v4233_v27 = vpop.f32.mrf.mxu0 }
 0x430   :  { %4725 = vst [vmem:[#allocation25_spill] sm:$0xff] %v4233_v27 }
 0x431   :  { %v1828_v9 = vadd.f32 %v1753_v62, %v1399_v7  ;;  %v1829_v23 = vadd.f32 %v1776_v61, %v1400_v0  ;;  %v1831_v63 = vadd.f32 %v1822_v46, %v1402_v56  ;;  %2514 = vset.pattern.permute.xlu1 %v4723_v60  ;;  %v1393_v46 = vmul.f32 %v1384_v58, %v3950_v43 }
 0x432   :  { %892 = vperm.xlu1 %2514, %v3827_v42  }
 0x433   :  { %v2426_v28 = vmul.f32 -1.442695, %v1828_v9  ;;  %v2428_v30 = vmul.f32 -1.442695, %v1829_v23  ;;  %v2430_v20 = vmul.f32 -1.442695, %v1831_v63  ;;  %v1401_v61 = vadd.f32 %v1393_v46, %v3953_v51 }
 0x435   :  { %2562 = vpow2.f32 %v2426_v28 }
 0x436   :  { %2564 = vpow2.f32 %v2428_v30 }
 0x437   :  { %2566 = vpow2.f32 %v2430_v20  ;;  %v799_v20 = vrot.slane %v3883_v47, 6  ;;  %v1799_v9 = vpop.f32.mrf.mxu0 }
 0x438   :  { %v1830_v63 = vadd.f32 %v1799_v9, %v1401_v61 }
 0x43a   :  { %2515 = vset.pattern.permute.xlu1 %v4724_v31 }
 0x43b   :  { %v2563_v4 = vpop.eup %2562  ;;  %949 = vperm.xlu1 %2515, %v3827_v42  }
 0x43c   :  { %v2565_v10 = vpop.eup %2564  ;;  %v1842_v7 = vadd.f32 1.0, %v2563_v4 }
 0x43d   :  { %v2567_v0 = vpop.eup %2566  ;;  %v1880_v56 = vadd.f32 1.0, %v2565_v10  ;;  %v800_v10 = vsel %vm4726_vm4, %v797_v6, %v799_v20 }
 0x43e   :  { %2568 = vrcp.f32 %v1842_v7  ;;  %v1920_v62 = vadd.f32 1.0, %v2567_v0  ;;  %v1855_v0 = vand.u32 2147483648, %v1842_v7  ;;  %v1853_v61 = vand.u32 2147483647, %v1842_v7 }
 0x43f   :  { %2570 = vrcp.f32 %v1880_v56  ;;  %v1893_v9 = vand.u32 2147483648, %v1880_v56  ;;  %v1891_v13 = vand.u32 2147483647, %v1880_v56  ;;  %vm1849_vm12 = vweird.f32 %v1842_v7 }
 0x440   :  { %2572 = vrcp.f32 %v1920_v62  ;;  %v1856_v31 = vor.u32 1.1754944e-38, %v1855_v0  ;;  %vm1887_vm11 = vweird.f32 %v1880_v56  ;;  %vm1854_vm0 = vcmp.eq.f32.partialorder %v1853_v61, 8.507059e+37 }
 0x441   :  { %2574 = vtanh.f32 %v1830_v63  ;;  %v1894_v63 = vor.u32 1.1754944e-38, %v1893_v9  ;;  %vm1892_vm3 = vcmp.eq.f32.partialorder %v1891_v13, 8.507059e+37  ;;  %v972_v9 = vrot.slane %v4200_v16, 2 }
 0x443   :  { %2517 = vset.pattern.permute.xlu1 %v4661_v19 }
 0x444   :  { %v2569_v23 = vpop.eup %2568  ;;  %1063 = vperm.xlu1 %2517, %v3827_v42   ;;  %v846_v42 = vmul.f32 %v832_v34, %v800_v10 }
 0x445   :  { %v2571_v28 = vpop.eup %2570  ;;  %v1845_v58 = vmul.f32 %v2569_v23, %v1842_v7  ;;  %vm1850_vm10 = vweird.f32 %v2569_v23 }
 0x446   :  { %v1883_v30 = vmul.f32 %v2571_v28, %v1880_v56  ;;  %v2573_v4 = vpop.eup %2572  ;;  %vm1888_vm9 = vweird.f32 %v2571_v28  ;;  %vm1851_vm2 = vmor %vm1849_vm12, %vm1850_vm10  ;;  %vm1927_vm10 = vweird.f32 %v1920_v62 }
 0x447   :  { %v1846_v46 = vsub.f32 1.0, %v1845_v58  ;;  %v1923_v45 = vmul.f32 %v2573_v4, %v1920_v62  ;;  %vm1889_vm1 = vmor %vm1887_vm11, %vm1888_vm9  ;;  %vm1928_vm4 = vweird.f32 %v2573_v4  ;;  %vm4730_vm11 = vcmask 1045504  }
 0x448   :  { %v1884_v5 = vsub.f32 1.0, %v1883_v30  ;;  %v2575_v30 = vpop.eup %2574  ;;  %vm1929_vm9 = vmor %vm1927_vm10, %vm1928_vm4 }
 0x449   :  { %v1847_v19 = vmul.f32 %v2569_v23, %v1846_v46  ;;  %v1924_v59 = vsub.f32 1.0, %v1923_v45 }
 0x44a   :  { %v1885_v36 = vmul.f32 %v2571_v28, %v1884_v5 }
 0x44b   :  { %v1848_v27 = vadd.f32 %v2569_v23, %v1847_v19  ;;  %v1925_v7 = vmul.f32 %v2573_v4, %v1924_v59 }
 0x44c   :  { %1092 = vrot.lane.b32.xlu1 %v846_v42, %s2799_s14  ;;  %v1886_v6 = vadd.f32 %v2571_v28, %v1885_v36  ;;  %v1933_v36 = vand.u32 2147483648, %v1920_v62 }
 0x44d   :  { %v1852_v58 = vsel %vm1851_vm2, %v2569_v23, %v1848_v27  ;;  %2519 = vset.pattern.permute.xlu1 %v4692_v41  ;;  %v1926_v19 = vadd.f32 %v2573_v4, %v1925_v7  ;;  %v1931_v27 = vand.u32 2147483647, %v1920_v62  ;;  %vm4728_vm2 = vcmask 1040384  }
 0x44e   :  { %v1857_v34 = vsel %vm1854_vm0, %v1856_v31, %v1852_v58  ;;  %v1890_v5 = vsel %vm1889_vm1, %v2571_v28, %v1886_v6  ;;  %v1934_v23 = vor.u32 1.1754944e-38, %v1933_v36  ;;  %v1003_v6 = vpop.permute.xlu0 %1002  ;;  %vm4732_vm0 = vcmask 1046528  }
 0x44f   :  { %v1954_v10 = vmul.f32 %v2575_v30, %v1857_v34  ;;  %v1895_v46 = vsel %vm1892_vm3, %v1894_v63, %v1890_v5  ;;  %v1930_v56 = vsel %vm1929_vm9, %v2573_v4, %v1926_v19  ;;  %vm1932_vm12 = vcmp.eq.f32.partialorder %v1931_v27, 8.507059e+37 }
 0x450   :  { %v1952_v45 = vmul.f32 %v1895_v46, %v4019_v48  ;;  %v1935_v13 = vsel %vm1932_vm12, %v1934_v23, %v1930_v56  ;;  %v915_v63 = vrot.slane %v4200_v16, 1  ;;  %v4731_v27 = vrot.slane %v3883_v47, 1 }
 0x451   :  { %vm4733_vm1 = vcmask 1041408  }
 0x452   :  { %v4250_v0 = vadd.f32 %v1954_v10, %v1952_v45  ;;  %v4729_v10 = vrot.slane %v3883_v47, 2  ;;  %v916_v56 = vsel %vm4732_vm0, %v4731_v27, %v915_v63 }
 0x454   :  { %2576 = vtanh.f32 %v4250_v0  ;;  %v973_v46 = vsel %vm4730_vm11, %v4729_v10, %v972_v9 }
 0x455   :  { %v1017_v45 = vmul.f32 %v1003_v6, %v973_v46  ;;  %v4317_v6 = vld [vmem:[%s4542_s3] ss:$0 sm:$0xff] }
 0x45a   :  { %v2577_v31 = vpop.eup %2576 }
 0x45b   :  { %v1960_v28 = vmul.f32 %v2577_v31, %v1935_v13  ;;  %v1802_v13 = vpop.f32.mrf.mxu0 }
 0x45d   :  { %1978 = vmatmul.f32.vlgmr.msra.gmra.mxu2 %v1960_v28  ;;  %2001 = vmatmul.f32.vlgmr.msra.gmra.mxu3 %v1960_v28 }
 0x45e   :  { %2024 = vmatmul.f32.vlgmr.msra.gmra.mxu0 %v1960_v28  ;;  %2047 = vmatmul.f32.vlgmr.msrb.gmra.mxu1 %v1960_v28 }
 0x45f   :  { %2441 = vmatpush.msra.mxu2 %v4080_v44 }
 0x461   :  { %2442 = vmatpush.msra.mxu2 %v4083_v25 }
 0x463   :  { %2443 = vmatpush.msra.mxu2 %v4097_v17  ;;  %v1825_v17 = vpop.f32.mrf.mxu1 }
 0x465   :  { %2444 = vmatpush.msra.mxu2 %v4110_v24 }
 0x467   :  { %2445 = vmatpush.msra.mxu2 %v4119_v18 }
 0x469   :  { %2446 = vmatpush.msra.mxu2 %v4122_v33 }
 0x46b   :  { %2447 = vmatpush.msra.mxu2 %v4129_v54  ;;  %v1756_v54 = vpop.f32.mrf.mxu2 }
 0x46d   :  { %2448 = vmatpush.msra.mxu2 %v4144_v14  ;;  %v1779_v14 = vpop.f32.mrf.mxu3 }
 0x46f   :  { %2449 = vmatpush.msra.mxu2 %v4147_v40 }
 0x471   :  { %2450 = vmatpush.msra.mxu2 %v4150_v55 }
 0x473   :  { %2451 = vmatpush.msra.mxu2 %v4153_v37 }
 0x475   :  { %2452 = vmatpush.msra.mxu2 %v4156_v2  ;;  %v856_v2 = vrot.slane %v3883_v47, 7 }
 0x477   :  { %2453 = vmatpush.msra.mxu2 %v4159_v52 }
 0x479   :  { %2454 = vmatpush.msra.mxu2 %v4162_v1 }
 0x47b   :  { %2455 = vmatpush.msra.mxu2 %v4165_v22 }
 0x47d   :  { %2456 = vmatpush.msra.mxu2 %v4168_v53  ;;  %v4727_v53 = vrot.slane %v3721_v12, 7 }
 0x47f   :  { %v857_v62 = vsel %vm4728_vm2, %v4727_v53, %v856_v2 }
 0x480   :  { %v1389_v59 = vpop.permute.xlu1 %1388 }
 0x481   :  { %v1395_v48 = vmul.f32 %v1389_v59, %v3932_v38  ;;  %v1396_v44 = vmul.f32 %v1389_v59, %v3934_v26  ;;  %v1398_v25 = vmul.f32 %v1389_v59, %v3936_v3  ;;  %v1397_v58 = vmul.f32 %v1389_v59, %v3950_v43 }
 0x482   :  { %v801_v59 = vrot.slane %v4200_v16, 6 }
 0x483   :  { %v1403_v24 = vadd.f32 %v1395_v48, %v3938_v32  ;;  %v1404_v18 = vadd.f32 %v1396_v44, %v3940_v57  ;;  %v1406_v33 = vadd.f32 %v1398_v25, %v3942_v49  ;;  %v1405_v36 = vadd.f32 %v1397_v58, %v3953_v51 }
 0x484   :  { %v714_v58 = vadd.f32 %v4317_v6, %v4229_v29 }
 0x485   :  { %v1832_v40 = vadd.f32 %v1756_v54, %v1403_v24  ;;  %v1833_v55 = vadd.f32 %v1779_v14, %v1404_v18  ;;  %v1835_v37 = vadd.f32 %v1825_v17, %v1406_v33  ;;  %v1834_v28 = vadd.f32 %v1802_v13, %v1405_v36 }
 0x486   :  { %v802_v18 = vsel %vm4733_vm1, %v799_v20, %v801_v59  ;;  %v2719_v20 = vld [vmem:[%s4540_s1 + $0x28] sm:$0xff]  ;;  %vm4734_vm1 = vcmask 1040384  }
 0x487   :  { %v2427_v52 = vmul.f32 -1.442695, %v1832_v40  ;;  %v2429_v1 = vmul.f32 -1.442695, %v1833_v55  ;;  %v2431_v22 = vmul.f32 -1.442695, %v1835_v37 }
 0x489   :  { %2578 = vpow2.f32 %v2427_v52  ;;  %v889_v4 = vpop.permute.xlu1 %888 }
 0x48a   :  { %2580 = vpow2.f32 %v2429_v1  ;;  %v903_v61 = vmul.f32 %v889_v4, %v857_v62 }
 0x48b   :  { %2582 = vpow2.f32 %v2431_v22 }
 0x48c   :  { %1120 = vrot.lane.b32.xlu0 %v903_v61, %s2780_s23  ;;  %v858_v61 = vrot.slane %v4200_v16, 7 }
 0x48f   :  { %v2579_v42 = vpop.eup %2578 }
 0x490   :  { %v2581_v30 = vpop.eup %2580  ;;  %v1843_v34 = vadd.f32 1.0, %v2579_v42 }
 0x491   :  { %v2583_v5 = vpop.eup %2582  ;;  %v1881_v7 = vadd.f32 1.0, %v2581_v30 }
 0x492   :  { %2584 = vrcp.f32 %v1843_v34  ;;  %v946_v19 = vpop.permute.xlu1 %945  ;;  %v4296_v23 = vadd.f32 1.0, %v2583_v5  ;;  %v1868_v14 = vand.u32 2147483647, %v1843_v34  ;;  %v1870_v40 = vand.u32 2147483648, %v1843_v34 }
 0x493   :  { %2586 = vrcp.f32 %v1881_v7  ;;  %v960_v31 = vmul.f32 %v946_v19, %v916_v56  ;;  %v1908_v1 = vand.u32 2147483648, %v1881_v7  ;;  %v1906_v62 = vand.u32 2147483647, %v1881_v7 }
 0x494   :  { %1197 = vrot.lane.b32.xlu0 %v1017_v45, %s2800_s15  ;;  %2588 = vrcp.f32 %v4296_v23  ;;  %vm1864_vm10 = vweird.f32 %v1843_v34  ;;  %v1871_v30 = vor.u32 1.1754944e-38, %v1870_v40  ;;  %vm1902_vm12 = vweird.f32 %v1881_v7 }
 0x495   :  { %1169 = vrot.lane.b32.xlu1 %v960_v31, %s2801_s16  ;;  %2590 = vtanh.f32 %v1834_v28  ;;  %vm1869_vm2 = vcmp.eq.f32.partialorder %v1868_v14, 8.507059e+37  ;;  %vm1907_vm0 = vcmp.eq.f32.partialorder %v1906_v62, 8.507059e+37  ;;  %v4324_v31 = vmax.f32 %v714_v58, 0.0 }
 0x498   :  { %v2585_v48 = vpop.eup %2584 }
 0x499   :  { %v2587_v44 = vpop.eup %2586  ;;  %v1860_v25 = vmul.f32 %v2585_v48, %v1843_v34  ;;  %vm1865_vm3 = vweird.f32 %v2585_v48  ;;  %v1909_v34 = vor.u32 1.1754944e-38, %v1908_v1 }
 0x49a   :  { %v1898_v17 = vmul.f32 %v2587_v44, %v1881_v7  ;;  %v4305_v54 = vpop.eup %2588  ;;  %vm1903_vm4 = vweird.f32 %v2587_v44  ;;  %vm1866_vm9 = vmor %vm1864_vm10, %vm1865_vm3  ;;  %v859_v7 = vsel %vm4734_vm1, %v856_v2, %v858_v61  ;;  %v917_v2 = vrot.slane %v4324_v31, 1 }
 0x49b   :  { %v1861_v24 = vsub.f32 1.0, %v1860_v25  ;;  %v836_v33 = vpop.permute.xlu1 %835  ;;  %v1938_v22 = vmul.f32 %v4305_v54, %v4296_v23  ;;  %v2591_v10 = vpop.eup %2590  ;;  %vm1904_vm11 = vmor %vm1902_vm12, %vm1903_vm4  ;;  %vm1943_vm3 = vweird.f32 %v4305_v54  ;;  %vm1942_vm4 = vweird.f32 %v4296_v23 }
 0x49c   :  { %v1899_v55 = vsub.f32 1.0, %v1898_v17  ;;  %v847_v37 = vmul.f32 %v836_v33, %v802_v18  ;;  %v1946_v25 = vand.u32 2147483647, %v4296_v23  ;;  %v1007_v17 = vpop.permute.xlu2 %1006  ;;  %vm1944_vm10 = vmor %vm1942_vm4, %vm1943_vm3  ;;  %vm4736_vm12 = vcmask 1046528  }
 0x49d   :  { %v1862_v52 = vmul.f32 %v2585_v48, %v1861_v24  ;;  %778 = vperm.xlu1 %2519, %v2719_v20   ;;  %v1939_v42 = vsub.f32 1.0, %v1938_v22  ;;  %v918_v40 = vsel %vm4736_vm12, %v915_v63, %v917_v2  ;;  %v4737_v63 = vrot.slane %v4200_v16, 3 }
 0x49e   :  { %v1900_v53 = vmul.f32 %v2587_v44, %v1899_v55  ;;  %1094 = vrot.lane.b32.xlu0 %v847_v37, %s2799_s14  ;;  %v742_v20 = vrot.slane %v3883_v47, 5  ;;  %vm4741_vm1 = vcmask 654336   ;;  %vm4742_vm3 = vcmask 785408  }
 0x49f   :  { %v1863_v4 = vadd.f32 %v2585_v48, %v1862_v52  ;;  %v1940_v56 = vmul.f32 %v4305_v54, %v1939_v42  ;;  %v4739_v42 = vrot.slane %v3721_v12, 5  ;;  %vm4743_vm4 = vcmask 916480   ;;  %vm4746_vm12 = vmmov %vm4742_vm3 }
 0x4a0   :  { %v1901_v5 = vadd.f32 %v2587_v44, %v1900_v53 }
 0x4a1   :  { %v1867_v46 = vsel %vm1866_vm9, %v2585_v48, %v1863_v4  ;;  %v1941_v48 = vadd.f32 %v4305_v54, %v1940_v56  ;;  %vm4735_vm9 = vcmask 1045504   ;;  %v743_v58 = vsel %vm81_vm5, %v4739_v42, %v742_v20 }
 0x4a2   :  { %v1872_v45 = vsel %vm1869_vm2, %v1871_v30, %v1867_v46  ;;  %v1905_v19 = vsel %vm1904_vm11, %v2587_v44, %v1901_v5  ;;  %v974_v44 = vrot.slane %v4324_v31, 2  ;;  %vm1947_vm2 = vcmp.eq.f32.partialorder %v1946_v25, 8.507059e+37 }
 0x4a3   :  { %v1910_v36 = vsel %vm1907_vm0, %v1909_v34, %v1905_v19  ;;  %v1955_v27 = vmul.f32 %v2591_v10, %v1872_v45  ;;  %v1945_v24 = vsel %vm1944_vm10, %v4305_v54, %v1941_v48  ;;  %vm4738_vm11 = vcmask 1044480  }
 0x4a4   :  { %v1953_v29 = vmul.f32 %v1910_v36, %v4086_v15  ;;  %v893_v13 = vpop.permute.xlu1 %892  ;;  %v1948_v15 = vand.u32 2147483648, %v4296_v23  ;;  %v975_v18 = vsel %vm4735_vm9, %v972_v9, %v974_v44  ;;  %v1031_v9 = vrot.slane %v4324_v31, 3  ;;  %v775_v62 = vpop.permute.xlu2 %774  ;;  %vm4745_vm9 = vmmov %vm4741_vm1 }
 0x4a5   :  { %v904_v28 = vmul.f32 %v893_v13, %v859_v7  ;;  %1143 = vrot.lane.b32.xlu1 %v4200_v16, %s2798_s13  ;;  %v1018_v14 = vmul.f32 %v1007_v17, %v975_v18  ;;  %v789_v30 = vmul.f32 %v775_v62, %v743_v58  ;;  %vm4740_vm0 = vcmask 523264  }
 0x4a6   :  { %v4330_v59 = vadd.f32 %v1955_v27, %v1953_v29  ;;  %v1949_v33 = vor.u32 1.1754944e-38, %v1948_v15  ;;  %v1032_v54 = vsel %vm4738_vm11, %v4737_v63, %v1031_v9  ;;  %v744_v13 = vrot.slane %v4200_v16, 5  ;;  %vm4744_vm10 = vmmov %vm4740_vm0 }
 0x4a7   :  { %1122 = vrot.lane.b32.xlu2 %v904_v28, %s2780_s23  ;;  %vm2348_vm11 = vcmask 1047559   ;;  %v4749_v42 = vmov 4   ;;  %v4750_v58 = vmov 5  }
 0x4a8   :  { %2592 = vtanh.f32 %v4330_v59  ;;  %v1950_v1 = vsel %vm1947_vm2, %v1949_v33, %v1945_v24  ;;  %v745_v48 = vsel %vm81_vm5, %v742_v20, %v744_v13  ;;  %vm4747_vm2 = vmmov %vm4743_vm4 }
 0x4ac   :  { %v1142_v5 = vpop.permute.xlu2 %1141 }
 0x4ad   :  { %v950_v55 = vpop.permute.xlu1 %949 }
 0x4ae   :  { %v2593_v37 = vpop.eup %2592  ;;  %v961_v52 = vmul.f32 %v950_v55, %v918_v40 }
 0x4af   :  { %1199 = vrot.lane.b32.xlu2 %v1018_v14, %s2800_s15  ;;  %v4351_v23 = vmul.f32 %v2593_v37, %v1950_v1  ;;  %v4389_v1 = vld [vmem:[%s4548_s9] ss:$0 sm:$0xff] }
 0x4b0   :  { %1171 = vrot.lane.b32.xlu0 %v961_v52, %s2801_s16  ;;  %v2347_v9 = vmul.f32 %v4389_v1, %v4125_v35 }
 0x4b1   :  { %1981 = vmatmul.f32.gmra.mxu2 %v4351_v23  ;;  %2004 = vmatmul.f32.gmra.mxu3 %v4351_v23 }
 0x4b2   :  { %2027 = vmatmul.f32.gmra.mxu0 %v4351_v23  ;;  %2050 = vmatmul.f32.gmra.mxu1 %v4351_v23  ;;  %v2349_v63 = vsel %vm2348_vm11, %v2347_v9, 0.0 }
 0x4b4   :  { %v1226_v27 = vpop.permute.xlu2 %1225 }
 0x4b6   :  { %v1064_v22 = vpop.permute.xlu1 %1063 }
 0x4b7   :  { %v1075_v53 = vmul.f32 %v1064_v22, %v1032_v54  ;;  %v2721_v22 = vld [vmem:[%s4539_s0 + $0x20] sm:$0xff] }
 0x4b9   :  { %1227 = vrot.lane.b32.xlu1 %v1075_v53, %s2802_s18 }
 0x4be   :  { %v1093_v61 = vpop.permute.xlu1 %1092 }
 0x4bf   :  { %v1243_v10 = vsel %vm1238_vm13, %v789_v30, %v1093_v61  ;;  %v2723_v61 = vld [vmem:[%s4540_s1 + $0x38] sm:$0xff] }
 0x4fe   :  { %v1121_v4 = vpop.permute.xlu0 %1120 }
 0x4ff   :  { %v1251_v46 = vsel %vm1246_vm14, %v1243_v10, %v1121_v4  ;;  %v2048_v10 = vpop.f32.mrf.mxu1 }
 0x500   :  { %v1259_v45 = vsel %vm1254_vm15, %v1251_v46, %v1142_v5 }
 0x501   :  { %v1123_v15 = vpop.permute.xlu2 %1122 }
 0x506   :  { %v1198_v19 = vpop.permute.xlu0 %1197 }
 0x507   :  { %v1170_v34 = vpop.permute.xlu1 %1169 }
 0x508   :  { %v1267_v36 = vsel %vm4740_vm0, %v1259_v45, %v1170_v34  ;;  %vm4748_vm0 = vcmask 1041408   ;;  %v1979_v45 = vpop.f32.mrf.mxu2 }
 0x509   :  { %v1275_v47 = vsel %vm4741_vm1, %v1267_v36, %v1198_v19  ;;  %v1200_v14 = vpop.permute.xlu2 %1199  ;;  %v2002_v19 = vpop.f32.mrf.mxu3 }
 0x50a   :  { %v1283_v56 = vsel %vm4742_vm3, %v1275_v47, %v1226_v27 }
 0x50b   :  { %v1294_v12 = vmul.f32 %v4139_v8, %v1283_v56 }
 0x50d   :  { %v1310_v29 = vsel %vm4743_vm4, %v1294_v12, 0.0 }
 0x50e   :  { %1311 = vadd.xlane.f32.xlu0 %v1310_v29 }
 0x50f   :  { %v779_v7 = vpop.permute.xlu1 %778 }
 0x510   :  { %v1095_v28 = vpop.permute.xlu0 %1094  ;;  %v790_v44 = vmul.f32 %v779_v7, %v745_v48 }
 0x512   :  { %v1244_v2 = vsel %vm1238_vm13, %v790_v44, %v1095_v28 }
 0x513   :  { %v1252_v24 = vsel %vm1246_vm14, %v1244_v2, %v1123_v15 }
 0x517   :  { %v1144_v25 = vpop.permute.xlu1 %1143 }
 0x518   :  { %v1260_v18 = vsel %vm1254_vm15, %v1252_v24, %v1144_v25 }
 0x522   :  { %782 = vperm.xlu0 %2525, %v4024_v39   ;;  %v1172_v17 = vpop.permute.xlu0 %1171 }
 0x523   :  { %v1268_v33 = vsel %vm4744_vm10, %v1260_v18, %v1172_v17  ;;  %v2025_v18 = vpop.f32.mrf.mxu0 }
 0x524   :  { %v1276_v16 = vsel %vm4745_vm9, %v1268_v33, %v1200_v14 }
 0x52b   :  { %v1228_v40 = vpop.permute.xlu1 %1227 }
 0x52c   :  { %v1284_v55 = vsel %vm4746_vm12, %v1276_v16, %v1228_v40 }
 0x52d   :  { %v1295_v37 = vmul.f32 %v4139_v8, %v1284_v55  ;;  %v4751_v55 = vld [vmem:[#allocation25_spill] sm:$0xff] }
 0x52f   :  { %v1313_v52 = vsel %vm4747_vm2, %v1295_v37, 0.0  ;;  %v717_v37 = vadd.f32 %v4317_v6, %v4751_v55 }
 0x530   :  { %1314 = vadd.xlane.f32.xlu2 %v1313_v52 }
 0x548   :  { %1067 = vperm.xlu2 %2524, %v4024_v39   ;;  %v2722_v39 = vld [vmem:[%s4539_s0 + $0x28] sm:$0xff] }
 0x54c   :  { %2350 = vadd.xlane.f32.xlu0 %v2349_v63 }
 0x550   :  { %2526 = vset.pattern.permute.xlu2 %v4692_v41 }
 0x581   :  { %v1312_v8 = vpop.xlane.xlu0 %1311 }
 0x582   :  { %v1325_v54 = vadd.f32 %v3736_v11, %v1312_v8 }
 0x584   :  { %v1332_v53 = vsub.f32 %v2721_v22, %v1325_v54 }
 0x586   :  { %1409 = vperm.xlu1 %2519, %v1332_v53  }
 0x5a3   :  { %v1315_v62 = vpop.xlane.xlu2 %1314 }
 0x5a4   :  { %v1326_v35 = vadd.f32 %v3736_v11, %v1315_v62 }
 0x5a6   :  { %v1333_v20 = vsub.f32 %v2722_v39, %v1326_v35  ;;  %v2377_v4 = vrot.slane %v1326_v35, 5  ;;  %v4430_v35 = vmax.f32 %v717_v37, 0.0 }
 0x5a8   :  { %1414 = vperm.xlu1 %2519, %v1333_v20   ;;  %v4406_v41 = vsel %vm4748_vm0, %v4209_v50, %v2377_v4 }
 0x5b0   :  { %2520 = vset.pattern.permute.xlu1 %v4690_v21 }
 0x5b1   :  { %839 = vperm.xlu1 %2520, %v2723_v61  }
 0x5b9   :  { %2521 = vset.pattern.permute.xlu1 %v4723_v60 }
 0x5ba   :  { %896 = vperm.xlu1 %2521, %v2723_v61  }
 0x5c2   :  { %2522 = vset.pattern.permute.xlu1 %v4749_v42 }
 0x5c3   :  { %953 = vperm.xlu1 %2522, %v2723_v61  }
 0x5cb   :  { %2523 = vset.pattern.permute.xlu1 %v4750_v58 }
 0x5cc   :  { %1010 = vperm.xlu1 %2523, %v2723_v61  }
 0x5f8   :  { %v1410_v30 = vpop.permute.xlu1 %1409 }
 0x5f9   :  { %v1417_v50 = vmul.f32 %v1410_v30, %v3932_v38  ;;  %v1418_v5 = vmul.f32 %v1410_v30, %v3934_v26  ;;  %v1420_v21 = vmul.f32 %v1410_v30, %v3936_v3  ;;  %v1419_v15 = vmul.f32 %v1410_v30, %v3950_v43 }
 0x5fb   :  { %v1425_v46 = vadd.f32 %v1417_v50, %v3938_v32  ;;  %v1426_v34 = vadd.f32 %v1418_v5, %v3940_v57  ;;  %v1428_v60 = vadd.f32 %v1420_v21, %v3942_v49  ;;  %v1427_v25 = vadd.f32 %v1419_v15, %v3953_v51 }
 0x5fd   :  { %v2054_v36 = vadd.f32 %v1979_v45, %v1425_v46  ;;  %v2055_v27 = vadd.f32 %v2002_v19, %v1426_v34  ;;  %v2057_v47 = vadd.f32 %v2048_v10, %v1428_v60  ;;  %v2056_v14 = vadd.f32 %v2025_v18, %v1427_v25  ;;  %v2051_v34 = vpop.f32.mrf.mxu1 }
 0x5ff   :  { %v2432_v56 = vmul.f32 -1.442695, %v2054_v36  ;;  %v2434_v12 = vmul.f32 -1.442695, %v2055_v27  ;;  %v2436_v29 = vmul.f32 -1.442695, %v2057_v47  ;;  %v1982_v36 = vpop.f32.mrf.mxu2  ;;  %v2005_v27 = vpop.f32.mrf.mxu3 }
 0x601   :  { %2594 = vpow2.f32 %v2432_v56 }
 0x602   :  { %2596 = vpow2.f32 %v2434_v12 }
 0x603   :  { %2598 = vpow2.f32 %v2436_v29 }
 0x607   :  { %v2595_v7 = vpop.eup %2594 }
 0x608   :  { %v2597_v13 = vpop.eup %2596  ;;  %v2068_v28 = vadd.f32 1.0, %v2595_v7 }
 0x609   :  { %v2599_v48 = vpop.eup %2598  ;;  %v2106_v44 = vadd.f32 1.0, %v2597_v13 }
 0x60a   :  { %2600 = vrcp.f32 %v2068_v28  ;;  %v4422_v2 = vadd.f32 1.0, %v2599_v48  ;;  %v2081_v63 = vand.u32 2147483648, %v2068_v28  ;;  %v2079_v54 = vand.u32 2147483647, %v2068_v28 }
 0x60b   :  { %2602 = vrcp.f32 %v2106_v44  ;;  %vm2075_vm3 = vweird.f32 %v2068_v28  ;;  %v2119_v62 = vand.u32 2147483648, %v2106_v44  ;;  %v2117_v20 = vand.u32 2147483647, %v2106_v44 }
 0x60c   :  { %2604 = vrcp.f32 %v4422_v2  ;;  %v2082_v61 = vor.u32 1.1754944e-38, %v2081_v63  ;;  %vm2113_vm9 = vweird.f32 %v2106_v44  ;;  %vm2080_vm12 = vcmp.eq.f32.partialorder %v2079_v54, 8.507059e+37 }
 0x60d   :  { %2606 = vtanh.f32 %v2056_v14  ;;  %v2120_v10 = vor.u32 1.1754944e-38, %v2119_v62  ;;  %vm2118_vm0 = vcmp.eq.f32.partialorder %v2117_v20, 8.507059e+37  ;;  %v803_v48 = vrot.slane %v4324_v31, 6 }
 0x60e   :  { %v2157_v55 = vand.u32 2147483647, %v4422_v2 }
 0x610   :  { %v2601_v17 = vpop.eup %2600 }
 0x611   :  { %v2603_v24 = vpop.eup %2602  ;;  %v2071_v33 = vmul.f32 %v2601_v17, %v2068_v28  ;;  %vm2076_vm1 = vweird.f32 %v2601_v17  ;;  %v804_v28 = vrot.slane %v4430_v35, 6 }
 0x612   :  { %v2109_v40 = vmul.f32 %v2603_v24, %v2106_v44  ;;  %v4428_v8 = vpop.eup %2604  ;;  %vm2114_vm4 = vweird.f32 %v2603_v24  ;;  %vm2077_vm10 = vmor %vm2075_vm3, %vm2076_vm1  ;;  %vm4752_vm1 = vcmask 1041408  }
 0x613   :  { %v2072_v16 = vsub.f32 1.0, %v2071_v33  ;;  %v2149_v42 = vmul.f32 %v4428_v8, %v4422_v2  ;;  %vm2115_vm2 = vmor %vm2113_vm9, %vm2114_vm4  ;;  %v2607_v46 = vpop.eup %2606  ;;  %v805_v33 = vsel %vm4752_vm1, %v803_v48, %v804_v28  ;;  %vm2154_vm3 = vweird.f32 %v4428_v8 }
 0x614   :  { %v2110_v52 = vsub.f32 1.0, %v2109_v40  ;;  %vm2153_vm4 = vweird.f32 %v4422_v2  ;;  %vm2158_vm9 = vcmp.eq.f32.partialorder %v2157_v55, 8.507059e+37 }
 0x615   :  { %v2073_v9 = vmul.f32 %v2601_v17, %v2072_v16  ;;  %v2150_v56 = vsub.f32 1.0, %v2149_v42 }
 0x616   :  { %v2111_v22 = vmul.f32 %v2603_v24, %v2110_v52 }
 0x617   :  { %v2074_v53 = vadd.f32 %v2601_v17, %v2073_v9 }
 0x618   :  { %v2112_v39 = vadd.f32 %v2603_v24, %v2111_v22 }
 0x619   :  { %v2078_v6 = vsel %vm2077_vm10, %v2601_v17, %v2074_v53  ;;  %vm4453_vm10 = vmor %vm2153_vm4, %vm2154_vm3  ;;  %v861_v53 = vrot.slane %v4430_v35, 7 }
 0x61a   :  { %v1415_v4 = vpop.permute.xlu1 %1414  ;;  %v2083_v5 = vsel %vm2080_vm12, %v2082_v61, %v2078_v6  ;;  %v2116_v21 = vsel %vm2115_vm2, %v2603_v24, %v2112_v39  ;;  %v2151_v24 = vmul.f32 %v4428_v8, %v2150_v56  ;;  %vm4755_vm12 = vcmask 1040384  }
 0x61b   :  { %v1421_v58 = vmul.f32 %v1415_v4, %v3932_v38  ;;  %v1422_v30 = vmul.f32 %v1415_v4, %v3934_v26  ;;  %v1424_v50 = vmul.f32 %v1415_v4, %v3936_v3  ;;  %v2121_v47 = vsel %vm2118_vm0, %v2120_v10, %v2116_v21 }
 0x61c   :  { %v2180_v12 = vmul.f32 %v2607_v46, %v2083_v5  ;;  %v2178_v44 = vmul.f32 %v2121_v47, %v4250_v0  ;;  %v2152_v16 = vadd.f32 %v4428_v8, %v2151_v24  ;;  %v2159_v0 = vand.u32 2147483648, %v4422_v2  ;;  %v2028_v5 = vpop.f32.mrf.mxu0 }
 0x61d   :  { %v1429_v60 = vadd.f32 %v1421_v58, %v3938_v32  ;;  %v1430_v45 = vadd.f32 %v1422_v30, %v3940_v57  ;;  %v1432_v19 = vadd.f32 %v1424_v50, %v3942_v49  ;;  %v1423_v52 = vmul.f32 %v1415_v4, %v3950_v43 }
 0x61e   :  { %v2182_v18 = vadd.f32 %v2180_v12, %v2178_v44  ;;  %v2156_v22 = vsel %vm4453_vm10, %v4428_v8, %v2152_v16  ;;  %v2160_v20 = vor.u32 1.1754944e-38, %v2159_v0  ;;  %v860_v4 = vrot.slane %v4324_v31, 7  ;;  %v1068_v16 = vpop.permute.xlu2 %1067 }
 0x61f   :  { %v2058_v29 = vadd.f32 %v1982_v36, %v1429_v60  ;;  %v2059_v7 = vadd.f32 %v2005_v27, %v1430_v45  ;;  %v2061_v13 = vadd.f32 %v2051_v34, %v1432_v19  ;;  %v1431_v61 = vadd.f32 %v1423_v52, %v3953_v51 }
 0x620   :  { %v2161_v42 = vsel %vm2158_vm9, %v2160_v20, %v2156_v22  ;;  %v862_v30 = vsel %vm4755_vm12, %v860_v4, %v861_v53  ;;  %v919_v10 = vrot.slane %v4430_v35, 1  ;;  %vm4756_vm2 = vcmask 1046528  }
 0x621   :  { %v2433_v15 = vmul.f32 -1.442695, %v2058_v29  ;;  %v2435_v25 = vmul.f32 -1.442695, %v2059_v7  ;;  %v2437_v17 = vmul.f32 -1.442695, %v2061_v13  ;;  %v2060_v21 = vadd.f32 %v2028_v5, %v1431_v61 }
 0x622   :  { %v927_v36 = vsel %vm4756_vm2, %v919_v10, 0.0 }
 0x623   :  { %2608 = vpow2.f32 %v2433_v15  ;;  %v840_v14 = vpop.permute.xlu1 %839 }
 0x624   :  { %2610 = vpow2.f32 %v2435_v25  ;;  %v848_v40 = vmul.f32 %v840_v14, %v805_v33  ;;  %v1033_v25 = vrot.slane %v4430_v35, 3  ;;  %v976_v14 = vrot.slane %v4430_v35, 2 }
 0x625   :  { %2612 = vpow2.f32 %v2437_v17 }
 0x626   :  { %1096 = vrot.lane.b32.xlu1 %v848_v40, %s2799_s14  ;;  %2614 = vtanh.f32 %v2182_v18 }
 0x629   :  { %v2609_v37 = vpop.eup %2608 }
 0x62a   :  { %v2611_v63 = vpop.eup %2610  ;;  %v2069_v54 = vadd.f32 1.0, %v2609_v37 }
 0x62b   :  { %v2613_v62 = vpop.eup %2612  ;;  %v4461_v39 = vadd.f32 1.0, %v2611_v63 }
 0x62c   :  { %v2615_v2 = vpop.eup %2614  ;;  %2616 = vrcp.f32 %v2069_v54  ;;  %v897_v6 = vpop.permute.xlu1 %896  ;;  %v4466_v58 = vadd.f32 1.0, %v2613_v62  ;;  %v2094_v56 = vand.u32 2147483647, %v2069_v54  ;;  %v2096_v12 = vand.u32 2147483648, %v2069_v54 }
 0x62d   :  { %2618 = vrcp.f32 %v4461_v39  ;;  %v2186_v8 = vmul.f32 %v2615_v2, %v2161_v42  ;;  %v905_v50 = vmul.f32 %v897_v6, %v862_v30  ;;  %v2134_v28 = vand.u32 2147483648, %v4461_v39 }
 0x62e   :  { %2620 = vrcp.f32 %v4466_v58  ;;  %v2132_v15 = vand.u32 2147483647, %v4461_v39  ;;  %vm2090_vm3 = vweird.f32 %v2069_v54  ;;  %v2097_v18 = vor.u32 1.1754944e-38, %v2096_v12 }
 0x62f   :  { %2204 = vmatmul.f32.vlgmr.msrb.gmra.mxu2 %v2186_v8  ;;  %2226 = vmatmul.f32.vlgmr.msrb.gmra.mxu3 %v2186_v8  ;;  %2622 = vtanh.f32 %v2060_v21  ;;  %vm2128_vm10 = vweird.f32 %v4461_v39  ;;  %vm2095_vm9 = vcmp.eq.f32.partialorder %v2094_v56, 8.507059e+37  ;;  %v2135_v55 = vor.u32 1.1754944e-38, %v2134_v28 }
 0x630   :  { %2248 = vmatmul.f32.vlgmr.msrb.gmra.mxu0 %v2186_v8  ;;  %2270 = vmatmul.f32.vlgmr.msra.gmra.mxu1 %v2186_v8  ;;  %vm2133_vm2 = vcmp.eq.f32.partialorder %v2132_v15, 8.507059e+37  ;;  %v2174_v61 = vand.u32 2147483648, %v4466_v58  ;;  %v2724_v15 = vld [vmem:[%s4543_s4] ss:$0 sm:$0xff] }
 0x631   :  { %1124 = vrot.lane.b32.xlu1 %v905_v50, %s2780_s23 }
 0x632   :  { %v2617_v46 = vpop.eup %2616  ;;  %v2175_v8 = vor.u32 1.1754944e-38, %v2174_v61 }
 0x633   :  { %v2619_v34 = vpop.eup %2618  ;;  %v2086_v60 = vmul.f32 %v2617_v46, %v2069_v54  ;;  %vm2091_vm0 = vweird.f32 %v2617_v46 }
 0x634   :  { %v2124_v45 = vmul.f32 %v2619_v34, %v4461_v39  ;;  %v2621_v47 = vpop.eup %2620  ;;  %vm2129_vm1 = vweird.f32 %v2619_v34  ;;  %vm2092_vm4 = vmor %vm2090_vm3, %vm2091_vm0  ;;  %vm4757_vm0 = vcmask 1044480   ;;  %vm4758_vm3 = vcmask 1045504  }
 0x635   :  { %v2087_v19 = vsub.f32 1.0, %v2086_v60  ;;  %v954_v27 = vpop.permute.xlu1 %953  ;;  %v2164_v48 = vmul.f32 %v2621_v47, %v4466_v58  ;;  %v2623_v40 = vpop.eup %2622  ;;  %vm2130_vm12 = vmor %vm2128_vm10, %vm2129_vm1  ;;  %v1041_v9 = vsel %vm4757_vm0, %v1033_v25, 0.0  ;;  %v984_v39 = vsel %vm4758_vm3, %v976_v14, 0.0 }
 0x636   :  { %v2125_v29 = vsub.f32 1.0, %v2124_v45  ;;  %v962_v7 = vmul.f32 %v954_v27, %v927_v36  ;;  %v1076_v53 = vmul.f32 %v1068_v16, %v1041_v9  ;;  %vm2169_vm1 = vweird.f32 %v2621_v47  ;;  %v783_v60 = vpop.permute.xlu0 %782 }
 0x637   :  { %v2088_v13 = vmul.f32 %v2617_v46, %v2087_v19  ;;  %v2165_v24 = vsub.f32 1.0, %v2164_v48  ;;  %vm4761_vm0 = vcmask 785408  }
 0x638   :  { %v2126_v44 = vmul.f32 %v2619_v34, %v2125_v29  ;;  %1173 = vrot.lane.b32.xlu2 %v962_v7, %s2801_s16 }
 0x639   :  { %v2089_v17 = vadd.f32 %v2617_v46, %v2088_v13  ;;  %1145 = vrot.lane.b32.xlu1 %v4430_v35, %s2798_s13  ;;  %v2166_v22 = vmul.f32 %v2621_v47, %v2165_v24 }
 0x63a   :  { %v2127_v33 = vadd.f32 %v2619_v34, %v2126_v44 }
 0x63b   :  { %v2093_v0 = vsel %vm2092_vm4, %v2617_v46, %v2089_v17  ;;  %v2167_v6 = vadd.f32 %v2621_v47, %v2166_v22  ;;  %vm2168_vm4 = vweird.f32 %v4466_v58  ;;  %v747_v46 = vrot.slane %v4430_v35, 5 }
 0x63c   :  { %v2098_v37 = vsel %vm2095_vm9, %v2097_v18, %v2093_v0  ;;  %v2131_v52 = vsel %vm2130_vm12, %v2619_v34, %v2127_v33  ;;  %vm2170_vm10 = vmor %vm2168_vm4, %vm2169_vm1  ;;  %v746_v34 = vrot.slane %v4324_v31, 5  ;;  %vm4759_vm12 = vcmask 523264  }
 0x63d   :  { %v2136_v63 = vsel %vm2133_vm2, %v2135_v55, %v2131_v52  ;;  %v2181_v54 = vmul.f32 %v2623_v40, %v2098_v37  ;;  %v2171_v42 = vsel %vm2170_vm10, %v2621_v47, %v2167_v6  ;;  %vm4760_vm2 = vcmask 654336   ;;  %v2725_v40 = vld [vmem:[%s4539_s0 + $0x38] sm:$0xff] }
 0x63e   :  { %v2179_v62 = vmul.f32 %v2136_v63, %v4330_v59  ;;  %v1011_v20 = vpop.permute.xlu1 %1010  ;;  %v2172_v59 = vand.u32 2147483647, %v4466_v58  ;;  %v748_v58 = vsel %vm81_vm5, %v746_v34, %v747_v46  ;;  %v2352_v37 = vmul.f32 %v4389_v1, %v4351_v23 }
 0x63f   :  { %v1019_v2 = vmul.f32 %v1011_v20, %v984_v39  ;;  %v791_v36 = vmul.f32 %v783_v60, %v748_v58 }
 0x640   :  { %v4487_v4 = vadd.f32 %v2181_v54, %v2179_v62  ;;  %1229 = vrot.lane.b32.xlu2 %v1076_v53, %s2802_s18  ;;  %vm2173_vm9 = vcmp.eq.f32.partialorder %v2172_v59, 8.507059e+37  ;;  %v2353_v52 = vsel %vm2348_vm11, %v2352_v37, 0.0 }
 0x641   :  { %1201 = vrot.lane.b32.xlu1 %v1019_v2, %s2800_s15  ;;  %v2176_v50 = vsel %vm2173_vm9, %v2175_v8, %v2171_v42  ;;  %s2804_s15 = smov [#allocation7]  }
 0x642   :  { %2624 = vtanh.f32 %v4487_v4  ;;  %s2399_s16 = sshll.u32 %s2804_s15, 4  ;;  %s2400_s16 = int_to_ptr.vmem [resolvable:$true] %s2399_s16 }
 0x648   :  { %v2625_v30 = vpop.eup %2624 }
 0x649   :  { %v2187_v5 = vmul.f32 %v2625_v30, %v2176_v50 }
 0x64b   :  { %2206 = vmatmul.f32.gmra.mxu2 %v2187_v5  ;;  %2228 = vmatmul.f32.gmra.mxu3 %v2187_v5  ;;  %v2356_v24 = vmul.f32 %v4389_v1, %v2187_v5 }
 0x64c   :  { %2250 = vmatmul.f32.gmra.mxu0 %v2187_v5 }
 0x64d   :  { %v2357_v18 = vsel %vm2348_vm11, %v2356_v24, 0.0 }
 0x653   :  { %2272 = vmatmul.f32.vlgmr.msra.gmra.mxu2 %v2187_v5 }
 0x692   :  { %v1174_v45 = vpop.permute.xlu2 %1173 }
 0x698   :  { %v1097_v21 = vpop.permute.xlu1 %1096 }
 0x699   :  { %v1245_v56 = vsel %vm1238_vm13, %v791_v36, %v1097_v21  ;;  %vm4762_vm13 = vcmask 916480  }
 0x69a   :  { %v1230_v31 = vpop.permute.xlu2 %1229 }
 0x6a3   :  { %v1125_v10 = vpop.permute.xlu1 %1124 }
 0x6a4   :  { %v1253_v12 = vsel %vm1246_vm14, %v1245_v56, %v1125_v10 }
 0x6ab   :  { %v1146_v19 = vpop.permute.xlu1 %1145 }
 0x6ac   :  { %v1261_v29 = vsel %vm1254_vm15, %v1253_v12, %v1146_v19 }
 0x6ad   :  { %v2249_v27 = vpop.f32.mrf.mxu0  ;;  %v2271_v47 = vpop.f32.mrf.mxu1  ;;  %v1269_v35 = vsel %vm4759_vm12, %v1261_v29, %v1174_v45 }
 0x6b2   :  { %v2205_v7 = vpop.f32.mrf.mxu2  ;;  %v2227_v13 = vpop.f32.mrf.mxu3 }
 0x6b3   :  { %v1202_v28 = vpop.permute.xlu1 %1201 }
 0x6b4   :  { %v1277_v48 = vsel %vm4760_vm2, %v1269_v35, %v1202_v28 }
 0x6b5   :  { %v1285_v44 = vsel %vm4761_vm0, %v1277_v48, %v1230_v31 }
 0x6b6   :  { %v1296_v25 = vmul.f32 %v2724_v15, %v1285_v44 }
 0x6b8   :  { %v1316_v17 = vsel %vm4762_vm13, %v1296_v25, 0.0 }
 0x6b9   :  { %1317 = vadd.xlane.f32.xlu1 %v1316_v17 }
 0x6c1   :  { %2358 = vadd.xlane.f32.xlu1 %v2357_v18 }
 0x6c9   :  { %v2251_v50 = vpop.f32.mrf.mxu0 }
 0x6ce   :  { %v2207_v9 = vpop.f32.mrf.mxu2  ;;  %v2229_v39 = vpop.f32.mrf.mxu3 }
 0x6d6   :  { %v2273_v23 = vpop.f32.mrf.mxu2 }
 0x72c   :  { %v1318_v33 = vpop.xlane.xlu1 %1317 }
 0x72d   :  { %v1327_v14 = vadd.f32 %v3736_v11, %v1318_v33 }
 0x72f   :  { %v1334_v16 = vsub.f32 %v2725_v40, %v1327_v14  ;;  %v2380_v0 = vrot.slane %v1327_v14, 4 }
 0x731   :  { %1435 = vperm.xlu2 %2526, %v1334_v16   ;;  %v2384_v55 = vsel %vm81_vm5, %v4406_v41, %v2380_v0 }
 0x75a   :  { %2354 = vadd.xlane.f32.xlu2 %v2353_v52 }
 0x772   :  { %2387 = vperm.xlu2 %2526, %v2384_v55  }
 0x78b   :  { %v1436_v63 = vpop.permute.xlu2 %1435 }
 0x78c   :  { %v1438_v11 = vmul.f32 %v1436_v63, %v3932_v38  ;;  %v1439_v54 = vmul.f32 %v1436_v63, %v3934_v26  ;;  %v1441_v22 = vmul.f32 %v1436_v63, %v3936_v3  ;;  %v1440_v3 = vmul.f32 %v1436_v63, %v3950_v43 }
 0x78e   :  { %v1442_v53 = vadd.f32 %v1438_v11, %v3938_v32  ;;  %v1443_v62 = vadd.f32 %v1439_v54, %v3940_v57  ;;  %v1445_v41 = vadd.f32 %v1441_v22, %v3942_v49  ;;  %v1444_v30 = vadd.f32 %v1440_v3, %v3953_v51  ;;  %v2359_v22 = vpop.xlane.xlu1 %2358 }
 0x790   :  { %v2276_v20 = vadd.f32 %v2207_v9, %v1442_v53  ;;  %v2277_v2 = vadd.f32 %v2229_v39, %v1443_v62  ;;  %v2279_v6 = vadd.f32 %v2273_v23, %v1445_v41  ;;  %v2278_v21 = vadd.f32 %v2251_v50, %v1444_v30 }
 0x791   :  { %v2368_v53 = vstv %s4549_s10 }
 0x792   :  { %v2438_v61 = vmul.f32 -1.442695, %v2276_v20  ;;  %v2439_v59 = vmul.f32 -1.442695, %v2277_v2  ;;  %v2440_v42 = vmul.f32 -1.442695, %v2279_v6 }
 0x794   :  { %2626 = vpow2.f32 %v2438_v61 }
 0x795   :  { %2628 = vpow2.f32 %v2439_v59 }
 0x796   :  { %2630 = vpow2.f32 %v2440_v42 }
 0x79a   :  { %v2627_v38 = vpop.eup %2626 }
 0x79b   :  { %v2629_v26 = vpop.eup %2628  ;;  %v2283_v32 = vadd.f32 1.0, %v2627_v38 }
 0x79c   :  { %v2631_v8 = vpop.eup %2630  ;;  %v2302_v57 = vadd.f32 1.0, %v2629_v26 }
 0x79d   :  { %2632 = vrcp.f32 %v2283_v32  ;;  %v2322_v49 = vadd.f32 1.0, %v2631_v8  ;;  %v2295_v43 = vand.u32 2147483648, %v2283_v32  ;;  %v2293_v27 = vand.u32 2147483647, %v2283_v32 }
 0x79e   :  { %2634 = vrcp.f32 %v2302_v57  ;;  %v2314_v47 = vand.u32 2147483648, %v2302_v57  ;;  %v2312_v51 = vand.u32 2147483647, %v2302_v57  ;;  %vm2289_vm15 = vweird.f32 %v2283_v32 }
 0x79f   :  { %2636 = vrcp.f32 %v2322_v49  ;;  %v2296_v7 = vor.u32 1.1754944e-38, %v2295_v43  ;;  %vm2308_vm1 = vweird.f32 %v2302_v57  ;;  %vm2294_vm4 = vcmp.eq.f32.partialorder %v2293_v27, 8.507059e+37 }
 0x7a0   :  { %2638 = vtanh.f32 %v2278_v21  ;;  %v2315_v35 = vor.u32 1.1754944e-38, %v2314_v47  ;;  %vm2313_vm9 = vcmp.eq.f32.partialorder %v2312_v51, 8.507059e+37  ;;  %v2334_v14 = vand.u32 2147483648, %v2322_v49 }
 0x7a1   :  { %vm2328_vm2 = vweird.f32 %v2322_v49  ;;  %v2332_v40 = vand.u32 2147483647, %v2322_v49 }
 0x7a2   :  { %v2335_v0 = vor.u32 1.1754944e-38, %v2334_v14 }
 0x7a3   :  { %v2633_v5 = vpop.eup %2632  ;;  %vm2333_vm13 = vcmp.eq.f32.partialorder %v2332_v40, 8.507059e+37 }
 0x7a4   :  { %v2635_v10 = vpop.eup %2634  ;;  %v2285_v46 = vmul.f32 %v2633_v5, %v2283_v32  ;;  %vm2290_vm5 = vweird.f32 %v2633_v5 }
 0x7a5   :  { %v2637_v34 = vpop.eup %2636  ;;  %v2304_v60 = vmul.f32 %v2635_v10, %v2302_v57  ;;  %vm2309_vm14 = vweird.f32 %v2635_v10  ;;  %vm2291_vm3 = vmor %vm2289_vm15, %vm2290_vm5 }
 0x7a6   :  { %v2286_v45 = vsub.f32 1.0, %v2285_v46  ;;  %v2324_v58 = vmul.f32 %v2637_v34, %v2322_v49  ;;  %vm2310_vm10 = vmor %vm2308_vm1, %vm2309_vm14  ;;  %v2639_v31 = vpop.eup %2638  ;;  %vm2329_vm12 = vweird.f32 %v2637_v34 }
 0x7a7   :  { %v2305_v19 = vsub.f32 1.0, %v2304_v60  ;;  %vm2330_vm0 = vmor %vm2328_vm2, %vm2329_vm12 }
 0x7a8   :  { %v2287_v36 = vmul.f32 %v2633_v5, %v2286_v45  ;;  %v2325_v29 = vsub.f32 1.0, %v2324_v58 }
 0x7a9   :  { %v2306_v56 = vmul.f32 %v2635_v10, %v2305_v19 }
 0x7aa   :  { %v2288_v12 = vadd.f32 %v2633_v5, %v2287_v36  ;;  %v2326_v25 = vmul.f32 %v2637_v34, %v2325_v29 }
 0x7ab   :  { %v2307_v13 = vadd.f32 %v2635_v10, %v2306_v56 }
 0x7ac   :  { %v2292_v28 = vsel %vm2291_vm3, %v2633_v5, %v2288_v12  ;;  %v2327_v33 = vadd.f32 %v2637_v34, %v2326_v25 }
 0x7ad   :  { %v2297_v48 = vsel %vm2294_vm4, %v2296_v7, %v2292_v28  ;;  %v2311_v44 = vsel %vm2310_vm10, %v2635_v10, %v2307_v13 }
 0x7ae   :  { %v2316_v15 = vsel %vm2313_vm9, %v2315_v35, %v2311_v44  ;;  %v2339_v17 = vmul.f32 %v2639_v31, %v2297_v48  ;;  %v2331_v16 = vsel %vm2330_vm0, %v2637_v34, %v2327_v33 }
 0x7af   :  { %v2338_v24 = vmul.f32 %v2316_v15, %v4487_v4  ;;  %v2336_v37 = vsel %vm2333_vm13, %v2335_v0, %v2331_v16  ;;  %v2351_v4 = vpop.xlane.xlu0 %2350 }
 0x7b1   :  { %v2340_v18 = vadd.f32 %v2339_v17, %v2338_v24 }
 0x7b3   :  { %2640 = vtanh.f32 %v2340_v18 }
 0x7b9   :  { %v2641_v55 = vpop.eup %2640 }
 0x7ba   :  { %v2342_v52 = vmul.f32 %v2641_v55, %v2336_v37 }
 0x7bc   :  { %v2360_v9 = vmul.f32 %v4389_v1, %v2342_v52 }
 0x7be   :  { %v2361_v63 = vsel %vm2348_vm11, %v2360_v9, 0.0 }
 0x7bf   :  { %2362 = vadd.xlane.f32.xlu0 %v2361_v63 }
 0x7cd   :  { %v2355_v11 = vpop.xlane.xlu2 %2354 }
 0x7ce   :  { %v2364_v54 = vsel %vm591_vm6, %v2351_v4, %v2355_v11  ;;  %vm2392_vm6 = vcmask 27648  }
 0x7cf   :  { %v2365_v41 = vsel %vm600_vm7, %v2364_v54, %v2359_v22 }
 0x7d5   :  { %v2388_v20 = vpop.permute.xlu2 %2387 }
 0x832   :  { %v2363_v62 = vpop.xlane.xlu0 %2362 }
 0x833   :  { %v2366_v39 = vsel %vm609_vm8, %v2365_v41, %v2363_v62 }
 0x834   :  { %v2369_v23 = vadd.f32 %v2368_v53, %v2366_v39 }
 0x836   :  { %v2390_v1 = vperm.slane %v2369_v23, 7 }
 0x838   :  { %v2391_v2 = vadd.f32 %v2390_v1, %v2388_v20 }
 0x83a   :  { %2393 = vst.msk [vmem:[#allocation7] sm:$0xf] %vm2392_vm6, %v2391_v2 }
 0x83b   :  { %2404 = dma.vmem_to_hbm [thread:$0]  %s2400_s16, 64, %s2402_s26, [#allocation6]  }
 0x83c   :  { %2776 = dma.done.wait [#allocation6], 64  }
 0x83d   :  { %2777 = vsyncadd [#allocation6], 4294967232 }
 0x83e   :  { %2409 = vsyncpa [#allocation5], 1 }
 0x83f   :  { %2410 = vsyncpa [#allocation6], 1 }

</bundles_post_ra>
